<compile_context>
chip_gen: v5e
topology: v5e:2x2
jax: 0.10.0
libtpu: 0.0.40
codegen_flags: <defaults>
</compile_context>

<pallas_src>
import functools
import jax
import jax.numpy as jnp
from jax.experimental import pallas as pl
from jax.experimental.pallas import tpu as pltpu


# --------------------------------------------------------------------------
# In-kernel helpers (pure jnp, traced inside the Pallas body)
# --------------------------------------------------------------------------
def _layernorm(x, g, b, eps=1e-5):
    mean = jnp.mean(x, axis=-1, keepdims=True)
    var = jnp.mean((x - mean) ** 2, axis=-1, keepdims=True)
    return (x - mean) * jax.lax.rsqrt(var + eps) * g + b


# --------------------------------------------------------------------------
# Single fused kernel:
#   conv(im2col GEMM) -> transformer encoder layer -> GCN x2 -> log_softmax -> fc
# All rows are in graph-node (seq, batch) order throughout.
# --------------------------------------------------------------------------
def _make_fused_kernel(n_batch, seq, d_model, nhead):
    dh = d_model // nhead
    scale = float(dh) ** -0.5
    n_tok = n_batch * seq
    f32 = jnp.float32

    def kernel(cols_ref, mask_ref, a_ref,
               conv_w_ref, conv_b_ref,
               wq_ref, bq_ref, wk_ref, bk_ref, wv_ref, bv_ref,
               wo_ref, bo_ref,
               ln1_g_ref, ln1_b_ref,
               ff1_w_ref, ff1_b_ref, ff2_w_ref, ff2_b_ref,
               ln2_g_ref, ln2_b_ref,
               gcn_w_ref, gcn_b_ref,
               fc_w_ref, fc_b_ref,
               o_ref):
        # --- Conv2d(16->32, k=3, s=1, p=1) as one im2col GEMM ---
        tok = jnp.dot(cols_ref[...], conv_w_ref[...],
                      preferred_element_type=f32) + conv_b_ref[...]

        # --- self-attention: three separate Q/K/V GEMMs (no fused-QKV slicing) ---
        q = (jnp.dot(tok, wq_ref[...], preferred_element_type=f32) + bq_ref[...]) * scale
        k = jnp.dot(tok, wk_ref[...], preferred_element_type=f32) + bk_ref[...]
        v = jnp.dot(tok, wv_ref[...], preferred_element_type=f32) + bv_ref[...]

        mask = mask_ref[...]          # additive: 0 same-batch, -1e9 cross-batch

        # per-head attention over ALL tokens at once, batch isolation via mask;
        # output projection accumulated per head -> no concatenates, no transposes.
        attn = jnp.zeros((n_tok, d_model), f32)
        for h in range(nhead):
            c0 = h * dh
            qh = q[:, c0:c0 + dh]
            kh = k[:, c0:c0 + dh]
            vh = v[:, c0:c0 + dh]
            sc = jax.lax.dot_general(qh, kh, (((1,), (1,)), ((), ())),
                                     preferred_element_type=f32) + mask
            sc = sc - jnp.max(sc, axis=-1, keepdims=True)
            p = jnp.exp(sc)
            p = p / jnp.sum(p, axis=-1, keepdims=True)
            head = jnp.dot(p, vh, preferred_element_type=f32)           # (n_tok, dh)
            attn = attn + jnp.dot(head, wo_ref[c0:c0 + dh, :],
                                  preferred_element_type=f32)
        attn = attn + bo_ref[...]

        # --- residual + LN1 (dropout1 identity in eval mode) ---
        x1 = _layernorm(tok + attn, ln1_g_ref[...], ln1_b_ref[...])

        # --- FFN (f32 weights for parity with the f32 torch reference) ---
        h1 = jnp.dot(x1, ff1_w_ref[...], preferred_element_type=f32) + ff1_b_ref[...]
        h1 = jnp.maximum(h1, 0.0)
        ff = jnp.dot(h1, ff2_w_ref[...], preferred_element_type=f32) + ff2_b_ref[...]

        # --- residual + LN2 (dropout2 identity in eval mode) ---
        x2 = _layernorm(x1 + ff, ln2_g_ref[...], ln2_b_ref[...])
        # rows are already in graph-node (seq, batch) order — no reorder needed.

        # --- GCN tail: A_hat @ (X W) + b, ReLU, same layer again, log_softmax, fc ---
        a = a_ref[...]
        gw = gcn_w_ref[...]
        gb = gcn_b_ref[...]

        g1 = jnp.dot(a, jnp.dot(x2, gw, preferred_element_type=f32),
                     preferred_element_type=f32) + gb
        g1 = jnp.maximum(g1, 0.0)
        # TODO(synk): F.dropout(x, 0.5) applied with eval (identity) semantics.
        g2 = jnp.dot(a, jnp.dot(g1, gw, preferred_element_type=f32),
                     preferred_element_type=f32) + gb

        # log_softmax over dim=1
        m = jnp.max(g2, axis=-1, keepdims=True)
        s = g2 - m
        lse = jnp.log(jnp.sum(jnp.exp(s), axis=-1, keepdims=True))
        ls = s - lse

        # fc: Linear(32 -> 16)
        o_ref[...] = jnp.dot(ls, fc_w_ref[...],
                             preferred_element_type=f32) + fc_b_ref[...]

    return kernel


# --------------------------------------------------------------------------
# JAX / host glue
# --------------------------------------------------------------------------
def im2col_3x3_node_order(x_nhwc):
    """3x3 conv, stride 1, pad 1 -> [H*W*N, 9*C] patch matrix, rows in (seq, batch) order."""
    n, h, w, c = x_nhwc.shape
    xp = jnp.pad(x_nhwc, ((0, 0), (1, 1), (1, 1), (0, 0)))
    patches = []
    for di in range(3):
        for dj in range(3):
            patches.append(xp[:, di:di + h, dj:dj + w, :])
    cols = jnp.concatenate(patches, axis=-1)           # (n, h, w, 9c), rows (b, s)
    cols = jnp.transpose(cols, (1, 2, 0, 3))           # (h, w, n, 9c), rows (s, b)
    return cols.reshape(h * w * n, 9 * c)


def gcn_norm_adj(edge_index, num_nodes):
    """Dense symmetric GCN normalization: D^-1/2 (A + I) D^-1/2 (static graph, run once)."""
    src, dst = edge_index[0], edge_index[1]
    a = jnp.zeros((num_nodes, num_nodes), jnp.float32).at[dst, src].set(1.0)
    a = a + jnp.eye(num_nodes, dtype=jnp.float32)      # add self loops
    deg = jnp.sum(a, axis=1)
    dinv = jax.lax.rsqrt(jnp.maximum(deg, 1e-12))
    return dinv[:, None] * a * dinv[None, :]


def _row(v):
    return v.reshape(1, -1).astype(jnp.float32)


def model_forward(x_nchw, a_norm, attn_mask, params):
    d_model, nhead = 32, 4

    # NCHW -> NHWC -> im2col patches, rows already in graph-node (seq, batch) order
    x = jnp.transpose(x_nchw, (0, 2, 3, 1)).astype(jnp.float32)
    n, h, w, _ = x.shape
    s = h * w
    n_nodes = s * n
    cols = im2col_3x3_node_order(x)                    # (n_nodes, 144)

    operands = (
        cols, attn_mask, a_norm,
        params["conv_w"], _row(params["conv_b"]),
        params["wq"], _row(params["bq"]),
        params["wk"], _row(params["bk"]),
        params["wv"], _row(params["bv"]),
        params["wo"], _row(params["bo"]),
        _row(params["ln1_g"]), _row(params["ln1_b"]),
        params["w_ff1"], _row(params["b_ff1"]),
        params["w_ff2"], _row(params["b_ff2"]),
        _row(params["ln2_g"]), _row(params["ln2_b"]),
        params["gcn_w"], _row(params["gcn_b"]),
        params["fc_w"], _row(params["fc_b"]),
    )

    vmem_specs = [pl.BlockSpec(memory_space=pltpu.MemorySpace.VMEM) for _ in operands]
    cost = pl.CostEstimate(flops=9_400_000, transcendentals=6_000,
                           bytes_accessed=620_000)

    return pl.pallas_call(
        _make_fused_kernel(n, s, d_model, nhead),
        out_shape=jax.ShapeDtypeStruct((n_nodes, 16), jnp.float32),
        in_specs=vmem_specs,
        out_specs=pl.BlockSpec(memory_space=pltpu.MemorySpace.VMEM),
        cost_estimate=cost,
    )(*operands)


# --------------------------------------------------------------------------
# Deterministic parameter init
# --------------------------------------------------------------------------
def init_params(key):
    ks = jax.random.split(key, 10)
    d = 32
    ff = 2048  # TransformerEncoderLayer default dim_feedforward

    def w(k, shape, scale=0.05):
        return (scale * jax.random.normal(k, shape)).astype(jnp.float32)

    return {
        # conv weight in im2col layout [3*3*16, 32]
        "conv_w": w(ks[0], (9 * 16, d)),
        "conv_b": jnp.zeros((d,), jnp.float32),
        # separate Q/K/V projections, (in, out) layout
        "wq": w(ks[1], (d, d)), "bq": jnp.zeros((d,), jnp.float32),
        "wk": w(ks[2], (d, d)), "bk": jnp.zeros((d,), jnp.float32),
        "wv": w(ks[3], (d, d)), "bv": jnp.zeros((d,), jnp.float32),
        "wo": w(ks[4], (d, d)), "bo": jnp.zeros((d,), jnp.float32),
        # transformer FFN (f32 for parity with the torch reference)
        "w_ff1": w(ks[5], (d, ff)),
        "b_ff1": jnp.zeros((ff,), jnp.float32),
        "w_ff2": w(ks[6], (ff, d)),
        "b_ff2": jnp.zeros((d,), jnp.float32),
        # layer norms
        "ln1_g": jnp.ones((d,), jnp.float32), "ln1_b": jnp.zeros((d,), jnp.float32),
        "ln2_g": jnp.ones((d,), jnp.float32), "ln2_b": jnp.zeros((d,), jnp.float32),
        # GCNConv(32, 32) — shared across both calls, as in the torch module
        "gcn_w": w(ks[7], (d, d)), "gcn_b": jnp.zeros((d,), jnp.float32),
        # fc: Linear(32, 16)
        "fc_w": w(ks[8], (d, 16)), "fc_b": jnp.zeros((16,), jnp.float32),
    }


if __name__ == "__main__":
    key = jax.random.PRNGKey(0)
    k_x, k_p = jax.random.split(key)

    # small shapes: batch=2, in_channels=16, spatial=4x4 -> 32 graph nodes
    x = jax.random.normal(k_x, (2, 16, 4, 4), dtype=jnp.float32)
    n_batch, _, hh, ww = x.shape
    n_nodes = n_batch * hh * ww

    # bidirectional ring graph over the 32 nodes
    idx = jnp.arange(n_nodes, dtype=jnp.int32)
    src = jnp.concatenate([idx, (idx + 1) % n_nodes])
    dst = jnp.concatenate([(idx + 1) % n_nodes, idx])
    edge_index = jnp.stack([src, dst], axis=0)          # [2, 64]

    # static graph quantities: computed ONCE, outside the traced/jitted path
    a_norm = gcn_norm_adj(edge_index, n_nodes)
    node_b = jnp.arange(n_nodes, dtype=jnp.int32) % n_batch   # node r = s*n + b -> batch b
    attn_mask = jnp.where(node_b[:, None] == node_b[None, :],
                          0.0, -1e9).astype(jnp.float32)

    params = init_params(k_p)

    fwd = jax.jit(functools.partial(model_forward, params=params))
    out = fwd(x, a_norm, attn_mask)
    jax.block_until_ready(out)

    assert out.shape == (n_nodes, 16), out.shape
    assert bool(jnp.all(jnp.isfinite(out)))
    print("KERNEL_OK")
</pallas_src>

<mosaic_0001>
module attributes {stable_mosaic.version = 11 : i64} {
  func.func @kernel(%arg0: memref<32x144xf32, #tpu.memory_space<vmem>>, %arg1: memref<32x32xf32, #tpu.memory_space<vmem>>, %arg2: memref<32x32xf32, #tpu.memory_space<vmem>>, %arg3: memref<144x32xf32, #tpu.memory_space<vmem>>, %arg4: memref<1x32xf32, #tpu.memory_space<vmem>>, %arg5: memref<32x32xf32, #tpu.memory_space<vmem>>, %arg6: memref<1x32xf32, #tpu.memory_space<vmem>>, %arg7: memref<32x32xf32, #tpu.memory_space<vmem>>, %arg8: memref<1x32xf32, #tpu.memory_space<vmem>>, %arg9: memref<32x32xf32, #tpu.memory_space<vmem>>, %arg10: memref<1x32xf32, #tpu.memory_space<vmem>>, %arg11: memref<32x32xf32, #tpu.memory_space<vmem>>, %arg12: memref<1x32xf32, #tpu.memory_space<vmem>>, %arg13: memref<1x32xf32, #tpu.memory_space<vmem>>, %arg14: memref<1x32xf32, #tpu.memory_space<vmem>>, %arg15: memref<32x2048xf32, #tpu.memory_space<vmem>>, %arg16: memref<1x2048xf32, #tpu.memory_space<vmem>>, %arg17: memref<2048x32xf32, #tpu.memory_space<vmem>>, %arg18: memref<1x32xf32, #tpu.memory_space<vmem>>, %arg19: memref<1x32xf32, #tpu.memory_space<vmem>>, %arg20: memref<1x32xf32, #tpu.memory_space<vmem>>, %arg21: memref<32x32xf32, #tpu.memory_space<vmem>>, %arg22: memref<1x32xf32, #tpu.memory_space<vmem>>, %arg23: memref<32x16xf32, #tpu.memory_space<vmem>>, %arg24: memref<1x16xf32, #tpu.memory_space<vmem>>, %arg25: memref<32x16xf32, #tpu.memory_space<vmem>>) attributes {dimension_semantics = [], scalar_prefetch = 0 : i64, scratch_operands = 0 : i64, tpu.core_type = #tpu.core_type<tc>} {
    %c0 = arith.constant 0 : index
    %c0_0 = arith.constant 0 : index
    %0 = vector.load %arg0[%c0, %c0_0] : memref<32x144xf32, #tpu.memory_space<vmem>>, vector<32x144xf32>
    %c0_1 = arith.constant 0 : index
    %c0_2 = arith.constant 0 : index
    %1 = vector.load %arg3[%c0_1, %c0_2] : memref<144x32xf32, #tpu.memory_space<vmem>>, vector<144x32xf32>
    %cst = arith.constant dense<0.000000e+00> : vector<32x32xf32>
    %2 = tpu.matmul %0, %1, %cst {dimension_numbers = #tpu.dot_dimension_numbers<[1], [0], [0], [1], [0, 0, 1, 1], [], []>} : vector<32x144xf32>, vector<144x32xf32>, vector<32x32xf32> -> vector<32x32xf32>
    %c0_3 = arith.constant 0 : index
    %c0_4 = arith.constant 0 : index
    %3 = vector.load %arg4[%c0_3, %c0_4] : memref<1x32xf32, #tpu.memory_space<vmem>>, vector<1x32xf32>
    %4 = vector.broadcast %3 : vector<1x32xf32> to vector<32x32xf32>
    %5 = arith.addf %2, %4 : vector<32x32xf32>
    %c0_5 = arith.constant 0 : index
    %c0_6 = arith.constant 0 : index
    %6 = vector.load %arg5[%c0_5, %c0_6] : memref<32x32xf32, #tpu.memory_space<vmem>>, vector<32x32xf32>
    %cst_7 = arith.constant dense<0.000000e+00> : vector<32x32xf32>
    %7 = tpu.matmul %5, %6, %cst_7 {dimension_numbers = #tpu.dot_dimension_numbers<[1], [0], [0], [1], [0, 0, 1, 1], [], []>} : vector<32x32xf32>, vector<32x32xf32>, vector<32x32xf32> -> vector<32x32xf32>
    %c0_8 = arith.constant 0 : index
    %c0_9 = arith.constant 0 : index
    %8 = vector.load %arg6[%c0_8, %c0_9] : memref<1x32xf32, #tpu.memory_space<vmem>>, vector<1x32xf32>
    %9 = vector.broadcast %8 : vector<1x32xf32> to vector<32x32xf32>
    %10 = arith.addf %7, %9 : vector<32x32xf32>
    %cst_10 = arith.constant 0.353553385 : f32
    %11 = vector.broadcast %cst_10 : f32 to vector<32x32xf32>
    %12 = arith.mulf %10, %11 : vector<32x32xf32>
    %c0_11 = arith.constant 0 : index
    %c0_12 = arith.constant 0 : index
    %13 = vector.load %arg7[%c0_11, %c0_12] : memref<32x32xf32, #tpu.memory_space<vmem>>, vector<32x32xf32>
    %cst_13 = arith.constant dense<0.000000e+00> : vector<32x32xf32>
    %14 = tpu.matmul %5, %13, %cst_13 {dimension_numbers = #tpu.dot_dimension_numbers<[1], [0], [0], [1], [0, 0, 1, 1], [], []>} : vector<32x32xf32>, vector<32x32xf32>, vector<32x32xf32> -> vector<32x32xf32>
    %c0_14 = arith.constant 0 : index
    %c0_15 = arith.constant 0 : index
    %15 = vector.load %arg8[%c0_14, %c0_15] : memref<1x32xf32, #tpu.memory_space<vmem>>, vector<1x32xf32>
    %16 = vector.broadcast %15 : vector<1x32xf32> to vector<32x32xf32>
    %17 = arith.addf %14, %16 : vector<32x32xf32>
    %c0_16 = arith.constant 0 : index
    %c0_17 = arith.constant 0 : index
    %18 = vector.load %arg9[%c0_16, %c0_17] : memref<32x32xf32, #tpu.memory_space<vmem>>, vector<32x32xf32>
    %cst_18 = arith.constant dense<0.000000e+00> : vector<32x32xf32>
    %19 = tpu.matmul %5, %18, %cst_18 {dimension_numbers = #tpu.dot_dimension_numbers<[1], [0], [0], [1], [0, 0, 1, 1], [], []>} : vector<32x32xf32>, vector<32x32xf32>, vector<32x32xf32> -> vector<32x32xf32>
    %c0_19 = arith.constant 0 : index
    %c0_20 = arith.constant 0 : index
    %20 = vector.load %arg10[%c0_19, %c0_20] : memref<1x32xf32, #tpu.memory_space<vmem>>, vector<1x32xf32>
    %21 = vector.broadcast %20 : vector<1x32xf32> to vector<32x32xf32>
    %22 = arith.addf %19, %21 : vector<32x32xf32>
    %c0_21 = arith.constant 0 : index
    %c0_22 = arith.constant 0 : index
    %23 = vector.load %arg1[%c0_21, %c0_22] : memref<32x32xf32, #tpu.memory_space<vmem>>, vector<32x32xf32>
    %cst_23 = arith.constant 0.000000e+00 : f32
    %24 = vector.broadcast %cst_23 : f32 to vector<32x32xf32>
    %25 = vector.extract_strided_slice %12 {offsets = [0, 0], sizes = [32, 8], strides = [1, 1]} : vector<32x32xf32> to vector<32x8xf32>
    %26 = vector.extract_strided_slice %17 {offsets = [0, 0], sizes = [32, 8], strides = [1, 1]} : vector<32x32xf32> to vector<32x8xf32>
    %27 = vector.extract_strided_slice %22 {offsets = [0, 0], sizes = [32, 8], strides = [1, 1]} : vector<32x32xf32> to vector<32x8xf32>
    %cst_24 = arith.constant dense<0.000000e+00> : vector<32x32xf32>
    %28 = tpu.matmul %25, %26, %cst_24 {dimension_numbers = #tpu.dot_dimension_numbers<[1], [1], [0], [0], [0, 0, 1, 0], [], []>} : vector<32x8xf32>, vector<32x8xf32>, vector<32x32xf32> -> vector<32x32xf32>
    %29 = arith.addf %28, %23 : vector<32x32xf32>
    %cst_25 = arith.constant dense<0xFF800000> : vector<32xf32>
    %30 = vector.multi_reduction <maximumf>, %29, %cst_25 [1] : vector<32x32xf32> to vector<32xf32>
    %31 = vector.shape_cast %30 : vector<32xf32> to vector<32x1xf32>
    %32 = vector.broadcast %31 : vector<32x1xf32> to vector<32x32xf32>
    %33 = arith.subf %29, %32 : vector<32x32xf32>
    %34 = math.exp %33 : vector<32x32xf32>
    %cst_26 = arith.constant dense<0.000000e+00> : vector<32xf32>
    %35 = vector.multi_reduction <add>, %34, %cst_26 [1] : vector<32x32xf32> to vector<32xf32>
    %36 = vector.shape_cast %35 : vector<32xf32> to vector<32x1xf32>
    %37 = vector.broadcast %36 : vector<32x1xf32> to vector<32x32xf32>
    %38 = arith.divf %34, %37 : vector<32x32xf32>
    %cst_27 = arith.constant dense<0.000000e+00> : vector<32x8xf32>
    %39 = tpu.matmul %38, %27, %cst_27 {dimension_numbers = #tpu.dot_dimension_numbers<[1], [0], [0], [1], [0, 0, 1, 1], [], []>} : vector<32x32xf32>, vector<32x8xf32>, vector<32x8xf32> -> vector<32x8xf32>
    %c0_28 = arith.constant 0 : index
    %c0_29 = arith.constant 0 : index
    %40 = vector.load %arg11[%c0_28, %c0_29] : memref<32x32xf32, #tpu.memory_space<vmem>>, vector<8x32xf32>
    %cst_30 = arith.constant dense<0.000000e+00> : vector<32x32xf32>
    %41 = tpu.matmul %39, %40, %cst_30 {dimension_numbers = #tpu.dot_dimension_numbers<[1], [0], [0], [1], [0, 0, 1, 1], [], []>} : vector<32x8xf32>, vector<8x32xf32>, vector<32x32xf32> -> vector<32x32xf32>
    %42 = arith.addf %24, %41 : vector<32x32xf32>
    %43 = vector.extract_strided_slice %12 {offsets = [0, 8], sizes = [32, 8], strides = [1, 1]} : vector<32x32xf32> to vector<32x8xf32>
    %44 = vector.extract_strided_slice %17 {offsets = [0, 8], sizes = [32, 8], strides = [1, 1]} : vector<32x32xf32> to vector<32x8xf32>
    %45 = vector.extract_strided_slice %22 {offsets = [0, 8], sizes = [32, 8], strides = [1, 1]} : vector<32x32xf32> to vector<32x8xf32>
    %cst_31 = arith.constant dense<0.000000e+00> : vector<32x32xf32>
    %46 = tpu.matmul %43, %44, %cst_31 {dimension_numbers = #tpu.dot_dimension_numbers<[1], [1], [0], [0], [0, 0, 1, 0], [], []>} : vector<32x8xf32>, vector<32x8xf32>, vector<32x32xf32> -> vector<32x32xf32>
    %47 = arith.addf %46, %23 : vector<32x32xf32>
    %cst_32 = arith.constant dense<0xFF800000> : vector<32xf32>
    %48 = vector.multi_reduction <maximumf>, %47, %cst_32 [1] : vector<32x32xf32> to vector<32xf32>
    %49 = vector.shape_cast %48 : vector<32xf32> to vector<32x1xf32>
    %50 = vector.broadcast %49 : vector<32x1xf32> to vector<32x32xf32>
    %51 = arith.subf %47, %50 : vector<32x32xf32>
    %52 = math.exp %51 : vector<32x32xf32>
    %cst_33 = arith.constant dense<0.000000e+00> : vector<32xf32>
    %53 = vector.multi_reduction <add>, %52, %cst_33 [1] : vector<32x32xf32> to vector<32xf32>
    %54 = vector.shape_cast %53 : vector<32xf32> to vector<32x1xf32>
    %55 = vector.broadcast %54 : vector<32x1xf32> to vector<32x32xf32>
    %56 = arith.divf %52, %55 : vector<32x32xf32>
    %cst_34 = arith.constant dense<0.000000e+00> : vector<32x8xf32>
    %57 = tpu.matmul %56, %45, %cst_34 {dimension_numbers = #tpu.dot_dimension_numbers<[1], [0], [0], [1], [0, 0, 1, 1], [], []>} : vector<32x32xf32>, vector<32x8xf32>, vector<32x8xf32> -> vector<32x8xf32>
    %c8 = arith.constant 8 : index
    %c0_35 = arith.constant 0 : index
    %58 = vector.load %arg11[%c8, %c0_35] : memref<32x32xf32, #tpu.memory_space<vmem>>, vector<8x32xf32>
    %cst_36 = arith.constant dense<0.000000e+00> : vector<32x32xf32>
    %59 = tpu.matmul %57, %58, %cst_36 {dimension_numbers = #tpu.dot_dimension_numbers<[1], [0], [0], [1], [0, 0, 1, 1], [], []>} : vector<32x8xf32>, vector<8x32xf32>, vector<32x32xf32> -> vector<32x32xf32>
    %60 = arith.addf %42, %59 : vector<32x32xf32>
    %61 = vector.extract_strided_slice %12 {offsets = [0, 16], sizes = [32, 8], strides = [1, 1]} : vector<32x32xf32> to vector<32x8xf32>
    %62 = vector.extract_strided_slice %17 {offsets = [0, 16], sizes = [32, 8], strides = [1, 1]} : vector<32x32xf32> to vector<32x8xf32>
    %63 = vector.extract_strided_slice %22 {offsets = [0, 16], sizes = [32, 8], strides = [1, 1]} : vector<32x32xf32> to vector<32x8xf32>
    %cst_37 = arith.constant dense<0.000000e+00> : vector<32x32xf32>
    %64 = tpu.matmul %61, %62, %cst_37 {dimension_numbers = #tpu.dot_dimension_numbers<[1], [1], [0], [0], [0, 0, 1, 0], [], []>} : vector<32x8xf32>, vector<32x8xf32>, vector<32x32xf32> -> vector<32x32xf32>
    %65 = arith.addf %64, %23 : vector<32x32xf32>
    %cst_38 = arith.constant dense<0xFF800000> : vector<32xf32>
    %66 = vector.multi_reduction <maximumf>, %65, %cst_38 [1] : vector<32x32xf32> to vector<32xf32>
    %67 = vector.shape_cast %66 : vector<32xf32> to vector<32x1xf32>
    %68 = vector.broadcast %67 : vector<32x1xf32> to vector<32x32xf32>
    %69 = arith.subf %65, %68 : vector<32x32xf32>
    %70 = math.exp %69 : vector<32x32xf32>
    %cst_39 = arith.constant dense<0.000000e+00> : vector<32xf32>
    %71 = vector.multi_reduction <add>, %70, %cst_39 [1] : vector<32x32xf32> to vector<32xf32>
    %72 = vector.shape_cast %71 : vector<32xf32> to vector<32x1xf32>
    %73 = vector.broadcast %72 : vector<32x1xf32> to vector<32x32xf32>
    %74 = arith.divf %70, %73 : vector<32x32xf32>
    %cst_40 = arith.constant dense<0.000000e+00> : vector<32x8xf32>
    %75 = tpu.matmul %74, %63, %cst_40 {dimension_numbers = #tpu.dot_dimension_numbers<[1], [0], [0], [1], [0, 0, 1, 1], [], []>} : vector<32x32xf32>, vector<32x8xf32>, vector<32x8xf32> -> vector<32x8xf32>
    %c16 = arith.constant 16 : index
    %c0_41 = arith.constant 0 : index
    %76 = vector.load %arg11[%c16, %c0_41] : memref<32x32xf32, #tpu.memory_space<vmem>>, vector<8x32xf32>
    %cst_42 = arith.constant dense<0.000000e+00> : vector<32x32xf32>
    %77 = tpu.matmul %75, %76, %cst_42 {dimension_numbers = #tpu.dot_dimension_numbers<[1], [0], [0], [1], [0, 0, 1, 1], [], []>} : vector<32x8xf32>, vector<8x32xf32>, vector<32x32xf32> -> vector<32x32xf32>
    %78 = arith.addf %60, %77 : vector<32x32xf32>
    %79 = vector.extract_strided_slice %12 {offsets = [0, 24], sizes = [32, 8], strides = [1, 1]} : vector<32x32xf32> to vector<32x8xf32>
    %80 = vector.extract_strided_slice %17 {offsets = [0, 24], sizes = [32, 8], strides = [1, 1]} : vector<32x32xf32> to vector<32x8xf32>
    %81 = vector.extract_strided_slice %22 {offsets = [0, 24], sizes = [32, 8], strides = [1, 1]} : vector<32x32xf32> to vector<32x8xf32>
    %cst_43 = arith.constant dense<0.000000e+00> : vector<32x32xf32>
    %82 = tpu.matmul %79, %80, %cst_43 {dimension_numbers = #tpu.dot_dimension_numbers<[1], [1], [0], [0], [0, 0, 1, 0], [], []>} : vector<32x8xf32>, vector<32x8xf32>, vector<32x32xf32> -> vector<32x32xf32>
    %83 = arith.addf %82, %23 : vector<32x32xf32>
    %cst_44 = arith.constant dense<0xFF800000> : vector<32xf32>
    %84 = vector.multi_reduction <maximumf>, %83, %cst_44 [1] : vector<32x32xf32> to vector<32xf32>
    %85 = vector.shape_cast %84 : vector<32xf32> to vector<32x1xf32>
    %86 = vector.broadcast %85 : vector<32x1xf32> to vector<32x32xf32>
    %87 = arith.subf %83, %86 : vector<32x32xf32>
    %88 = math.exp %87 : vector<32x32xf32>
    %cst_45 = arith.constant dense<0.000000e+00> : vector<32xf32>
    %89 = vector.multi_reduction <add>, %88, %cst_45 [1] : vector<32x32xf32> to vector<32xf32>
    %90 = vector.shape_cast %89 : vector<32xf32> to vector<32x1xf32>
    %91 = vector.broadcast %90 : vector<32x1xf32> to vector<32x32xf32>
    %92 = arith.divf %88, %91 : vector<32x32xf32>
    %cst_46 = arith.constant dense<0.000000e+00> : vector<32x8xf32>
    %93 = tpu.matmul %92, %81, %cst_46 {dimension_numbers = #tpu.dot_dimension_numbers<[1], [0], [0], [1], [0, 0, 1, 1], [], []>} : vector<32x32xf32>, vector<32x8xf32>, vector<32x8xf32> -> vector<32x8xf32>
    %c24 = arith.constant 24 : index
    %c0_47 = arith.constant 0 : index
    %94 = vector.load %arg11[%c24, %c0_47] : memref<32x32xf32, #tpu.memory_space<vmem>>, vector<8x32xf32>
    %cst_48 = arith.constant dense<0.000000e+00> : vector<32x32xf32>
    %95 = tpu.matmul %93, %94, %cst_48 {dimension_numbers = #tpu.dot_dimension_numbers<[1], [0], [0], [1], [0, 0, 1, 1], [], []>} : vector<32x8xf32>, vector<8x32xf32>, vector<32x32xf32> -> vector<32x32xf32>
    %96 = arith.addf %78, %95 : vector<32x32xf32>
    %c0_49 = arith.constant 0 : index
    %c0_50 = arith.constant 0 : index
    %97 = vector.load %arg12[%c0_49, %c0_50] : memref<1x32xf32, #tpu.memory_space<vmem>>, vector<1x32xf32>
    %98 = vector.broadcast %97 : vector<1x32xf32> to vector<32x32xf32>
    %99 = arith.addf %96, %98 : vector<32x32xf32>
    %100 = arith.addf %5, %99 : vector<32x32xf32>
    %c0_51 = arith.constant 0 : index
    %c0_52 = arith.constant 0 : index
    %101 = vector.load %arg13[%c0_51, %c0_52] : memref<1x32xf32, #tpu.memory_space<vmem>>, vector<1x32xf32>
    %c0_53 = arith.constant 0 : index
    %c0_54 = arith.constant 0 : index
    %102 = vector.load %arg14[%c0_53, %c0_54] : memref<1x32xf32, #tpu.memory_space<vmem>>, vector<1x32xf32>
    %cst_55 = arith.constant dense<0.000000e+00> : vector<32xf32>
    %103 = vector.multi_reduction <add>, %100, %cst_55 [1] : vector<32x32xf32> to vector<32xf32>
    %104 = vector.shape_cast %103 : vector<32xf32> to vector<32x1xf32>
    %cst_56 = arith.constant 3.200000e+01 : f32
    %105 = vector.broadcast %cst_56 : f32 to vector<32x1xf32>
    %106 = arith.divf %104, %105 : vector<32x1xf32>
    %107 = vector.broadcast %106 : vector<32x1xf32> to vector<32x32xf32>
    %108 = arith.subf %100, %107 : vector<32x32xf32>
    %109 = arith.mulf %108, %108 : vector<32x32xf32>
    %cst_57 = arith.constant dense<0.000000e+00> : vector<32xf32>
    %110 = vector.multi_reduction <add>, %109, %cst_57 [1] : vector<32x32xf32> to vector<32xf32>
    %111 = vector.shape_cast %110 : vector<32xf32> to vector<32x1xf32>
    %cst_58 = arith.constant 3.200000e+01 : f32
    %112 = vector.broadcast %cst_58 : f32 to vector<32x1xf32>
    %113 = arith.divf %111, %112 : vector<32x1xf32>
    %114 = vector.broadcast %106 : vector<32x1xf32> to vector<32x32xf32>
    %115 = arith.subf %100, %114 : vector<32x32xf32>
    %cst_59 = arith.constant 9.99999974E-6 : f32
    %116 = vector.broadcast %cst_59 : f32 to vector<32x1xf32>
    %117 = arith.addf %113, %116 : vector<32x1xf32>
    %118 = math.rsqrt %117 : vector<32x1xf32>
    %119 = vector.broadcast %118 : vector<32x1xf32> to vector<32x32xf32>
    %120 = arith.mulf %115, %119 : vector<32x32xf32>
    %121 = vector.broadcast %101 : vector<1x32xf32> to vector<32x32xf32>
    %122 = arith.mulf %120, %121 : vector<32x32xf32>
    %123 = vector.broadcast %102 : vector<1x32xf32> to vector<32x32xf32>
    %124 = arith.addf %122, %123 : vector<32x32xf32>
    %c0_60 = arith.constant 0 : index
    %c0_61 = arith.constant 0 : index
    %125 = vector.load %arg15[%c0_60, %c0_61] : memref<32x2048xf32, #tpu.memory_space<vmem>>, vector<32x2048xf32>
    %cst_62 = arith.constant dense<0.000000e+00> : vector<32x2048xf32>
    %126 = tpu.matmul %124, %125, %cst_62 {dimension_numbers = #tpu.dot_dimension_numbers<[1], [0], [0], [1], [0, 0, 1, 1], [], []>} : vector<32x32xf32>, vector<32x2048xf32>, vector<32x2048xf32> -> vector<32x2048xf32>
    %c0_63 = arith.constant 0 : index
    %c0_64 = arith.constant 0 : index
    %127 = vector.load %arg16[%c0_63, %c0_64] : memref<1x2048xf32, #tpu.memory_space<vmem>>, vector<1x2048xf32>
    %128 = vector.broadcast %127 : vector<1x2048xf32> to vector<32x2048xf32>
    %129 = arith.addf %126, %128 : vector<32x2048xf32>
    %cst_65 = arith.constant 0.000000e+00 : f32
    %130 = vector.broadcast %cst_65 : f32 to vector<32x2048xf32>
    %131 = arith.maximumf %129, %130 : vector<32x2048xf32>
    %c0_66 = arith.constant 0 : index
    %c0_67 = arith.constant 0 : index
    %132 = vector.load %arg17[%c0_66, %c0_67] : memref<2048x32xf32, #tpu.memory_space<vmem>>, vector<2048x32xf32>
    %cst_68 = arith.constant dense<0.000000e+00> : vector<32x32xf32>
    %133 = tpu.matmul %131, %132, %cst_68 {dimension_numbers = #tpu.dot_dimension_numbers<[1], [0], [0], [1], [0, 0, 1, 1], [], []>} : vector<32x2048xf32>, vector<2048x32xf32>, vector<32x32xf32> -> vector<32x32xf32>
    %c0_69 = arith.constant 0 : index
    %c0_70 = arith.constant 0 : index
    %134 = vector.load %arg18[%c0_69, %c0_70] : memref<1x32xf32, #tpu.memory_space<vmem>>, vector<1x32xf32>
    %135 = vector.broadcast %134 : vector<1x32xf32> to vector<32x32xf32>
    %136 = arith.addf %133, %135 : vector<32x32xf32>
    %137 = arith.addf %124, %136 : vector<32x32xf32>
    %c0_71 = arith.constant 0 : index
    %c0_72 = arith.constant 0 : index
    %138 = vector.load %arg19[%c0_71, %c0_72] : memref<1x32xf32, #tpu.memory_space<vmem>>, vector<1x32xf32>
    %c0_73 = arith.constant 0 : index
    %c0_74 = arith.constant 0 : index
    %139 = vector.load %arg20[%c0_73, %c0_74] : memref<1x32xf32, #tpu.memory_space<vmem>>, vector<1x32xf32>
    %cst_75 = arith.constant dense<0.000000e+00> : vector<32xf32>
    %140 = vector.multi_reduction <add>, %137, %cst_75 [1] : vector<32x32xf32> to vector<32xf32>
    %141 = vector.shape_cast %140 : vector<32xf32> to vector<32x1xf32>
    %cst_76 = arith.constant 3.200000e+01 : f32
    %142 = vector.broadcast %cst_76 : f32 to vector<32x1xf32>
    %143 = arith.divf %141, %142 : vector<32x1xf32>
    %144 = vector.broadcast %143 : vector<32x1xf32> to vector<32x32xf32>
    %145 = arith.subf %137, %144 : vector<32x32xf32>
    %146 = arith.mulf %145, %145 : vector<32x32xf32>
    %cst_77 = arith.constant dense<0.000000e+00> : vector<32xf32>
    %147 = vector.multi_reduction <add>, %146, %cst_77 [1] : vector<32x32xf32> to vector<32xf32>
    %148 = vector.shape_cast %147 : vector<32xf32> to vector<32x1xf32>
    %cst_78 = arith.constant 3.200000e+01 : f32
    %149 = vector.broadcast %cst_78 : f32 to vector<32x1xf32>
    %150 = arith.divf %148, %149 : vector<32x1xf32>
    %151 = vector.broadcast %143 : vector<32x1xf32> to vector<32x32xf32>
    %152 = arith.subf %137, %151 : vector<32x32xf32>
    %cst_79 = arith.constant 9.99999974E-6 : f32
    %153 = vector.broadcast %cst_79 : f32 to vector<32x1xf32>
    %154 = arith.addf %150, %153 : vector<32x1xf32>
    %155 = math.rsqrt %154 : vector<32x1xf32>
    %156 = vector.broadcast %155 : vector<32x1xf32> to vector<32x32xf32>
    %157 = arith.mulf %152, %156 : vector<32x32xf32>
    %158 = vector.broadcast %138 : vector<1x32xf32> to vector<32x32xf32>
    %159 = arith.mulf %157, %158 : vector<32x32xf32>
    %160 = vector.broadcast %139 : vector<1x32xf32> to vector<32x32xf32>
    %161 = arith.addf %159, %160 : vector<32x32xf32>
    %c0_80 = arith.constant 0 : index
    %c0_81 = arith.constant 0 : index
    %162 = vector.load %arg2[%c0_80, %c0_81] : memref<32x32xf32, #tpu.memory_space<vmem>>, vector<32x32xf32>
    %c0_82 = arith.constant 0 : index
    %c0_83 = arith.constant 0 : index
    %163 = vector.load %arg21[%c0_82, %c0_83] : memref<32x32xf32, #tpu.memory_space<vmem>>, vector<32x32xf32>
    %c0_84 = arith.constant 0 : index
    %c0_85 = arith.constant 0 : index
    %164 = vector.load %arg22[%c0_84, %c0_85] : memref<1x32xf32, #tpu.memory_space<vmem>>, vector<1x32xf32>
    %cst_86 = arith.constant dense<0.000000e+00> : vector<32x32xf32>
    %165 = tpu.matmul %161, %163, %cst_86 {dimension_numbers = #tpu.dot_dimension_numbers<[1], [0], [0], [1], [0, 0, 1, 1], [], []>} : vector<32x32xf32>, vector<32x32xf32>, vector<32x32xf32> -> vector<32x32xf32>
    %cst_87 = arith.constant dense<0.000000e+00> : vector<32x32xf32>
    %166 = tpu.matmul %162, %165, %cst_87 {dimension_numbers = #tpu.dot_dimension_numbers<[1], [0], [0], [1], [0, 0, 1, 1], [], []>} : vector<32x32xf32>, vector<32x32xf32>, vector<32x32xf32> -> vector<32x32xf32>
    %167 = vector.broadcast %164 : vector<1x32xf32> to vector<32x32xf32>
    %168 = arith.addf %166, %167 : vector<32x32xf32>
    %cst_88 = arith.constant 0.000000e+00 : f32
    %169 = vector.broadcast %cst_88 : f32 to vector<32x32xf32>
    %170 = arith.maximumf %168, %169 : vector<32x32xf32>
    %cst_89 = arith.constant dense<0.000000e+00> : vector<32x32xf32>
    %171 = tpu.matmul %170, %163, %cst_89 {dimension_numbers = #tpu.dot_dimension_numbers<[1], [0], [0], [1], [0, 0, 1, 1], [], []>} : vector<32x32xf32>, vector<32x32xf32>, vector<32x32xf32> -> vector<32x32xf32>
    %cst_90 = arith.constant dense<0.000000e+00> : vector<32x32xf32>
    %172 = tpu.matmul %162, %171, %cst_90 {dimension_numbers = #tpu.dot_dimension_numbers<[1], [0], [0], [1], [0, 0, 1, 1], [], []>} : vector<32x32xf32>, vector<32x32xf32>, vector<32x32xf32> -> vector<32x32xf32>
    %173 = vector.broadcast %164 : vector<1x32xf32> to vector<32x32xf32>
    %174 = arith.addf %172, %173 : vector<32x32xf32>
    %cst_91 = arith.constant dense<0xFF800000> : vector<32xf32>
    %175 = vector.multi_reduction <maximumf>, %174, %cst_91 [1] : vector<32x32xf32> to vector<32xf32>
    %176 = vector.shape_cast %175 : vector<32xf32> to vector<32x1xf32>
    %177 = vector.broadcast %176 : vector<32x1xf32> to vector<32x32xf32>
    %178 = arith.subf %174, %177 : vector<32x32xf32>
    %179 = math.exp %178 : vector<32x32xf32>
    %cst_92 = arith.constant dense<0.000000e+00> : vector<32xf32>
    %180 = vector.multi_reduction <add>, %179, %cst_92 [1] : vector<32x32xf32> to vector<32xf32>
    %181 = vector.shape_cast %180 : vector<32xf32> to vector<32x1xf32>
    %182 = math.log %181 : vector<32x1xf32>
    %183 = vector.broadcast %182 : vector<32x1xf32> to vector<32x32xf32>
    %184 = arith.subf %178, %183 : vector<32x32xf32>
    %c0_93 = arith.constant 0 : index
    %c0_94 = arith.constant 0 : index
    %185 = vector.load %arg23[%c0_93, %c0_94] : memref<32x16xf32, #tpu.memory_space<vmem>>, vector<32x16xf32>
    %cst_95 = arith.constant dense<0.000000e+00> : vector<32x16xf32>
    %186 = tpu.matmul %184, %185, %cst_95 {dimension_numbers = #tpu.dot_dimension_numbers<[1], [0], [0], [1], [0, 0, 1, 1], [], []>} : vector<32x32xf32>, vector<32x16xf32>, vector<32x16xf32> -> vector<32x16xf32>
    %c0_96 = arith.constant 0 : index
    %c0_97 = arith.constant 0 : index
    %187 = vector.load %arg24[%c0_96, %c0_97] : memref<1x16xf32, #tpu.memory_space<vmem>>, vector<1x16xf32>
    %188 = vector.broadcast %187 : vector<1x16xf32> to vector<32x16xf32>
    %189 = arith.addf %186, %188 : vector<32x16xf32>
    %c0_98 = arith.constant 0 : index
    %c0_99 = arith.constant 0 : index
    %190 = vector.load %arg25[%c0_98, %c0_99] : memref<32x16xf32, #tpu.memory_space<vmem>>, vector<32x16xf32>
    tpu.vector_store %arg25[%c0_98, %c0_99], %189 {strides = array<i32>} : memref<32x16xf32, #tpu.memory_space<vmem>>, vector<32x16xf32>,
    return
  }
}

</mosaic_0001>

<bundles_post_ra>
// kernel: model_forward.1
= control target key start
LH: loop header
LB: loop body
LE: loop exit
PB: predicated region body
PF: predicated region fallthrough
CT: control target
= control target key end

     0   :  { %s4889_s0 = inlined_call_operand.vmem [shape: f32[32,144], index: 0, kind: input, shape index: {}]   ;;  %s4890_s1 = inlined_call_operand.vmem [shape: f32[32,32], index: 1, kind: input, shape index: {}]   ;;  %s4891_s2 = inlined_call_operand.vmem [shape: f32[32,32], index: 2, kind: input, shape index: {}]   ;;  %s4892_s3 = inlined_call_operand.vmem [shape: f32[144,32], index: 3, kind: input, shape index: {}]   ;;  %s4893_s4 = inlined_call_operand.vmem [shape: f32[1,32], index: 4, kind: input, shape index: {}, may-alias: {4,6,8,10,12,14,18,20,22}]   ;;  %s4894_s5 = inlined_call_operand.vmem [shape: f32[32,32], index: 5, kind: input, shape index: {}]   ;;  %s4895_s6 = inlined_call_operand.vmem [shape: f32[1,32], index: 6, kind: input, shape index: {}, may-alias: {4,6,8,10,12,14,18,20,22}]   ;;  %s4896_s7 = inlined_call_operand.vmem [shape: f32[32,32], index: 7, kind: input, shape index: {}]   ;;  %s4897_s8 = inlined_call_operand.vmem [shape: f32[1,32], index: 8, kind: input, shape index: {}, may-alias: {4,6,8,10,12,14,18,20,22}]   ;;  %s4898_s9 = inlined_call_operand.vmem [shape: f32[32,32], index: 9, kind: input, shape index: {}]   ;;  %s4899_s10 = inlined_call_operand.vmem [shape: f32[1,32], index: 10, kind: input, shape index: {}, may-alias: {4,6,8,10,12,14,18,20,22}]   ;;  %s4900_s11 = inlined_call_operand.vmem [shape: f32[32,32], index: 11, kind: input, shape index: {}]   ;;  %s4901_s12 = inlined_call_operand.vmem [shape: f32[1,32], index: 12, kind: input, shape index: {}, may-alias: {4,6,8,10,12,14,18,20,22}]   ;;  %s4902_s13 = inlined_call_operand.vmem [shape: f32[1,32], index: 13, kind: input, shape index: {}, may-alias: {13,19}]   ;;  %s4903_s14 = inlined_call_operand.vmem [shape: f32[1,32], index: 14, kind: input, shape index: {}, may-alias: {4,6,8,10,12,14,18,20,22}]   ;;  %s4904_s15 = inlined_call_operand.vmem [shape: f32[32,2048], index: 15, kind: input, shape index: {}]   ;;  %s4905_s16 = inlined_call_operand.vmem [shape: f32[1,2048], index: 16, kind: input, shape index: {}]   ;;  %s4906_s17 = inlined_call_operand.hbm [shape: f32[2048,32], index: 17, kind: input, shape index: {}]   ;;  %s4907_s18 = inlined_call_operand.vmem [shape: f32[1,32], index: 18, kind: input, shape index: {}, may-alias: {4,6,8,10,12,14,18,20,22}]   ;;  %s4908_s19 = inlined_call_operand.vmem [shape: f32[1,32], index: 19, kind: input, shape index: {}, may-alias: {13,19}]   ;;  %s4909_s20 = inlined_call_operand.vmem [shape: f32[1,32], index: 20, kind: input, shape index: {}, may-alias: {4,6,8,10,12,14,18,20,22}]   ;;  %s4910_s21 = inlined_call_operand.vmem [shape: f32[32,32], index: 21, kind: input, shape index: {}]   ;;  %s4911_s22 = inlined_call_operand.vmem [shape: f32[1,32], index: 22, kind: input, shape index: {}, may-alias: {4,6,8,10,12,14,18,20,22}]   ;;  %s4912_s23 = inlined_call_operand.vmem [shape: f32[32,16], index: 23, kind: input, shape index: {}]   ;;  %s4913_s24 = inlined_call_operand.vmem [shape: f32[1,16], index: 24, kind: input, shape index: {}]   ;;  %s4914_s25 = inlined_call_operand.vmem [shape: f32[32,16], index: 25, kind: output, shape index: {}]  }
   0x1   :  { %4922 = sst [smem:[#allocation5_spill]] %s4889_s0 }
   0x2   :  { %4923 = sst [smem:[#allocation6_spill]] %s4890_s1 }
   0x3   :  { %4924 = sst [smem:[#allocation7_spill]] %s4891_s2 }
   0x4   :  { %4925 = sst [smem:[#allocation8_spill]] %s4892_s3 }
   0x5   :  { %4926 = sst [smem:[#allocation9_spill]] %s4893_s4 }
   0x6   :  { %4927 = sst [smem:[#allocation10_spill]] %s4894_s5 }
   0x7   :  { %4928 = sst [smem:[#allocation11_spill]] %s4895_s6 }
   0x8   :  { %4929 = sst [smem:[#allocation12_spill]] %s4896_s7 }
   0x9   :  { %4930 = sst [smem:[#allocation13_spill]] %s4897_s8 }
   0xa   :  { %4931 = sst [smem:[#allocation14_spill]] %s4898_s9 }
   0xb   :  { %30 = vsyncpa [#allocation3], 0  ;;  %s69_s6 = sshll.u32 %s4906_s17, 4  ;;  %s3542_s30 = smov [#allocation2]   ;;  %s70_s6 = int_to_ptr.hbm [resolvable:$true] %s69_s6 }
   0xc   :  { %s71_s7 = sshll.u32 %s3542_s30, 4  ;;  %s3543_s3 = smov 128   ;;  %s72_s7 = int_to_ptr.vmem [resolvable:$true] %s71_s7 }
   0xd   :  { %s3544_s26 = smov 8  }
   0xe   :  { %77 = dma.hbm_to_vmem [thread:$0]  %s70_s6, 32768, %s72_s7, [#allocation3], %s3543_s3, %s3543_s3, %s3544_s26  }
   0xf   :  { %3540 = dma.done.wait [#allocation3], 32768  }
  0x10   :  { %3541 = vsyncadd [#allocation3], 4294934528  ;;  %s4932_s27 = sld [smem:[#allocation8_spill]]  ;;  %vm126_vm0 = vcmask 130048   ;;  %vm205_vm1 = vcmask 261120   ;;  %vm329_vm2 = vcmask 64512  }
  0x11   :  { %s4933_s8 = sld [smem:[#allocation5_spill]]  ;;  %v3407_v56 = vld [vmem:[%s4899_s10] ss:$0 sm:$0xff]  ;;  %s3546_s30 = smov 112  }
  0x12   :  { %s4934_s26 = sld [smem:[#allocation10_spill]]  ;;  %s3547_s10 = smov 104  }
  0x13   :  { %s4935_s28 = sld [smem:[#allocation14_spill]] }
  0x14   :  { %s4937_s5 = sld [smem:[#allocation12_spill]] }
  0x15   :  { %s4938_s3 = sld [smem:[#allocation13_spill]] }
  0x16   :  { %v119_v0 = vld [vmem:[%s4932_s27 + $0x78] sm:$0xff]  ;;  %v118_v1 = vld [vmem:[%s4932_s27 + $0x70] sm:$0xff]  ;;  %v117_v2 = vld [vmem:[%s4932_s27 + $0x68] sm:$0xff]  ;;  %s4947_s29 = sld [smem:[#allocation7_spill]] }
  0x17   :  { %139 = vmatpush.msra.mxu0 %v119_v0  ;;  %v116_v3 = vld [vmem:[%s4932_s27 + $0x60] sm:$0xff]  ;;  %v121_v4 = vld [vmem:[%s4932_s27 + $0x88] sm:$0xff]  ;;  %v115_v5 = vld [vmem:[%s4932_s27 + $0x58] sm:$0xff] }
  0x18   :  { %182 = vmatpush.msra.mxu1 %v121_v4  ;;  %v120_v6 = vld [vmem:[%s4932_s27 + $0x80] sm:$0xff]  ;;  %v97_v7 = vld [vmem:[%s4933_s8 + $0x8] sm:$0xff]  ;;  %3363 = vmatpush.msra.mxu2 %v121_v4  ;;  %v114_v8 = vld [vmem:[%s4932_s27 + $0x50] sm:$0xff] }
  0x19   :  { %140 = vmatpush.msra.mxu0 %v118_v1  ;;  %v113_v9 = vld [vmem:[%s4932_s27 + $0x48] sm:$0xff]  ;;  %v112_v10 = vld [vmem:[%s4932_s27 + $0x40] sm:$0xff]  ;;  %v111_v11 = vld [vmem:[%s4932_s27 + $0x38] sm:$0xff] }
  0x1a   :  { %183 = vmatpush.msra.mxu1 %v120_v6  ;;  %3364 = vmatpush.msra.mxu2 %v120_v6  ;;  %v99_v12 = vld [vmem:[%s4933_s8 + $0x18] sm:$0xff]  ;;  %v110_v13 = vld [vmem:[%s4932_s27 + $0x30] sm:$0xff]  ;;  %v109_v15 = vld [vmem:[%s4932_s27 + $0x28] sm:$0xff] }
  0x1b   :  { %141 = vmatpush.msra.mxu0 %v117_v2  ;;  %3199 = vmatmul.msk.f32.vlgmr.msra.gmra.mxu1 %vm126_vm0, %v97_v7  ;;  %v103_v14 = vld [vmem:[%s4933_s8 + $0x38] sm:$0xff]  ;;  %v108_v16 = vld [vmem:[%s4932_s27 + $0x20] sm:$0xff]  ;;  %v101_v18 = vld [vmem:[%s4933_s8 + $0x28] sm:$0xff] }
  0x1c   :  { %3202 = vmatmul.msk.f32.vlgmr.msra.gmra.mxu2 %vm126_vm0, %v103_v14  ;;  %v107_v17 = vld [vmem:[%s4932_s27 + $0x18] sm:$0xff]  ;;  %v106_v19 = vld [vmem:[%s4932_s27 + $0x10] sm:$0xff]  ;;  %v105_v22 = vld [vmem:[%s4932_s27 + $0x8] sm:$0xff] }
  0x1d   :  { %142 = vmatpush.msra.mxu0 %v116_v3  ;;  %v200_v20 = vld [vmem:[%s4934_s26 + $0x18] sm:$0xff]  ;;  %v104_v23 = vld [vmem:[%s4932_s27] sm:$0xff]  ;;  %v98_v25 = vld [vmem:[%s4933_s8 + $0x10] sm:$0xff]  ;;  %s4936_s27 = sld [smem:[#allocation9_spill]] }
  0x1e   :  { %v291_v21 = vld [vmem:[%s4935_s28 + $0x18] sm:$0xff]  ;;  %230 = vmatpush.msrb.mxu2 %v200_v20  ;;  %3365 = vmatpush.msra.mxu3 %v200_v20  ;;  %v96_v24 = vld [vmem:[%s4933_s8] sm:$0xff]  ;;  %v102_v27 = vld [vmem:[%s4933_s8 + $0x30] sm:$0xff] }
  0x1f   :  { %143 = vmatpush.msra.mxu0 %v115_v5  ;;  %308 = vmatpush.msrb.mxu1 %v291_v21  ;;  %v100_v26 = vld [vmem:[%s4933_s8 + $0x20] sm:$0xff]  ;;  %v199_v28 = vld [vmem:[%s4934_s26 + $0x10] sm:$0xff]  ;;  %v198_v30 = vld [vmem:[%s4934_s26 + $0x8] sm:$0xff]  ;;  %s3545_s8 = smov 120  }
  0x20   :  { %v290_v29 = vld [vmem:[%s4935_s28 + $0x10] sm:$0xff]  ;;  %231 = vmatpush.msrb.mxu2 %v199_v28  ;;  %v289_v31 = vld [vmem:[%s4935_s28 + $0x8] sm:$0xff]  ;;  %3366 = vmatpush.msra.mxu3 %v199_v28  ;;  %v197_v32 = vld [vmem:[%s4934_s26] sm:$0xff] }
  0x21   :  { %144 = vmatpush.msra.mxu0 %v114_v8  ;;  %309 = vmatpush.msrb.mxu1 %v290_v29  ;;  %v288_v33 = vld [vmem:[%s4935_s28] sm:$0xff]  ;;  %v254_v36 = vld [vmem:[%s4937_s5 + $0x18] sm:$0xff]  ;;  %v253_v37 = vld [vmem:[%s4937_s5 + $0x10] sm:$0xff] }
  0x22   :  { %232 = vmatpush.msrb.mxu2 %v198_v30  ;;  %3367 = vmatpush.msra.mxu3 %v198_v30  ;;  %v252_v38 = vld [vmem:[%s4937_s5 + $0x8] sm:$0xff]  ;;  %v251_v41 = vld [vmem:[%s4937_s5] sm:$0xff]  ;;  %s4940_s5 = sld [smem:[#allocation6_spill]] }
  0x23   :  { %145 = vmatpush.msra.mxu0 %v113_v9  ;;  %3200 = vmatmul.msk.f32.gmra.mxu1 %vm126_vm0, %v99_v12  ;;  %v3406_v35 = vld [vmem:[%s4936_s27] ss:$0 sm:$0xff]  ;;  %s4939_s27 = sld [smem:[#allocation11_spill]] }
  0x24   :  { %310 = vmatpush.msrb.mxu1 %v289_v31  ;;  %233 = vmatpush.msrb.mxu2 %v197_v32  ;;  %v3409_v7 = vld [vmem:[%s4938_s3] ss:$0 sm:$0xff] }
  0x25   :  { %146 = vmatpush.msra.mxu0 %v112_v10  ;;  %3368 = vmatpush.msra.mxu3 %v197_v32 }
  0x26   :  { %311 = vmatpush.msrb.mxu1 %v288_v33 }
  0x27   :  { %147 = vmatpush.msra.mxu0 %v111_v11  ;;  %271 = vmatpush.msrb.mxu3 %v254_v36 }
  0x28   :  { %v3890_v28 = vld [vmem:[%s4940_s5 + $0x8] sm:$0xff]  ;;  %v3897_v32 = vld [vmem:[%s4940_s5 + $0x10] sm:$0xff]  ;;  %v3904_v36 = vld [vmem:[%s4940_s5 + $0x18] sm:$0xff] }
  0x29   :  { %148 = vmatpush.msra.mxu0 %v110_v13  ;;  %272 = vmatpush.msrb.mxu3 %v253_v37  ;;  %v3408_v12 = vld [vmem:[%s4939_s27] ss:$0 sm:$0xff] }
  0x2b   :  { %149 = vmatpush.msra.mxu0 %v109_v15  ;;  %3201 = vmatmul.msk.f32.gmra.mxu1 %vm126_vm0, %v101_v18 }
  0x2c   :  { %273 = vmatpush.msrb.mxu3 %v252_v38 }
  0x2d   :  { %150 = vmatpush.msra.mxu0 %v108_v16 }
  0x2e   :  { %274 = vmatpush.msrb.mxu3 %v251_v41 }
  0x2f   :  { %151 = vmatpush.msra.mxu0 %v107_v17 }
  0x31   :  { %152 = vmatpush.msra.mxu0 %v106_v19 }
  0x33   :  { %153 = vmatpush.msra.mxu0 %v105_v22 }
  0x35   :  { %154 = vmatpush.msra.mxu0 %v104_v23 }
  0x36   :  { %155 = vmatmul.f32.vlgmr.msra.gmra.mxu0 %v96_v24  ;;  %v3883_v24 = vld [vmem:[%s4940_s5] sm:$0xff] }
  0x3e   :  { %158 = vmatmul.f32.gmra.mxu0 %v98_v25 }
  0x46   :  { %161 = vmatmul.f32.gmra.mxu0 %v100_v26 }
  0x4e   :  { %164 = vmatmul.f32.gmra.mxu0 %v102_v27 }
  0x98   :  { %v185_v34 = vpop.f32.mrf.mxu1 }
  0x9f   :  { %v194_v52 = vpop.f32.mrf.mxu2 }
  0xa0   :  { %v188_v43 = vpop.f32.mrf.mxu1 }
  0xa8   :  { %v191_v48 = vpop.f32.mrf.mxu1 }
  0xb3   :  { %v156_v39 = vpop.f32.mrf.mxu0 }
  0xb4   :  { %v157_v40 = vadd.f32 %v3406_v35, %v156_v39 }
  0xb6   :  { %v3803_v42 = vadd.f32 %v185_v34, %v157_v40 }
  0xb8   :  { %3203 = vmatmul.msk.f32.vlgmr.msrb.gmra.mxu2 %vm205_vm1, %v3803_v42  ;;  %3211 = vmatmul.msk.f32.vlgmr.msrb.gmra.mxu1 %vm205_vm1, %v3803_v42 }
  0xbb   :  { %v159_v44 = vpop.f32.mrf.mxu0 }
  0xbc   :  { %v160_v45 = vadd.f32 %v3406_v35, %v159_v44 }
  0xbe   :  { %v3809_v46 = vadd.f32 %v188_v43, %v160_v45 }
  0xc0   :  { %3204 = vmatmul.msk.f32.gmra.mxu2 %vm205_vm1, %v3809_v46  ;;  %3212 = vmatmul.msk.f32.gmra.mxu1 %vm205_vm1, %v3809_v46 }
  0xc3   :  { %v162_v47 = vpop.f32.mrf.mxu0 }
  0xc4   :  { %v163_v49 = vadd.f32 %v3406_v35, %v162_v47 }
  0xc6   :  { %v3815_v50 = vadd.f32 %v191_v48, %v163_v49 }
  0xc8   :  { %3205 = vmatmul.msk.f32.vlgmr.msra.gmra.mxu3 %vm205_vm1, %v3815_v50  ;;  %3213 = vmatmul.msk.f32.gmra.mxu1 %vm205_vm1, %v3815_v50 }
  0xcb   :  { %v165_v51 = vpop.f32.mrf.mxu0 }
  0xcc   :  { %v166_v53 = vadd.f32 %v3406_v35, %v165_v51 }
  0xce   :  { %v3821_v54 = vadd.f32 %v194_v52, %v166_v53 }
  0xd0   :  { %3206 = vmatmul.msk.f32.gmra.mxu3 %vm205_vm1, %v3821_v54  ;;  %3214 = vmatmul.msk.f32.gmra.mxu1 %vm205_vm1, %v3821_v54 }
  0xd8   :  { %3207 = vmatmul.msk.f32.vlgmr.msrb.gmra.mxu3 %vm205_vm1, %v3803_v42 }
  0xe0   :  { %3208 = vmatmul.msk.f32.gmra.mxu3 %vm205_vm1, %v3809_v46 }
  0xe8   :  { %3209 = vmatmul.msk.f32.gmra.mxu3 %vm205_vm1, %v3815_v50 }
  0xf0   :  { %3210 = vmatmul.msk.f32.gmra.mxu3 %vm205_vm1, %v3821_v54 }
 0x135   :  { %v313_v55 = vpop.f32.mrf.mxu1 }
 0x136   :  { %v314_v58 = vadd.f32 %v3407_v56, %v313_v55 }
 0x13b   :  { %v235_v11 = vpop.f32.mrf.mxu2 }
 0x13c   :  { %v236_v14 = vadd.f32 %v3408_v12, %v235_v11 }
 0x13d   :  { %v316_v57 = vpop.f32.mrf.mxu1 }
 0x13e   :  { %v317_v59 = vadd.f32 %v3407_v56, %v316_v57  ;;  %v3864_v16 = vmul.f32 0.35355338, %v236_v14 }
 0x140   :  { %v3838_v60 = vpack.i.bf16 %v314_v58, %v317_v59 }
 0x143   :  { %v238_v17 = vpop.f32.mrf.mxu2 }
 0x144   :  { %v239_v18 = vadd.f32 %v3408_v12, %v238_v17 }
 0x145   :  { %v319_v61 = vpop.f32.mrf.mxu1 }
 0x146   :  { %v320_v0 = vadd.f32 %v3407_v56, %v319_v61  ;;  %v3868_v19 = vmul.f32 0.35355338, %v239_v18 }
 0x14b   :  { %v241_v62 = vpop.f32.mrf.mxu3 }
 0x14c   :  { %v242_v20 = vadd.f32 %v3408_v12, %v241_v62 }
 0x14d   :  { %v322_v63 = vpop.f32.mrf.mxu1 }
 0x14e   :  { %v323_v1 = vadd.f32 %v3407_v56, %v322_v63  ;;  %v3872_v21 = vmul.f32 0.35355338, %v242_v20 }
 0x150   :  { %503 = vmatpush.msra.mxu3 %v323_v1  ;;  %v3840_v2 = vpack.i.bf16 %v320_v0, %v323_v1 }
 0x152   :  { %504 = vmatpush.msra.mxu3 %v320_v0 }
 0x153   :  { %v244_v3 = vpop.f32.mrf.mxu3 }
 0x154   :  { %505 = vmatpush.msra.mxu3 %v317_v59  ;;  %v245_v22 = vadd.f32 %v3408_v12, %v244_v3  ;;  %v520_v3 = vld [vmem:[%s4900_s11] sm:$0xff] }
 0x156   :  { %506 = vmatpush.msra.mxu3 %v314_v58  ;;  %v3876_v23 = vmul.f32 0.35355338, %v245_v22 }
 0x158   :  { %804 = vmatpush.msrb.mxu3 %v520_v3 }
 0x15b   :  { %v276_v4 = vpop.f32.mrf.mxu3 }
 0x15c   :  { %v3860_v15 = vadd.f32 %v3409_v7, %v276_v4 }
 0x163   :  { %v279_v5 = vpop.f32.mrf.mxu3 }
 0x164   :  { %v3856_v13 = vadd.f32 %v3409_v7, %v279_v5 }
 0x16b   :  { %v282_v6 = vpop.f32.mrf.mxu3 }
 0x16c   :  { %v3849_v10 = vadd.f32 %v3409_v7, %v282_v6 }
 0x173   :  { %v285_v8 = vpop.f32.mrf.mxu3 }
 0x174   :  { %v3845_v9 = vadd.f32 %v3409_v7, %v285_v8 }
 0x176   :  { %3215 = vmatpush.xpose.msk.msra.mxu2 %vm329_vm2, %v3845_v9 }
 0x17a   :  { %3216 = vmatpush.xpose.msk.msra.mxu2 %vm329_vm2, %v3849_v10 }
 0x17e   :  { %3217 = vmatpush.xpose.msk.msra.mxu2 %vm329_vm2, %v3856_v13 }
 0x182   :  { %3218 = vmatpush.xpose.msk.msra.mxu2 %vm329_vm2, %v3860_v15 }
 0x185   :  { %3219 = vmatmul.msk.f32.vlgmr.msra.gmra.mxu2 %vm329_vm2, %v3864_v16 }
 0x18d   :  { %3220 = vmatmul.msk.f32.gmra.mxu2 %vm329_vm2, %v3868_v19 }
 0x195   :  { %3221 = vmatmul.msk.f32.gmra.mxu2 %vm329_vm2, %v3872_v21 }
 0x19d   :  { %3222 = vmatmul.msk.f32.gmra.mxu2 %vm329_vm2, %v3876_v23 }
 0x208   :  { %v371_v25 = vpop.f32.mrf.mxu2 }
 0x209   :  { %v372_v26 = vadd.f32 %v371_v25, %v3883_v24 }
 0x20b   :  { %v383_v27 = vsel %vm205_vm1, %v372_v26, -inf }
 0x20c   :  { %384 = vmax.xlane.f32.xlu0 %v383_v27 }
 0x210   :  { %v374_v29 = vpop.f32.mrf.mxu2 }
 0x211   :  { %v375_v30 = vadd.f32 %v374_v29, %v3890_v28 }
 0x213   :  { %v386_v31 = vsel %vm205_vm1, %v375_v30, -inf }
 0x214   :  { %387 = vmax.xlane.f32.xlu0 %v386_v31 }
 0x218   :  { %v377_v33 = vpop.f32.mrf.mxu2 }
 0x219   :  { %v378_v34 = vadd.f32 %v377_v33, %v3897_v32 }
 0x21b   :  { %v389_v35 = vsel %vm205_vm1, %v378_v34, -inf }
 0x21c   :  { %390 = vmax.xlane.f32.xlu1 %v389_v35 }
 0x220   :  { %v380_v37 = vpop.f32.mrf.mxu2 }
 0x221   :  { %v381_v38 = vadd.f32 %v380_v37, %v3904_v36 }
 0x223   :  { %v392_v39 = vsel %vm205_vm1, %v381_v38, -inf }
 0x224   :  { %393 = vmax.xlane.f32.xlu1 %v392_v39 }
 0x27f   :  { %v385_v40 = vpop.xlane.xlu0 %384 }
 0x280   :  { %v395_v41 = vsub.f32 %v372_v26, %v385_v40 }
 0x282   :  { %v399_v43 = vmul.f32 1.442695, %v395_v41 }
 0x284   :  { %3418 = vpow2.f32 %v399_v43 }
 0x287   :  { %v388_v44 = vpop.xlane.xlu0 %387 }
 0x288   :  { %v396_v45 = vsub.f32 %v375_v30, %v388_v44 }
 0x28a   :  { %v3908_v47 = vpop.eup %3418  ;;  %v401_v48 = vmul.f32 1.442695, %v396_v45 }
 0x28b   :  { %v407_v49 = vsel %vm205_vm1, %v3908_v47, 0.0 }
 0x28c   :  { %3420 = vpow2.f32 %v401_v48  ;;  %408 = vadd.xlane.f32.xlu2 %v407_v49 }
 0x28f   :  { %v391_v51 = vpop.xlane.xlu1 %390 }
 0x290   :  { %v397_v52 = vsub.f32 %v378_v34, %v391_v51 }
 0x292   :  { %v3912_v53 = vpop.eup %3420  ;;  %v403_v55 = vmul.f32 1.442695, %v397_v52 }
 0x293   :  { %v410_v56 = vsel %vm205_vm1, %v3912_v53, 0.0 }
 0x294   :  { %3422 = vpow2.f32 %v403_v55  ;;  %411 = vadd.xlane.f32.xlu2 %v410_v56 }
 0x297   :  { %v394_v57 = vpop.xlane.xlu1 %393 }
 0x298   :  { %v398_v58 = vsub.f32 %v381_v38, %v394_v57 }
 0x29a   :  { %v3916_v59 = vpop.eup %3422  ;;  %v405_v61 = vmul.f32 1.442695, %v398_v58 }
 0x29b   :  { %v413_v62 = vsel %vm205_vm1, %v3916_v59, 0.0 }
 0x29c   :  { %3424 = vpow2.f32 %v405_v61  ;;  %414 = vadd.xlane.f32.xlu0 %v413_v62 }
 0x2a2   :  { %v3920_v63 = vpop.eup %3424 }
 0x2a3   :  { %v416_v0 = vsel %vm205_vm1, %v3920_v63, 0.0 }
 0x2a4   :  { %417 = vadd.xlane.f32.xlu1 %v416_v0 }
 0x2ac   :  { %535 = vrot.lane.b32.xlu2 %v3845_v9, %s3545_s8 }
 0x2b0   :  { %533 = vrot.lane.b32.xlu0 %v3849_v10, %s3545_s8 }
 0x2b4   :  { %529 = vrot.lane.b32.xlu2 %v3860_v15, %s3545_s8 }
 0x2b8   :  { %521 = vrot.lane.b32.xlu0 %v3864_v16, %s3545_s8 }
 0x2bc   :  { %523 = vrot.lane.b32.xlu2 %v3868_v19, %s3545_s8 }
 0x2bd   :  { %531 = vrot.lane.b32.xlu1 %v3856_v13, %s3545_s8 }
 0x2c0   :  { %832 = vrot.lane.b32.xlu0 %v3845_v9, %s3546_s30 }
 0x2c4   :  { %1088 = vrot.lane.b32.xlu2 %v3845_v9, %s3547_s10 }
 0x2c5   :  { %525 = vrot.lane.b32.xlu1 %v3872_v21, %s3545_s8 }
 0x2c8   :  { %1086 = vrot.lane.b32.xlu0 %v3849_v10, %s3547_s10 }
 0x2cc   :  { %527 = vrot.lane.b32.xlu2 %v3876_v23, %s3545_s8 }
 0x2cd   :  { %830 = vrot.lane.b32.xlu1 %v3849_v10, %s3546_s30 }
 0x2d0   :  { %1084 = vrot.lane.b32.xlu0 %v3856_v13, %s3547_s10 }
 0x2d4   :  { %826 = vrot.lane.b32.xlu2 %v3860_v15, %s3546_s30 }
 0x2d5   :  { %828 = vrot.lane.b32.xlu1 %v3856_v13, %s3546_s30 }
 0x2d8   :  { %818 = vrot.lane.b32.xlu0 %v3864_v16, %s3546_s30 }
 0x2dc   :  { %1074 = vrot.lane.b32.xlu2 %v3864_v16, %s3547_s10 }
 0x2dd   :  { %1082 = vrot.lane.b32.xlu1 %v3860_v15, %s3547_s10 }
 0x2e0   :  { %1076 = vrot.lane.b32.xlu0 %v3868_v19, %s3547_s10 }
 0x2e4   :  { %822 = vrot.lane.b32.xlu2 %v3872_v21, %s3546_s30 }
 0x2e5   :  { %820 = vrot.lane.b32.xlu1 %v3868_v19, %s3546_s30 }
 0x2e8   :  { %824 = vrot.lane.b32.xlu0 %v3876_v23, %s3546_s30 }
 0x2ec   :  { %1080 = vrot.lane.b32.xlu2 %v3876_v23, %s3547_s10 }
 0x2ed   :  { %1078 = vrot.lane.b32.xlu1 %v3872_v21, %s3547_s10 }
 0x2ff   :  { %v409_v1 = vpop.xlane.xlu2 %408 }
 0x300   :  { %3426 = vrcp.f32 %v409_v1  ;;  %v430_v8 = vand.u32 2147483648, %v409_v1  ;;  %v428_v10 = vand.u32 2147483647, %v409_v1  ;;  %vm424_vm4 = vweird.f32 %v409_v1 }
 0x302   :  { %v431_v13 = vor.u32 1.1754944e-38, %v430_v8  ;;  %vm429_vm6 = vcmp.eq.f32.partialorder %v428_v10, 8.507059e+37 }
 0x306   :  { %v3427_v4 = vpop.eup %3426 }
 0x307   :  { %v420_v5 = vmul.f32 %v3427_v4, %v409_v1  ;;  %v412_v6 = vpop.xlane.xlu2 %411  ;;  %vm425_vm3 = vweird.f32 %v3427_v4 }
 0x308   :  { %3428 = vrcp.f32 %v412_v6  ;;  %vm426_vm5 = vmor %vm424_vm4, %vm425_vm3  ;;  %v445_v21 = vand.u32 2147483648, %v412_v6  ;;  %v443_v23 = vand.u32 2147483647, %v412_v6  ;;  %vm439_vm8 = vweird.f32 %v412_v6 }
 0x309   :  { %v421_v7 = vsub.f32 1.0, %v420_v5 }
 0x30a   :  { %v446_v27 = vor.u32 1.1754944e-38, %v445_v21  ;;  %vm444_vm10 = vcmp.eq.f32.partialorder %v443_v23, 8.507059e+37 }
 0x30b   :  { %v422_v9 = vmul.f32 %v3427_v4, %v421_v7 }
 0x30d   :  { %v423_v11 = vadd.f32 %v3427_v4, %v422_v9 }
 0x30e   :  { %v3429_v12 = vpop.eup %3428 }
 0x30f   :  { %v427_v14 = vsel %vm426_vm5, %v3427_v4, %v423_v11  ;;  %v435_v15 = vmul.f32 %v3429_v12, %v412_v6  ;;  %v536_v16 = vpop.permute.xlu2 %535  ;;  %v415_v17 = vpop.xlane.xlu0 %414  ;;  %vm440_vm7 = vweird.f32 %v3429_v12 }
 0x310   :  { %v432_v18 = vsel %vm429_vm6, %v431_v13, %v427_v14  ;;  %3430 = vrcp.f32 %v415_v17  ;;  %3227 = vmatpush.xpose.msk.msrb.mxu0 %vm329_vm2, %v536_v16  ;;  %vm441_vm9 = vmor %vm439_vm8, %vm440_vm7  ;;  %v460_v38 = vand.u32 2147483648, %v415_v17  ;;  %v458_v40 = vand.u32 2147483647, %v415_v17 }
 0x311   :  { %v436_v19 = vsub.f32 1.0, %v435_v15  ;;  %v433_v20 = vmul.f32 %v3908_v47, %v432_v18  ;;  %vm454_vm12 = vweird.f32 %v415_v17 }
 0x312   :  { %v461_v44 = vor.u32 1.1754944e-38, %v460_v38  ;;  %vm459_vm14 = vcmp.eq.f32.partialorder %v458_v40, 8.507059e+37 }
 0x313   :  { %v437_v22 = vmul.f32 %v3429_v12, %v436_v19  ;;  %3223 = vmatmul.msk.f32.vlgmr.msra.gmra.mxu3 %vm205_vm1, %v433_v20 }
 0x315   :  { %v438_v25 = vadd.f32 %v3429_v12, %v437_v22 }
 0x316   :  { %v3431_v26 = vpop.eup %3430 }
 0x317   :  { %v450_v29 = vmul.f32 %v3431_v26, %v415_v17  ;;  %v418_v30 = vpop.xlane.xlu1 %417  ;;  %v530_v31 = vpop.permute.xlu2 %529  ;;  %v442_v33 = vsel %vm441_vm9, %v3429_v12, %v438_v25  ;;  %vm455_vm11 = vweird.f32 %v3431_v26 }
 0x318   :  { %3432 = vrcp.f32 %v418_v30  ;;  %v447_v34 = vsel %vm444_vm10, %v446_v27, %v442_v33  ;;  %vm456_vm13 = vmor %vm454_vm12, %vm455_vm11  ;;  %v473_v57 = vand.u32 2147483647, %v418_v30  ;;  %vm469_vm3 = vweird.f32 %v418_v30 }
 0x319   :  { %v451_v35 = vsub.f32 1.0, %v450_v29  ;;  %v448_v37 = vmul.f32 %v3912_v53, %v447_v34  ;;  %v475_v53 = vand.u32 2147483648, %v418_v30 }
 0x31a   :  { %vm474_vm5 = vcmp.eq.f32.partialorder %v473_v57, 8.507059e+37 }
 0x31b   :  { %v452_v39 = vmul.f32 %v3431_v26, %v451_v35  ;;  %3224 = vmatmul.msk.f32.gmra.mxu3 %vm205_vm1, %v448_v37  ;;  %v476_v61 = vor.u32 1.1754944e-38, %v475_v53 }
 0x31d   :  { %v453_v41 = vadd.f32 %v3431_v26, %v452_v39 }
 0x31e   :  { %v3433_v43 = vpop.eup %3432 }
 0x31f   :  { %v465_v45 = vmul.f32 %v3433_v43, %v418_v30  ;;  %v524_v47 = vpop.permute.xlu2 %523  ;;  %v457_v48 = vsel %vm456_vm13, %v3431_v26, %v453_v41  ;;  %vm470_vm15 = vweird.f32 %v3433_v43 }
 0x320   :  { %v462_v49 = vsel %vm459_vm14, %v461_v44, %v457_v48  ;;  %vm471_vm4 = vmor %vm469_vm3, %vm470_vm15 }
 0x321   :  { %v466_v51 = vsub.f32 1.0, %v465_v45  ;;  %v463_v52 = vmul.f32 %v3916_v59, %v462_v49 }
 0x322   :  { %v534_v55 = vpop.permute.xlu0 %533 }
 0x323   :  { %v467_v56 = vmul.f32 %v3433_v43, %v466_v51  ;;  %3225 = vmatmul.msk.f32.gmra.mxu3 %vm205_vm1, %v463_v52  ;;  %3228 = vmatpush.xpose.msk.msrb.mxu0 %vm329_vm2, %v534_v55 }
 0x325   :  { %v468_v58 = vadd.f32 %v3433_v43, %v467_v56 }
 0x327   :  { %v1089_v62 = vpop.permute.xlu2 %1088  ;;  %v472_v0 = vsel %vm471_vm4, %v3433_v43, %v468_v58 }
 0x328   :  { %3263 = vmatpush.xpose.msk.msra.mxu3 %vm329_vm2, %v1089_v62  ;;  %v477_v1 = vsel %vm474_vm5, %v476_v61, %v472_v0 }
 0x329   :  { %v478_v59 = vmul.f32 %v3920_v63, %v477_v1 }
 0x32a   :  { %v522_v3 = vpop.permute.xlu0 %521 }
 0x32b   :  { %3226 = vmatmul.msk.f32.gmra.mxu3 %vm205_vm1, %v478_v59 }
 0x32f   :  { %v532_v4 = vpop.permute.xlu1 %531  ;;  %v528_v63 = vpop.permute.xlu2 %527 }
 0x330   :  { %3229 = vmatpush.xpose.msk.msrb.mxu0 %vm329_vm2, %v532_v4 }
 0x332   :  { %v833_v5 = vpop.permute.xlu0 %832 }
 0x334   :  { %3230 = vmatpush.xpose.msk.msrb.mxu0 %vm329_vm2, %v530_v31 }
 0x337   :  { %v526_v6 = vpop.permute.xlu1 %525  ;;  %3231 = vmatmul.msk.f32.vlgmr.msrb.gmra.mxu0 %vm329_vm2, %v522_v3  ;;  %v827_v11 = vpop.permute.xlu2 %826 }
 0x338   :  { %3247 = vmatpush.xpose.msk.msra.mxu0 %vm329_vm2, %v833_v5 }
 0x33a   :  { %v1087_v7 = vpop.permute.xlu0 %1086 }
 0x33b   :  { %3264 = vmatpush.xpose.msk.msra.mxu3 %vm329_vm2, %v1087_v7 }
 0x33f   :  { %v831_v8 = vpop.permute.xlu1 %830  ;;  %3232 = vmatmul.msk.f32.gmra.mxu0 %vm329_vm2, %v524_v47  ;;  %v1075_v14 = vpop.permute.xlu2 %1074 }
 0x340   :  { %3248 = vmatpush.xpose.msk.msra.mxu0 %vm329_vm2, %v831_v8 }
 0x342   :  { %v1085_v9 = vpop.permute.xlu0 %1084 }
 0x343   :  { %3265 = vmatpush.xpose.msk.msra.mxu3 %vm329_vm2, %v1085_v9 }
 0x347   :  { %v829_v10 = vpop.permute.xlu1 %828  ;;  %3233 = vmatmul.msk.f32.gmra.mxu0 %vm329_vm2, %v526_v6  ;;  %v823_v17 = vpop.permute.xlu2 %822 }
 0x348   :  { %3249 = vmatpush.xpose.msk.msra.mxu0 %vm329_vm2, %v829_v10 }
 0x34a   :  { %v819_v13 = vpop.permute.xlu0 %818 }
 0x34c   :  { %3250 = vmatpush.xpose.msk.msra.mxu0 %vm329_vm2, %v827_v11 }
 0x34f   :  { %v1083_v12 = vpop.permute.xlu1 %1082  ;;  %3234 = vmatmul.msk.f32.gmra.mxu0 %vm329_vm2, %v528_v63  ;;  %v1081_v39 = vpop.permute.xlu2 %1080 }
 0x350   :  { %3266 = vmatpush.xpose.msk.msra.mxu3 %vm329_vm2, %v1083_v12 }
 0x352   :  { %v1077_v16 = vpop.permute.xlu0 %1076 }
 0x357   :  { %3251 = vmatmul.msk.f32.vlgmr.msra.gmra.mxu0 %vm329_vm2, %v819_v13  ;;  %v821_v15 = vpop.permute.xlu1 %820 }
 0x35a   :  { %v825_v18 = vpop.permute.xlu0 %824 }
 0x35f   :  { %3252 = vmatmul.msk.f32.gmra.mxu0 %vm329_vm2, %v821_v15  ;;  %v1079_v34 = vpop.permute.xlu1 %1078 }
 0x367   :  { %3253 = vmatmul.msk.f32.gmra.mxu0 %vm329_vm2, %v823_v17 }
 0x36f   :  { %3254 = vmatmul.msk.f32.gmra.mxu0 %vm329_vm2, %v825_v18 }
 0x396   :  { %v508_v19 = vpop.f32.mrf.mxu3 }
 0x397   :  { %3243 = vmatmul.msk.f32.vlgmr.msrb.gmra.mxu3 %vm329_vm2, %v508_v19 }
 0x39e   :  { %v511_v20 = vpop.f32.mrf.mxu3 }
 0x39f   :  { %3244 = vmatmul.msk.f32.gmra.mxu3 %vm329_vm2, %v511_v20 }
 0x3a6   :  { %v514_v21 = vpop.f32.mrf.mxu3 }
 0x3a7   :  { %3245 = vmatmul.msk.f32.gmra.mxu3 %vm329_vm2, %v514_v21 }
 0x3ae   :  { %v517_v22 = vpop.f32.mrf.mxu3 }
 0x3af   :  { %3246 = vmatmul.msk.f32.gmra.mxu3 %vm329_vm2, %v517_v22 }
 0x3b4   :  { %v570_v23 = vpop.f32.mrf.mxu0 }
 0x3b5   :  { %v571_v25 = vadd.f32 %v570_v23, %v3883_v24 }
 0x3b7   :  { %3267 = vmatmul.msk.f32.vlgmr.msra.gmra.mxu3 %vm329_vm2, %v1075_v14  ;;  %v582_v26 = vsel %vm205_vm1, %v571_v25, -inf }
 0x3b8   :  { %583 = vmax.xlane.f32.xlu1 %v582_v26 }
 0x3bc   :  { %v573_v27 = vpop.f32.mrf.mxu0 }
 0x3bd   :  { %v574_v29 = vadd.f32 %v573_v27, %v3890_v28 }
 0x3bf   :  { %3268 = vmatmul.msk.f32.gmra.mxu3 %vm329_vm2, %v1077_v16  ;;  %v585_v30 = vsel %vm205_vm1, %v574_v29, -inf }
 0x3c0   :  { %586 = vmax.xlane.f32.xlu0 %v585_v30 }
 0x3c4   :  { %v576_v31 = vpop.f32.mrf.mxu0 }
 0x3c5   :  { %v577_v33 = vadd.f32 %v576_v31, %v3897_v32 }
 0x3c7   :  { %3269 = vmatmul.msk.f32.gmra.mxu3 %vm329_vm2, %v1079_v34  ;;  %v588_v35 = vsel %vm205_vm1, %v577_v33, -inf }
 0x3c8   :  { %589 = vmax.xlane.f32.xlu2 %v588_v35 }
 0x3cc   :  { %v579_v37 = vpop.f32.mrf.mxu0 }
 0x3cd   :  { %v580_v38 = vadd.f32 %v579_v37, %v3904_v36 }
 0x3cf   :  { %3270 = vmatmul.msk.f32.gmra.mxu3 %vm329_vm2, %v1081_v39  ;;  %v591_v40 = vsel %vm205_vm1, %v580_v38, -inf }
 0x3d0   :  { %592 = vmax.xlane.f32.xlu1 %v591_v40 }
 0x3d4   :  { %v867_v41 = vpop.f32.mrf.mxu0 }
 0x3d5   :  { %v868_v43 = vadd.f32 %v867_v41, %v3883_v24 }
 0x3d7   :  { %v879_v44 = vsel %vm205_vm1, %v868_v43, -inf }
 0x3d8   :  { %880 = vmax.xlane.f32.xlu0 %v879_v44 }
 0x3dc   :  { %v870_v45 = vpop.f32.mrf.mxu0 }
 0x3dd   :  { %v871_v47 = vadd.f32 %v870_v45, %v3890_v28 }
 0x3df   :  { %v882_v48 = vsel %vm205_vm1, %v871_v47, -inf }
 0x3e0   :  { %883 = vmax.xlane.f32.xlu2 %v882_v48 }
 0x3e4   :  { %v873_v49 = vpop.f32.mrf.mxu0 }
 0x3e5   :  { %v4028_v51 = vadd.f32 %v873_v49, %v3897_v32 }
 0x3e7   :  { %v885_v52 = vsel %vm205_vm1, %v4028_v51, -inf }
 0x3ec   :  { %3382 = vrot.lane.b32.xlu0 %v3838_v60, %s3545_s8  ;;  %v876_v53 = vpop.f32.mrf.mxu0 }
 0x3ed   :  { %v4033_v55 = vadd.f32 %v876_v53, %v3904_v36 }
 0x3ef   :  { %v888_v57 = vsel %vm205_vm1, %v4033_v55, -inf }
 0x3f8   :  { %3377 = vrot.lane.b32.xlu2 %v3840_v2, %s3545_s8 }
 0x416   :  { %886 = vmax.xlane.f32.xlu0 %v885_v52 }
 0x41a   :  { %v4035_v56 = vpop.f32.mrf.mxu3 }
 0x41e   :  { %889 = vmax.xlane.f32.xlu0 %v888_v57 }
 0x422   :  { %v4039_v58 = vpop.f32.mrf.mxu3 }
 0x42a   :  { %v4041_v61 = vpop.f32.mrf.mxu3 }
 0x42b   :  { %v584_v62 = vpop.xlane.xlu1 %583 }
 0x42c   :  { %v594_v0 = vsub.f32 %v571_v25, %v584_v62 }
 0x42e   :  { %v598_v1 = vmul.f32 1.442695, %v594_v0 }
 0x430   :  { %3434 = vpow2.f32 %v598_v1 }
 0x432   :  { %v4043_v59 = vpop.f32.mrf.mxu3 }
 0x433   :  { %v587_v3 = vpop.xlane.xlu0 %586 }
 0x434   :  { %v595_v4 = vsub.f32 %v574_v29, %v587_v3 }
 0x436   :  { %v4045_v5 = vpop.eup %3434  ;;  %v600_v6 = vmul.f32 1.442695, %v595_v4 }
 0x437   :  { %v606_v7 = vsel %vm205_vm1, %v4045_v5, 0.0 }
 0x438   :  { %3436 = vpow2.f32 %v600_v6  ;;  %607 = vadd.xlane.f32.xlu1 %v606_v7 }
 0x43a   :  { %v1123_v8 = vpop.f32.mrf.mxu3 }
 0x43b   :  { %v590_v63 = vpop.xlane.xlu2 %589 }
 0x43c   :  { %v596_v9 = vsub.f32 %v577_v33, %v590_v63 }
 0x43e   :  { %v4049_v10 = vpop.eup %3436  ;;  %v602_v11 = vmul.f32 1.442695, %v596_v9 }
 0x43f   :  { %v609_v12 = vsel %vm205_vm1, %v4049_v10, 0.0 }
 0x440   :  { %3438 = vpow2.f32 %v602_v11  ;;  %610 = vadd.xlane.f32.xlu1 %v609_v12 }
 0x442   :  { %v1126_v13 = vpop.f32.mrf.mxu3 }
 0x443   :  { %v593_v14 = vpop.xlane.xlu1 %592 }
 0x444   :  { %v597_v15 = vsub.f32 %v580_v38, %v593_v14  ;;  %v4071_v38 = vadd.f32 %v1123_v8, %v3883_v24  ;;  %v4080_v24 = vadd.f32 %v1126_v13, %v3890_v28 }
 0x446   :  { %v4053_v16 = vpop.eup %3438  ;;  %v604_v17 = vmul.f32 1.442695, %v597_v15  ;;  %v1135_v45 = vsel %vm205_vm1, %v4071_v38, -inf  ;;  %v1138_v48 = vsel %vm205_vm1, %v4080_v24, -inf }
 0x447   :  { %v612_v18 = vsel %vm205_vm1, %v4053_v16, 0.0 }
 0x448   :  { %3440 = vpow2.f32 %v604_v17  ;;  %613 = vadd.xlane.f32.xlu1 %v612_v18 }
 0x44a   :  { %v1129_v19 = vpop.f32.mrf.mxu3 }
 0x44b   :  { %v881_v20 = vpop.xlane.xlu0 %880  ;;  %v4085_v49 = vadd.f32 %v1129_v19, %v3897_v32 }
 0x44c   :  { %v891_v21 = vsub.f32 %v868_v43, %v881_v20 }
 0x44d   :  { %v1141_v52 = vsel %vm205_vm1, %v4085_v49, -inf }
 0x44e   :  { %v4057_v22 = vpop.eup %3440  ;;  %v895_v23 = vmul.f32 1.442695, %v891_v21 }
 0x44f   :  { %v615_v25 = vsel %vm205_vm1, %v4057_v22, 0.0 }
 0x450   :  { %3442 = vpow2.f32 %v895_v23  ;;  %616 = vadd.xlane.f32.xlu1 %v615_v25 }
 0x452   :  { %v1132_v26 = vpop.f32.mrf.mxu3 }
 0x453   :  { %v4062_v27 = vadd.f32 %v1132_v26, %v3904_v36  ;;  %v884_v29 = vpop.xlane.xlu2 %883 }
 0x454   :  { %v892_v30 = vsub.f32 %v871_v47, %v884_v29 }
 0x455   :  { %v1144_v31 = vsel %vm205_vm1, %v4062_v27, -inf }
 0x456   :  { %v4066_v33 = vpop.eup %3442  ;;  %v897_v34 = vmul.f32 1.442695, %v892_v30  ;;  %1145 = vmax.xlane.f32.xlu0 %v1144_v31 }
 0x457   :  { %v903_v35 = vsel %vm205_vm1, %v4066_v33, 0.0 }
 0x458   :  { %3444 = vpow2.f32 %v897_v34  ;;  %904 = vadd.xlane.f32.xlu1 %v903_v35 }
 0x45b   :  { %v3378_v37 = vpop.permute.xlu2 %3377 }
 0x45c   :  { %v3379_v36 = vunpack.i.l.bf16 %v3378_v37  ;;  %v3380_v40 = vunpack.i.h.bf16 %v3378_v37 }
 0x45e   :  { %v4073_v39 = vpop.eup %3444  ;;  %718 = vmatpush.msra.mxu1 %v3379_v36  ;;  %v3383_v41 = vpop.permute.xlu0 %3382 }
 0x45f   :  { %v3384_v43 = vunpack.i.l.bf16 %v3383_v41  ;;  %v906_v44 = vsel %vm205_vm1, %v4073_v39, 0.0  ;;  %v3385_v47 = vunpack.i.h.bf16 %v3383_v41 }
 0x460   :  { %907 = vadd.xlane.f32.xlu2 %v906_v44  ;;  %719 = vmatpush.msra.mxu1 %v3380_v40 }
 0x461   :  { %1136 = vmax.xlane.f32.xlu1 %v1135_v45 }
 0x462   :  { %720 = vmatpush.msra.mxu1 %v3384_v43 }
 0x464   :  { %721 = vmatpush.msra.mxu1 %v3385_v47 }
 0x468   :  { %1139 = vmax.xlane.f32.xlu2 %v1138_v48 }
 0x470   :  { %1142 = vmax.xlane.f32.xlu2 %v1141_v52 }
 0x47a   :  { %3387 = vrot.lane.b32.xlu1 %v3840_v2, %s3546_s30 }
 0x488   :  { %3397 = vrot.lane.b32.xlu2 %v3840_v2, %s3547_s10 }
 0x489   :  { %v887_v28 = vpop.xlane.xlu0 %886 }
 0x48a   :  { %v893_v53 = vsub.f32 %v4028_v51, %v887_v28 }
 0x48c   :  { %v899_v57 = vmul.f32 1.442695, %v893_v53 }
 0x48e   :  { %3446 = vpow2.f32 %v899_v57 }
 0x494   :  { %v4094_v62 = vpop.eup %3446 }
 0x495   :  { %v909_v32 = vsel %vm205_vm1, %v4094_v62, 0.0 }
 0x4a4   :  { %910 = vadd.xlane.f32.xlu1 %v909_v32 }
 0x4ab   :  { %v608_v0 = vpop.xlane.xlu1 %607 }
 0x4ac   :  { %3448 = vrcp.f32 %v608_v0  ;;  %v629_v7 = vand.u32 2147483648, %v608_v0  ;;  %v627_v8 = vand.u32 2147483647, %v608_v0  ;;  %vm623_vm7 = vweird.f32 %v608_v0 }
 0x4ae   :  { %v630_v9 = vor.u32 1.1754944e-38, %v629_v7  ;;  %vm628_vm9 = vcmp.eq.f32.partialorder %v627_v8, 8.507059e+37  ;;  %v890_v8 = vpop.xlane.xlu0 %889 }
 0x4b2   :  { %v3449_v1 = vpop.eup %3448 }
 0x4b3   :  { %v619_v3 = vmul.f32 %v3449_v1, %v608_v0  ;;  %v611_v4 = vpop.xlane.xlu1 %610  ;;  %vm624_vm6 = vweird.f32 %v3449_v1 }
 0x4b4   :  { %3450 = vrcp.f32 %v611_v4  ;;  %vm625_vm8 = vmor %vm623_vm7, %vm624_vm6  ;;  %v644_v18 = vand.u32 2147483648, %v611_v4  ;;  %v642_v20 = vand.u32 2147483647, %v611_v4  ;;  %vm638_vm11 = vweird.f32 %v611_v4 }
 0x4b5   :  { %v620_v6 = vsub.f32 1.0, %v619_v3 }
 0x4b6   :  { %v645_v25 = vor.u32 1.1754944e-38, %v644_v18  ;;  %vm643_vm13 = vcmp.eq.f32.partialorder %v642_v20, 8.507059e+37 }
 0x4b7   :  { %v621_v2 = vmul.f32 %v3449_v1, %v620_v6 }
 0x4b9   :  { %v622_v51 = vadd.f32 %v3449_v1, %v621_v2 }
 0x4ba   :  { %v3451_v63 = vpop.eup %3450 }
 0x4bb   :  { %v626_v11 = vsel %vm625_vm8, %v3449_v1, %v622_v51  ;;  %v634_v12 = vmul.f32 %v3451_v63, %v611_v4  ;;  %v614_v13 = vpop.xlane.xlu1 %613  ;;  %vm639_vm10 = vweird.f32 %v3451_v63 }
 0x4bc   :  { %v631_v14 = vsel %vm628_vm9, %v630_v9, %v626_v11  ;;  %3452 = vrcp.f32 %v614_v13  ;;  %vm640_vm12 = vmor %vm638_vm11, %vm639_vm10  ;;  %v659_v37 = vand.u32 2147483648, %v614_v13  ;;  %v657_v36 = vand.u32 2147483647, %v614_v13 }
 0x4bd   :  { %v635_v15 = vsub.f32 1.0, %v634_v12  ;;  %v632_v17 = vmul.f32 %v4045_v5, %v631_v14  ;;  %vm653_vm15 = vweird.f32 %v614_v13 }
 0x4be   :  { %v660_v43 = vor.u32 1.1754944e-38, %v659_v37  ;;  %vm658_vm4 = vcmp.eq.f32.partialorder %v657_v36, 8.507059e+37 }
 0x4bf   :  { %v636_v19 = vmul.f32 %v3451_v63, %v635_v15  ;;  %3235 = vmatmul.msk.f32.vlgmr.msra.gmra.mxu1 %vm205_vm1, %v632_v17 }
 0x4c1   :  { %v637_v21 = vadd.f32 %v3451_v63, %v636_v19 }
 0x4c2   :  { %v3453_v23 = vpop.eup %3452 }
 0x4c3   :  { %v649_v26 = vmul.f32 %v3453_v23, %v614_v13  ;;  %v617_v29 = vpop.xlane.xlu1 %616  ;;  %v641_v30 = vsel %vm640_vm12, %v3451_v63, %v637_v21  ;;  %vm654_vm14 = vweird.f32 %v3453_v23 }
 0x4c4   :  { %3454 = vrcp.f32 %v617_v29  ;;  %v646_v31 = vsel %vm643_vm13, %v645_v25, %v641_v30  ;;  %vm655_vm3 = vmor %vm653_vm15, %vm654_vm14  ;;  %v674_v28 = vand.u32 2147483648, %v617_v29  ;;  %v672_v57 = vand.u32 2147483647, %v617_v29 }
 0x4c5   :  { %v650_v34 = vsub.f32 1.0, %v649_v26  ;;  %v647_v5 = vmul.f32 %v4049_v10, %v646_v31  ;;  %vm668_vm6 = vweird.f32 %v617_v29  ;;  %v894_v31 = vsub.f32 %v4033_v55, %v890_v8 }
 0x4c6   :  { %v675_v0 = vor.u32 1.1754944e-38, %v674_v28  ;;  %vm673_vm8 = vcmp.eq.f32.partialorder %v672_v57, 8.507059e+37 }
 0x4c7   :  { %v651_v35 = vmul.f32 %v3453_v23, %v650_v34  ;;  %3236 = vmatmul.msk.f32.gmra.mxu1 %vm205_vm1, %v647_v5  ;;  %v901_v34 = vmul.f32 1.442695, %v894_v31 }
 0x4c9   :  { %v652_v40 = vadd.f32 %v3453_v23, %v651_v35  ;;  %v1146_v13 = vpop.xlane.xlu0 %1145  ;;  %v735_v35 = vld [vmem:[%s4900_s11 + $0x8] sm:$0xff] }
 0x4ca   :  { %v3455_v41 = vpop.eup %3454  ;;  %v1150_v15 = vsub.f32 %v4062_v27, %v1146_v13  ;;  %763 = vmatpush.msrb.mxu2 %v735_v35 }
 0x4cb   :  { %v664_v44 = vmul.f32 %v3455_v41, %v617_v29  ;;  %v4102_v45 = vpop.xlane.xlu1 %904  ;;  %v656_v47 = vsel %vm655_vm3, %v3453_v23, %v652_v40  ;;  %vm669_vm5 = vweird.f32 %v3455_v41 }
 0x4cc   :  { %v661_v52 = vsel %vm658_vm4, %v660_v43, %v656_v47  ;;  %vm670_vm7 = vmor %vm668_vm6, %vm669_vm5  ;;  %v1157_v18 = vmul.f32 1.442695, %v1150_v15  ;;  %vm920_vm11 = vweird.f32 %v4102_v45 }
 0x4cd   :  { %v665_v48 = vsub.f32 1.0, %v664_v44  ;;  %v662_v10 = vmul.f32 %v4053_v16, %v661_v52 }
 0x4cf   :  { %v666_v53 = vmul.f32 %v3455_v41, %v665_v48  ;;  %3237 = vmatmul.msk.f32.gmra.mxu1 %vm205_vm1, %v662_v10 }
 0x4d1   :  { %v667_v32 = vadd.f32 %v3455_v41, %v666_v53 }
 0x4d3   :  { %v4106_v1 = vpop.xlane.xlu2 %907  ;;  %v671_v3 = vsel %vm670_vm7, %v3455_v41, %v667_v32 }
 0x4d4   :  { %v1137_v4 = vpop.xlane.xlu1 %1136  ;;  %v676_v6 = vsel %vm673_vm8, %v675_v0, %v671_v3  ;;  %v924_v0 = vand.u32 2147483647, %v4102_v45  ;;  %vm935_vm6 = vweird.f32 %v4106_v1 }
 0x4d5   :  { %v1147_v7 = vsub.f32 %v4071_v38, %v1137_v4  ;;  %v677_v2 = vmul.f32 %v4057_v22, %v676_v6 }
 0x4d6   :  { %vm4168_vm13 = vcmp.eq.f32.partialorder %v924_v0, 8.507059e+37 }
 0x4d7   :  { %v1151_v16 = vmul.f32 1.442695, %v1147_v7  ;;  %3238 = vmatmul.msk.f32.gmra.mxu1 %vm205_vm1, %v677_v2  ;;  %v926_v7 = vand.u32 2147483648, %v4102_v45 }
 0x4d9   :  { %3456 = vpow2.f32 %v1151_v16  ;;  %v927_v15 = vor.u32 1.1754944e-38, %v926_v7 }
 0x4db   :  { %v1140_v51 = vpop.xlane.xlu2 %1139 }
 0x4dc   :  { %v1148_v63 = vsub.f32 %v4080_v24, %v1140_v51 }
 0x4de   :  { %v1153_v9 = vmul.f32 1.442695, %v1148_v63 }
 0x4df   :  { %v4112_v11 = vpop.eup %3456 }
 0x4e0   :  { %3458 = vpow2.f32 %v1153_v9  ;;  %v1159_v12 = vsel %vm205_vm1, %v4112_v11, 0.0 }
 0x4e1   :  { %1160 = vadd.xlane.f32.xlu0 %v1159_v12 }
 0x4e3   :  { %v1143_v38 = vpop.xlane.xlu2 %1142 }
 0x4e4   :  { %v1149_v22 = vsub.f32 %v4085_v49, %v1143_v38 }
 0x4e6   :  { %v4117_v14 = vpop.eup %3458  ;;  %v1155_v17 = vmul.f32 1.442695, %v1149_v22 }
 0x4e7   :  { %v1162_v24 = vsel %vm205_vm1, %v4117_v14, 0.0 }
 0x4e8   :  { %3460 = vpow2.f32 %v1155_v17  ;;  %1163 = vadd.xlane.f32.xlu2 %v1162_v24 }
 0x4e9   :  { %3462 = vpow2.f32 %v1157_v18 }
 0x4ea   :  { %3464 = vpow2.f32 %v901_v34 }
 0x4eb   :  { %v3398_v19 = vpop.permute.xlu2 %3397  ;;  %3466 = vrcp.f32 %v4102_v45 }
 0x4ec   :  { %v3399_v20 = vunpack.i.l.bf16 %v3398_v19  ;;  %v3388_v21 = vpop.permute.xlu1 %3387  ;;  %v3400_v26 = vunpack.i.h.bf16 %v3398_v19  ;;  %3468 = vrcp.f32 %v4106_v1 }
 0x4ed   :  { %v3389_v23 = vunpack.i.l.bf16 %v3388_v21  ;;  %v3390_v49 = vunpack.i.h.bf16 %v3388_v21 }
 0x4ee   :  { %v4122_v25 = vpop.eup %3460  ;;  %1267 = vmatpush.msrb.mxu0 %v3399_v20 }
 0x4ef   :  { %1011 = vmatpush.msrb.mxu1 %v3389_v23  ;;  %v1165_v27 = vsel %vm205_vm1, %v4122_v25, 0.0  ;;  %v4126_v29 = vpop.eup %3462 }
 0x4f0   :  { %1268 = vmatpush.msrb.mxu0 %v3400_v26  ;;  %1166 = vadd.xlane.f32.xlu1 %v1165_v27  ;;  %v1168_v30 = vsel %vm205_vm1, %v4126_v29, 0.0  ;;  %v4135_v5 = vpop.eup %3464 }
 0x4f1   :  { %1012 = vmatpush.msrb.mxu1 %v3390_v49  ;;  %v912_v37 = vsel %vm205_vm1, %v4135_v5, 0.0  ;;  %v3467_v55 = vpop.eup %3466 }
 0x4f2   :  { %v916_v41 = vmul.f32 %v3467_v55, %v4102_v45  ;;  %v4149_v47 = vpop.eup %3468  ;;  %vm921_vm9 = vweird.f32 %v3467_v55 }
 0x4f3   :  { %v931_v28 = vmul.f32 %v4149_v47, %v4106_v1  ;;  %vm4164_vm12 = vmor %vm920_vm11, %vm921_vm9  ;;  %vm936_vm4 = vweird.f32 %v4149_v47 }
 0x4f4   :  { %v917_v48 = vsub.f32 1.0, %v916_v41  ;;  %vm4194_vm8 = vmor %vm935_vm6, %vm936_vm4 }
 0x4f5   :  { %3392 = vrot.lane.b32.xlu0 %v3838_v60, %s3546_s30  ;;  %v932_v3 = vsub.f32 1.0, %v931_v28 }
 0x4f6   :  { %v918_v53 = vmul.f32 %v3467_v55, %v917_v48 }
 0x4f7   :  { %v933_v13 = vmul.f32 %v4149_v47, %v932_v3 }
 0x4f8   :  { %1169 = vadd.xlane.f32.xlu1 %v1168_v30  ;;  %v919_v6 = vadd.f32 %v3467_v55, %v918_v53 }
 0x4f9   :  { %v934_v31 = vadd.f32 %v4149_v47, %v933_v13 }
 0x4fa   :  { %v923_v22 = vsel %vm4164_vm12, %v3467_v55, %v919_v6 }
 0x4fb   :  { %v928_v49 = vsel %vm4168_vm13, %v927_v15, %v923_v22  ;;  %v938_v0 = vsel %vm4194_vm8, %v4149_v47, %v934_v31 }
 0x500   :  { %3402 = vrot.lane.b32.xlu2 %v3838_v60, %s3547_s10 }
 0x517   :  { %v4151_v52 = vpop.xlane.xlu1 %910 }
 0x518   :  { %v956_v12 = vand.u32 2147483648, %v4151_v52 }
 0x51f   :  { %913 = vadd.xlane.f32.xlu0 %v912_v37 }
 0x53c   :  { %v723_v36 = vpop.f32.mrf.mxu1 }
 0x53d   :  { %3239 = vmatmul.msk.f32.vlgmr.msrb.gmra.mxu2 %vm329_vm2, %v723_v36 }
 0x544   :  { %v726_v40 = vpop.f32.mrf.mxu1 }
 0x545   :  { %3240 = vmatmul.msk.f32.gmra.mxu2 %vm329_vm2, %v726_v40  ;;  %v941_v40 = vand.u32 2147483648, %v4106_v1 }
 0x547   :  { %v942_v3 = vor.u32 1.1754944e-38, %v941_v40 }
 0x54c   :  { %v729_v60 = vpop.f32.mrf.mxu1 }
 0x54d   :  { %3241 = vmatmul.msk.f32.gmra.mxu2 %vm329_vm2, %v729_v60 }
 0x554   :  { %v1161_v43 = vpop.xlane.xlu0 %1160  ;;  %v732_v44 = vpop.f32.mrf.mxu1 }
 0x555   :  { %3470 = vrcp.f32 %v1161_v43  ;;  %3242 = vmatmul.msk.f32.gmra.mxu2 %vm329_vm2, %v732_v44  ;;  %v1182_v2 = vand.u32 2147483648, %v1161_v43  ;;  %v1180_v8 = vand.u32 2147483647, %v1161_v43  ;;  %vm1176_vm14 = vweird.f32 %v1161_v43 }
 0x556   :  { %3472 = vrcp.f32 %v4151_v52 }
 0x557   :  { %v1183_v17 = vor.u32 1.1754944e-38, %v1182_v2  ;;  %vm1181_vm3 = vcmp.eq.f32.partialorder %v1180_v8, 8.507059e+37 }
 0x55b   :  { %v3471_v10 = vpop.eup %3470  ;;  %v4156_v57 = vpop.xlane.xlu2 %1163 }
 0x55c   :  { %v1172_v32 = vmul.f32 %v3471_v10, %v1161_v43  ;;  %3474 = vrcp.f32 %v4156_v57  ;;  %vm1177_vm10 = vweird.f32 %v3471_v10  ;;  %v4161_v51 = vpop.eup %3472  ;;  %v1197_v27 = vand.u32 2147483648, %v4156_v57  ;;  %v1284_v43 = vld [vmem:[%s4900_s11 + $0x18] sm:$0xff] }
 0x55d   :  { %vm1178_vm15 = vmor %vm1176_vm14, %vm1177_vm10  ;;  %v946_v21 = vmul.f32 %v4161_v51, %v4151_v52  ;;  %v1195_v36 = vand.u32 2147483647, %v4156_v57  ;;  %vm1191_vm7 = vweird.f32 %v4156_v57  ;;  %vm951_vm14 = vweird.f32 %v4161_v51 }
 0x55e   :  { %v1173_v4 = vsub.f32 1.0, %v1172_v32  ;;  %v1198_v48 = vor.u32 1.1754944e-38, %v1197_v27 }
 0x55f   :  { %v947_v55 = vsub.f32 1.0, %v946_v21  ;;  %vm1196_vm10 = vcmp.eq.f32.partialorder %v1195_v36, 8.507059e+37 }
 0x560   :  { %v1174_v16 = vmul.f32 %v3471_v10, %v1173_v4 }
 0x561   :  { %v948_v4 = vmul.f32 %v4161_v51, %v947_v55 }
 0x562   :  { %v3475_v63 = vpop.eup %3474  ;;  %v1175_v38 = vadd.f32 %v3471_v10, %v1174_v16 }
 0x563   :  { %v1187_v45 = vmul.f32 %v3475_v63, %v4156_v57  ;;  %v3403_v24 = vpop.permute.xlu2 %3402  ;;  %v4176_v18 = vpop.xlane.xlu1 %1166  ;;  %vm1192_vm5 = vweird.f32 %v3475_v63 }
 0x564   :  { %v1179_v19 = vsel %vm1178_vm15, %v3471_v10, %v1175_v38  ;;  %v3404_v20 = vunpack.i.l.bf16 %v3403_v24  ;;  %3476 = vrcp.f32 %v4176_v18  ;;  %v3405_v30 = vunpack.i.h.bf16 %v3403_v24  ;;  %vm1193_vm9 = vmor %vm1191_vm7, %vm1192_vm5 }
 0x565   :  { %v1184_v23 = vsel %vm1181_vm3, %v1183_v17, %v1179_v19  ;;  %v1188_v26 = vsub.f32 1.0, %v1187_v45  ;;  %v929_v10 = vmul.f32 %v4066_v33, %v928_v49  ;;  %v1212_v33 = vand.u32 2147483648, %v4176_v18 }
 0x566   :  { %1269 = vmatpush.msrb.mxu0 %v3404_v20  ;;  %v1185_v37 = vmul.f32 %v4112_v11, %v1184_v23  ;;  %v939_v11 = vand.u32 2147483647, %v4106_v1  ;;  %v1210_v8 = vand.u32 2147483647, %v4176_v18  ;;  %vm1206_vm13 = vweird.f32 %v4176_v18 }
 0x567   :  { %v1189_v34 = vmul.f32 %v3475_v63, %v1188_v26  ;;  %v3393_v35 = vpop.permute.xlu0 %3392  ;;  %v1213_v13 = vor.u32 1.1754944e-38, %v1212_v33  ;;  %vm950_vm3 = vweird.f32 %v4151_v52 }
 0x568   :  { %v3394_v60 = vunpack.i.l.bf16 %v3393_v35  ;;  %1270 = vmatpush.msrb.mxu0 %v3405_v30  ;;  %v3395_v28 = vunpack.i.h.bf16 %v3393_v35  ;;  %vm940_vm11 = vcmp.eq.f32.partialorder %v939_v11, 8.507059e+37  ;;  %vm1211_vm4 = vcmp.eq.f32.partialorder %v1210_v8, 8.507059e+37  ;;  %vm952_vm5 = vmor %vm950_vm3, %vm951_vm14  ;;  %v1028_v11 = vld [vmem:[%s4900_s11 + $0x10] sm:$0xff] }
 0x569   :  { %3271 = vmatmul.msk.f32.vlgmr.msrb.gmra.mxu0 %vm205_vm1, %v1185_v37  ;;  %v1190_v41 = vadd.f32 %v3475_v63, %v1189_v34  ;;  %v943_v7 = vsel %vm940_vm11, %v942_v3, %v938_v0  ;;  %1056 = vmatpush.msra.mxu2 %v1028_v11 }
 0x56a   :  { %v3477_v44 = vpop.eup %3476  ;;  %1013 = vmatpush.msrb.mxu1 %v3394_v60  ;;  %v944_v38 = vmul.f32 %v4073_v39, %v943_v7 }
 0x56b   :  { %v1202_v53 = vmul.f32 %v3477_v44, %v4176_v18  ;;  %v1170_v57 = vpop.xlane.xlu1 %1169  ;;  %v1194_v32 = vsel %vm1193_vm9, %v3475_v63, %v1190_v41  ;;  %vm1207_vm12 = vweird.f32 %v3477_v44  ;;  %v949_v63 = vadd.f32 %v4161_v51, %v948_v4 }
 0x56c   :  { %3478 = vrcp.f32 %v1170_v57  ;;  %1014 = vmatpush.msrb.mxu1 %v3395_v28  ;;  %v1199_v1 = vsel %vm1196_vm10, %v1198_v48, %v1194_v32  ;;  %vm1208_vm15 = vmor %vm1206_vm13, %vm1207_vm12  ;;  %v957_v18 = vor.u32 1.1754944e-38, %v956_v12  ;;  %v1227_v19 = vand.u32 2147483648, %v1170_v57 }
 0x56d   :  { %v1203_v6 = vsub.f32 1.0, %v1202_v53  ;;  %3255 = vmatmul.msk.f32.vlgmr.msrb.gmra.mxu1 %vm205_vm1, %v929_v10  ;;  %v1200_v16 = vmul.f32 %v4117_v14, %v1199_v1  ;;  %v954_v14 = vand.u32 2147483647, %v4151_v52  ;;  %v953_v24 = vsel %vm952_vm5, %v4161_v51, %v949_v63 }
 0x56e   :  { %v1225_v21 = vand.u32 2147483647, %v1170_v57  ;;  %vm1221_vm8 = vweird.f32 %v1170_v57  ;;  %v1228_v26 = vor.u32 1.1754944e-38, %v1227_v19  ;;  %1312 = vmatpush.msra.mxu1 %v1284_v43 }
 0x56f   :  { %v1204_v2 = vmul.f32 %v3477_v44, %v1203_v6  ;;  %vm955_vm6 = vcmp.eq.f32.partialorder %v954_v14, 8.507059e+37 }
 0x570   :  { %v958_v23 = vsel %vm955_vm6, %v957_v18, %v953_v24  ;;  %vm1226_vm10 = vcmp.eq.f32.partialorder %v1225_v21, 8.507059e+37 }
 0x571   :  { %3272 = vmatmul.msk.f32.gmra.mxu0 %vm205_vm1, %v1200_v16  ;;  %v1205_v47 = vadd.f32 %v3477_v44, %v1204_v2  ;;  %v959_v49 = vmul.f32 %v4094_v62, %v958_v23  ;;  %v3410_v16 = vld [vmem:[%s4901_s12] ss:$0 sm:$0xff] }
 0x572   :  { %v3479_v9 = vpop.eup %3478 }
 0x573   :  { %v1217_v22 = vmul.f32 %v3479_v9, %v1170_v57  ;;  %v1209_v15 = vsel %vm1208_vm15, %v3477_v44, %v1205_v47  ;;  %vm1222_vm7 = vweird.f32 %v3479_v9 }
 0x574   :  { %v1214_v17 = vsel %vm1211_vm4, %v1213_v13, %v1209_v15  ;;  %vm1223_vm9 = vmor %vm1221_vm8, %vm1222_vm7 }
 0x575   :  { %v1218_v45 = vsub.f32 1.0, %v1217_v22  ;;  %3256 = vmatmul.msk.f32.gmra.mxu1 %vm205_vm1, %v944_v38  ;;  %v1215_v39 = vmul.f32 %v4122_v25, %v1214_v17 }
 0x577   :  { %v1219_v20 = vmul.f32 %v3479_v9, %v1218_v45 }
 0x579   :  { %3273 = vmatmul.msk.f32.gmra.mxu0 %vm205_vm1, %v1215_v39  ;;  %v1220_v52 = vadd.f32 %v3479_v9, %v1219_v20 }
 0x57b   :  { %v1224_v27 = vsel %vm1223_vm9, %v3479_v9, %v1220_v52 }
 0x57c   :  { %v1229_v51 = vsel %vm1226_vm10, %v1228_v26, %v1224_v27 }
 0x57d   :  { %3257 = vmatmul.msk.f32.gmra.mxu1 %vm205_vm1, %v959_v49  ;;  %v1230_v30 = vmul.f32 %v4126_v29, %v1229_v51  ;;  %v3548_v51 = vmov 32.0  }
 0x581   :  { %3274 = vmatmul.msk.f32.gmra.mxu0 %vm205_vm1, %v1230_v30 }
 0x592   :  { %v914_v25 = vpop.xlane.xlu0 %913 }
 0x593   :  { %3480 = vrcp.f32 %v914_v25  ;;  %v971_v37 = vand.u32 2147483648, %v914_v25  ;;  %v969_v40 = vand.u32 2147483647, %v914_v25  ;;  %vm965_vm12 = vweird.f32 %v914_v25 }
 0x594   :  { %3482 = vrcp.f32 %v3548_v51 }
 0x595   :  { %v972_v60 = vor.u32 1.1754944e-38, %v971_v37  ;;  %vm970_vm14 = vcmp.eq.f32.partialorder %v969_v40, 8.507059e+37 }
 0x599   :  { %v3481_v31 = vpop.eup %3480 }
 0x59a   :  { %v961_v34 = vmul.f32 %v3481_v31, %v914_v25  ;;  %vm966_vm11 = vweird.f32 %v3481_v31  ;;  %v3483_v30 = vpop.eup %3482 }
 0x59b   :  { %vm967_vm13 = vmor %vm965_vm12, %vm966_vm11  ;;  %v1357_v25 = vmul.f32 32.0, %v3483_v30 }
 0x59c   :  { %v962_v35 = vsub.f32 1.0, %v961_v34 }
 0x59e   :  { %v963_v36 = vmul.f32 %v3481_v31, %v962_v35 }
 0x5a0   :  { %v964_v62 = vadd.f32 %v3481_v31, %v963_v36 }
 0x5a2   :  { %v968_v55 = vsel %vm967_vm13, %v3481_v31, %v964_v62 }
 0x5a3   :  { %v973_v41 = vsel %vm970_vm14, %v972_v60, %v968_v55 }
 0x5a4   :  { %v974_v29 = vmul.f32 %v4135_v5, %v973_v41 }
 0x5a6   :  { %3258 = vmatmul.msk.f32.gmra.mxu1 %vm205_vm1, %v974_v29 }
 0x5c0   :  { %v765_v0 = vpop.f32.mrf.mxu2 }
 0x5c1   :  { %v807_v33 = vadd.f32 %v4035_v56, %v765_v0  ;;  %v1501_v0 = vld [vmem:[%s4904_s15 + $0x180] sm:$0xff] }
 0x5c2   :  { %1577 = vmatpush.msrb.mxu2 %v1501_v0  ;;  %v1490_v0 = vld [vmem:[%s4904_s15 + $0x128] sm:$0xff] }
 0x5c8   :  { %v768_v3 = vpop.f32.mrf.mxu2 }
 0x5c9   :  { %v810_v63 = vadd.f32 %v4039_v58, %v768_v3  ;;  %v1502_v3 = vld [vmem:[%s4904_s15 + $0x188] sm:$0xff] }
 0x5ca   :  { %1606 = vmatpush.msrb.mxu3 %v1502_v3 }
 0x5d0   :  { %v771_v1 = vpop.f32.mrf.mxu2 }
 0x5d1   :  { %v813_v15 = vadd.f32 %v4041_v61, %v771_v1  ;;  %v1503_v1 = vld [vmem:[%s4904_s15 + $0x190] sm:$0xff] }
 0x5d2   :  { %1635 = vmatpush.msra.mxu0 %v1503_v1  ;;  %v1491_v1 = vld [vmem:[%s4904_s15 + $0x130] sm:$0xff] }
 0x5d8   :  { %v774_v4 = vpop.f32.mrf.mxu2 }
 0x5d9   :  { %v816_v21 = vadd.f32 %v4043_v59, %v774_v4  ;;  %v1504_v4 = vld [vmem:[%s4904_s15 + $0x198] sm:$0xff] }
 0x5da   :  { %1664 = vmatpush.msrb.mxu1 %v1504_v4  ;;  %v1492_v4 = vld [vmem:[%s4904_s15 + $0x138] sm:$0xff] }
 0x5e6   :  { %v1272_v44 = vpop.f32.mrf.mxu0 }
 0x5e7   :  { %3275 = vmatmul.msk.f32.vlgmr.msra.gmra.mxu1 %vm329_vm2, %v1272_v44 }
 0x5ea   :  { %v1016_v48 = vpop.f32.mrf.mxu1 }
 0x5eb   :  { %3259 = vmatmul.msk.f32.vlgmr.msra.gmra.mxu2 %vm329_vm2, %v1016_v48 }
 0x5ee   :  { %v1275_v28 = vpop.f32.mrf.mxu0 }
 0x5ef   :  { %3276 = vmatmul.msk.f32.gmra.mxu1 %vm329_vm2, %v1275_v28 }
 0x5f2   :  { %v1019_v5 = vpop.f32.mrf.mxu1 }
 0x5f3   :  { %3260 = vmatmul.msk.f32.gmra.mxu2 %vm329_vm2, %v1019_v5 }
 0x5f6   :  { %v1278_v10 = vpop.f32.mrf.mxu0 }
 0x5f7   :  { %3277 = vmatmul.msk.f32.gmra.mxu1 %vm329_vm2, %v1278_v10 }
 0x5fa   :  { %v1022_v53 = vpop.f32.mrf.mxu1 }
 0x5fb   :  { %3261 = vmatmul.msk.f32.gmra.mxu2 %vm329_vm2, %v1022_v53 }
 0x5fe   :  { %v1281_v57 = vpop.f32.mrf.mxu0 }
 0x5ff   :  { %3278 = vmatmul.msk.f32.gmra.mxu1 %vm329_vm2, %v1281_v57 }
 0x623   :  { %v1025_v32 = vpop.f32.mrf.mxu1 }
 0x624   :  { %3262 = vmatmul.msk.f32.gmra.mxu2 %vm329_vm2, %v1025_v32  ;;  %vm1361_vm2 = vweird.f32 %v3483_v30 }
 0x664   :  { %v1314_v6 = vpop.f32.mrf.mxu1 }
 0x66c   :  { %v1317_v12 = vpop.f32.mrf.mxu1 }
 0x66e   :  { %v1058_v7 = vpop.f32.mrf.mxu2 }
 0x66f   :  { %v1070_v2 = vadd.f32 %v1058_v7, %v807_v33  ;;  %v1486_v33 = vld [vmem:[%s4904_s15 + $0x108] sm:$0xff]  ;;  %v1487_v7 = vld [vmem:[%s4904_s15 + $0x110] sm:$0xff] }
 0x670   :  { %1607 = vmatpush.msrb.mxu3 %v1486_v33  ;;  %1636 = vmatpush.msra.mxu0 %v1487_v7  ;;  %v1474_v7 = vld [vmem:[%s4904_s15 + $0xa8] sm:$0xff] }
 0x671   :  { %v1326_v8 = vadd.f32 %v1314_v6, %v1070_v2  ;;  %v1485_v6 = vld [vmem:[%s4904_s15 + $0x100] sm:$0xff]  ;;  %v1488_v2 = vld [vmem:[%s4904_s15 + $0x118] sm:$0xff] }
 0x672   :  { %1578 = vmatpush.msrb.mxu2 %v1485_v6  ;;  %1665 = vmatpush.msrb.mxu1 %v1488_v2  ;;  %v1473_v6 = vld [vmem:[%s4904_s15 + $0xa0] sm:$0xff]  ;;  %v1475_v2 = vld [vmem:[%s4904_s15 + $0xb0] sm:$0xff] }
 0x673   :  { %v1334_v47 = vadd.f32 %v3410_v16, %v1326_v8  ;;  %v1470_v8 = vld [vmem:[%s4904_s15 + $0x88] sm:$0xff] }
 0x674   :  { %v1320_v19 = vpop.f32.mrf.mxu1  ;;  %1608 = vmatpush.msrb.mxu3 %v1470_v8  ;;  %v1457_v8 = vld [vmem:[%s4904_s15 + $0x20] sm:$0xff] }
 0x675   :  { %v1338_v9 = vadd.f32 %v1334_v47, %v3803_v42  ;;  %v1471_v47 = vld [vmem:[%s4904_s15 + $0x90] sm:$0xff] }
 0x676   :  { %v1061_v13 = vpop.f32.mrf.mxu2  ;;  %1637 = vmatpush.msra.mxu0 %v1471_v47  ;;  %v1458_v47 = vld [vmem:[%s4904_s15 + $0x28] sm:$0xff] }
 0x677   :  { %v1071_v38 = vadd.f32 %v1061_v13, %v810_v63  ;;  %v1344_v14 = vsel %vm205_vm1, %v1338_v9, 0.0  ;;  %v1472_v63 = vld [vmem:[%s4904_s15 + $0x98] sm:$0xff]  ;;  %v1455_v13 = vld [vmem:[%s4904_s15 + $0x10] sm:$0xff] }
 0x678   :  { %1345 = vadd.xlane.f32.xlu2 %v1344_v14  ;;  %1666 = vmatpush.msrb.mxu1 %v1472_v63 }
 0x679   :  { %v1327_v22 = vadd.f32 %v1317_v12, %v1071_v38  ;;  %v1454_v12 = vld [vmem:[%s4904_s15 + $0x8] sm:$0xff]  ;;  %v1456_v38 = vld [vmem:[%s4904_s15 + $0x18] sm:$0xff]  ;;  %1638 = vmatpush.msra.mxu0 %v1455_v13 }
 0x67a   :  { %1609 = vmatpush.msrb.mxu3 %v1454_v12  ;;  %1667 = vmatpush.msrb.mxu1 %v1456_v38  ;;  %v1460_v12 = vld [vmem:[%s4904_s15 + $0x38] sm:$0xff] }
 0x67b   :  { %v1335_v56 = vadd.f32 %v3410_v16, %v1327_v22 }
 0x67c   :  { %v1323_v61 = vpop.f32.mrf.mxu1 }
 0x67d   :  { %v1339_v17 = vadd.f32 %v1335_v56, %v3809_v46 }
 0x67e   :  { %v1064_v45 = vpop.f32.mrf.mxu2 }
 0x67f   :  { %v1072_v24 = vadd.f32 %v1064_v45, %v813_v15  ;;  %v1347_v18 = vsel %vm205_vm1, %v1339_v17, 0.0 }
 0x680   :  { %1348 = vadd.xlane.f32.xlu1 %v1347_v18 }
 0x681   :  { %v1328_v58 = vadd.f32 %v1320_v19, %v1072_v24 }
 0x683   :  { %v1336_v42 = vadd.f32 %v3410_v16, %v1328_v58 }
 0x685   :  { %v1340_v20 = vadd.f32 %v1336_v42, %v3815_v50  ;;  %v1358_v50 = vsub.f32 1.0, %v1357_v25 }
 0x687   :  { %v1350_v39 = vsel %vm205_vm1, %v1340_v20, 0.0  ;;  %v1359_v31 = vmul.f32 %v3483_v30, %v1358_v50 }
 0x688   :  { %1351 = vadd.xlane.f32.xlu1 %v1350_v39 }
 0x689   :  { %v1360_v34 = vadd.f32 %v3483_v30, %v1359_v31 }
 0x68b   :  { %v4257_v35 = vsel %vm1361_vm2, %v3483_v30, %v1360_v34 }
 0x6a7   :  { %v1067_v23 = vpop.f32.mrf.mxu2 }
 0x6a8   :  { %v1073_v52 = vadd.f32 %v1067_v23, %v816_v21 }
 0x6aa   :  { %v1329_v26 = vadd.f32 %v1323_v61, %v1073_v52 }
 0x6ac   :  { %v1337_v46 = vadd.f32 %v3410_v16, %v1329_v26  ;;  %v1469_v16 = vld [vmem:[%s4904_s15 + $0x80] sm:$0xff] }
 0x6ad   :  { %1579 = vmatpush.msrb.mxu2 %v1469_v16  ;;  %v4337_v26 = vld [vmem:[%s4902_s13] ss:$0 sm:$0xff]  ;;  %v1476_v16 = vld [vmem:[%s4904_s15 + $0xb8] sm:$0xff] }
 0x6ae   :  { %v1341_v49 = vadd.f32 %v1337_v46, %v3821_v54 }
 0x6b0   :  { %v1353_v27 = vsel %vm205_vm1, %v1341_v49, 0.0 }
 0x6b1   :  { %1354 = vadd.xlane.f32.xlu1 %v1353_v27  ;;  %v4342_v27 = vld [vmem:[%s4903_s14] ss:$0 sm:$0xff] }
 0x6eb   :  { %v1346_v59 = vpop.xlane.xlu2 %1345 }
 0x6ec   :  { %v1363_v37 = vmul.f32 %v4257_v35, %v1346_v59 }
 0x6ee   :  { %v4260_v36 = vsub.f32 %v1338_v9, %v1363_v37  ;;  %v1453_v9 = vld [vmem:[%s4904_s15] sm:$0xff] }
 0x6ef   :  { %1580 = vmatpush.msrb.mxu2 %v1453_v9  ;;  %v1459_v9 = vld [vmem:[%s4904_s15 + $0x30] sm:$0xff] }
 0x6f0   :  { %v1371_v54 = vmul.f32 %v4260_v36, %v4260_v36 }
 0x6f2   :  { %v1375_v40 = vsel %vm205_vm1, %v1371_v54, 0.0 }
 0x6f3   :  { %1376 = vadd.xlane.f32.xlu0 %v1375_v40  ;;  %v1349_v62 = vpop.xlane.xlu1 %1348 }
 0x6f4   :  { %v1364_v60 = vmul.f32 %v4257_v35, %v1349_v62 }
 0x6f6   :  { %v4266_v55 = vsub.f32 %v1339_v17, %v1364_v60 }
 0x6f8   :  { %v1372_v41 = vmul.f32 %v4266_v55, %v4266_v55 }
 0x6fa   :  { %v1378_v29 = vsel %vm205_vm1, %v1372_v41, 0.0 }
 0x6fb   :  { %v1352_v43 = vpop.xlane.xlu1 %1351  ;;  %1379 = vadd.xlane.f32.xlu1 %v1378_v29 }
 0x6fc   :  { %v1365_v11 = vmul.f32 %v4257_v35, %v1352_v43 }
 0x6fe   :  { %v4272_v44 = vsub.f32 %v1340_v20, %v1365_v11 }
 0x700   :  { %v1373_v48 = vmul.f32 %v4272_v44, %v4272_v44 }
 0x702   :  { %v1381_v28 = vsel %vm205_vm1, %v1373_v48, 0.0 }
 0x703   :  { %1382 = vadd.xlane.f32.xlu0 %v1381_v28 }
 0x724   :  { %v1355_v5 = vpop.xlane.xlu1 %1354 }
 0x725   :  { %v1366_v10 = vmul.f32 %v4257_v35, %v1355_v5  ;;  %v1506_v5 = vld [vmem:[%s4904_s15 + $0x1a8] sm:$0xff] }
 0x726   :  { %1722 = vmatpush.msra.mxu3 %v1506_v5  ;;  %v2108_v5 = vld [vmem:[#allocation2 + $0x78] sm:$0xff] }
 0x727   :  { %v4278_v53 = vsub.f32 %v1341_v49, %v1366_v10  ;;  %v1507_v10 = vld [vmem:[%s4904_s15 + $0x1b0] sm:$0xff] }
 0x728   :  { %1751 = vmatpush.msrb.mxu0 %v1507_v10  ;;  %1723 = vmatpush.msra.mxu3 %v1490_v0  ;;  %v2124_v10 = vld [vmem:[#allocation2 + $0xf8] sm:$0xff]  ;;  %v2107_v0 = vld [vmem:[#allocation2 + $0x70] sm:$0xff] }
 0x729   :  { %v1374_v57 = vmul.f32 %v4278_v53, %v4278_v53 }
 0x72a   :  { %1752 = vmatpush.msrb.mxu0 %v1491_v1  ;;  %1724 = vmatpush.msra.mxu3 %v1474_v7  ;;  %v2139_v1 = vld [vmem:[#allocation2 + $0x170] sm:$0xff]  ;;  %v2138_v7 = vld [vmem:[#allocation2 + $0x168] sm:$0xff] }
 0x72b   :  { %v1384_v32 = vsel %vm205_vm1, %v1374_v57, 0.0  ;;  %v1508_v57 = vld [vmem:[%s4904_s15 + $0x1b8] sm:$0xff] }
 0x72c   :  { %1385 = vadd.xlane.f32.xlu1 %v1384_v32  ;;  %v1489_v32 = vld [vmem:[%s4904_s15 + $0x120] sm:$0xff]  ;;  %1780 = vmatpush.msra.mxu1 %v1508_v57  ;;  %v2140_v57 = vld [vmem:[#allocation2 + $0x178] sm:$0xff] }
 0x72d   :  { %1753 = vmatpush.msrb.mxu0 %v1475_v2  ;;  %1725 = vmatpush.msra.mxu3 %v1458_v47  ;;  %v2154_v2 = vld [vmem:[#allocation2 + $0x1e8] sm:$0xff]  ;;  %v2137_v47 = vld [vmem:[#allocation2 + $0x160] sm:$0xff] }
 0x72e   :  { %1781 = vmatpush.msra.mxu1 %v1492_v4  ;;  %v2155_v4 = vld [vmem:[#allocation2 + $0x1f0] sm:$0xff] }
 0x72f   :  { %1754 = vmatpush.msrb.mxu0 %v1459_v9  ;;  %v2104_v9 = vld [vmem:[#allocation2 + $0x58] sm:$0xff] }
 0x730   :  { %1782 = vmatpush.msra.mxu1 %v1476_v16  ;;  %v2105_v16 = vld [vmem:[#allocation2 + $0x60] sm:$0xff] }
 0x732   :  { %1783 = vmatpush.msra.mxu1 %v1460_v12  ;;  %v2120_v12 = vld [vmem:[#allocation2 + $0xd8] sm:$0xff] }
 0x766   :  { %v1377_v14 = vpop.xlane.xlu0 %1376 }
 0x767   :  { %v1387_v22 = vmul.f32 %v1377_v14, %v4257_v35 }
 0x769   :  { %v1391_v56 = vadd.f32 1e-05, %v1387_v22 }
 0x76b   :  { %3484 = vrsqrt.f32 %v1391_v56  ;;  %vm1401_vm3 = vweird.f32 %v1391_v56 }
 0x76e   :  { %v1380_v15 = vpop.xlane.xlu1 %1379 }
 0x76f   :  { %v1388_v17 = vmul.f32 %v1380_v15, %v4257_v35 }
 0x771   :  { %v3485_v45 = vpop.eup %3484  ;;  %v1392_v24 = vadd.f32 1e-05, %v1388_v17 }
 0x772   :  { %v1396_v18 = vmul.f32 %v3485_v45, %v1391_v56  ;;  %vm1402_vm15 = vweird.f32 %v3485_v45 }
 0x773   :  { %3486 = vrsqrt.f32 %v1392_v24  ;;  %vm1403_vm4 = vmor %vm1401_vm3, %vm1402_vm15  ;;  %vm1411_vm6 = vweird.f32 %v1392_v24 }
 0x774   :  { %v1397_v19 = vmul.f32 %v3485_v45, %v1396_v18 }
 0x776   :  { %v1398_v58 = vmul.f32 0.5, %v1397_v19  ;;  %v1383_v42 = vpop.xlane.xlu0 %1382  ;;  %v1510_v19 = vld [vmem:[%s4904_s15 + $0x1c8] sm:$0xff] }
 0x777   :  { %v1389_v20 = vmul.f32 %v1383_v42, %v4257_v35  ;;  %v1512_v42 = vld [vmem:[%s4904_s15 + $0x1d8] sm:$0xff] }
 0x778   :  { %v1399_v39 = vsub.f32 1.5, %v1398_v58  ;;  %v1511_v58 = vld [vmem:[%s4904_s15 + $0x1d0] sm:$0xff] }
 0x779   :  { %v3487_v21 = vpop.eup %3486  ;;  %v1393_v23 = vadd.f32 1e-05, %v1389_v20  ;;  %v1493_v20 = vld [vmem:[%s4904_s15 + $0x140] sm:$0xff] }
 0x77a   :  { %v1400_v52 = vmul.f32 %v3485_v45, %v1399_v39  ;;  %v1406_v61 = vmul.f32 %v3487_v21, %v1392_v24  ;;  %vm1412_vm5 = vweird.f32 %v3487_v21  ;;  %v1494_v39 = vld [vmem:[%s4904_s15 + $0x148] sm:$0xff] }
 0x77b   :  { %3488 = vrsqrt.f32 %v1393_v23  ;;  %vm1413_vm7 = vmor %vm1411_vm6, %vm1412_vm5  ;;  %vm1421_vm9 = vweird.f32 %v1393_v23 }
 0x77c   :  { %v1404_v46 = vsel %vm1403_vm4, %v3485_v45, %v1400_v52  ;;  %v1407_v49 = vmul.f32 %v3487_v21, %v1406_v61  ;;  %v1477_v52 = vld [vmem:[%s4904_s15 + $0xc0] sm:$0xff]  ;;  %v1478_v61 = vld [vmem:[%s4904_s15 + $0xc8] sm:$0xff] }
 0x77d   :  { %v1435_v51 = vmul.f32 %v1404_v46, %v4260_v36  ;;  %v1480_v46 = vld [vmem:[%s4904_s15 + $0xd8] sm:$0xff] }
 0x77e   :  { %v1408_v30 = vmul.f32 0.5, %v1407_v49  ;;  %v1461_v49 = vld [vmem:[%s4904_s15 + $0x40] sm:$0xff] }
 0x77f   :  { %v1442_v25 = vmul.f32 %v4337_v26, %v1435_v51  ;;  %v1463_v51 = vld [vmem:[%s4904_s15 + $0x50] sm:$0xff] }
 0x780   :  { %v1409_v50 = vsub.f32 1.5, %v1408_v30  ;;  %v1464_v30 = vld [vmem:[%s4904_s15 + $0x58] sm:$0xff] }
 0x781   :  { %v3489_v31 = vpop.eup %3488  ;;  %v4347_v34 = vadd.f32 %v4342_v27, %v1442_v25  ;;  %v1513_v25 = vld [vmem:[%s4904_s15 + $0x1e0] sm:$0xff] }
 0x782   :  { %v1410_v59 = vmul.f32 %v3487_v21, %v1409_v50  ;;  %v1416_v37 = vmul.f32 %v3489_v31, %v1393_v23  ;;  %vm1422_vm8 = vweird.f32 %v3489_v31  ;;  %v1496_v23 = vld [vmem:[%s4904_s15 + $0x158] sm:$0xff]  ;;  %v1514_v50 = vld [vmem:[%s4904_s15 + $0x1e8] sm:$0xff] }
 0x783   :  { %3279 = vmatmul.msk.f32.vlgmr.msrb.gmra.mxu2 %vm205_vm1, %v4347_v34  ;;  %3283 = vmatmul.msk.f32.vlgmr.msrb.gmra.mxu3 %vm205_vm1, %v4347_v34  ;;  %vm1423_vm10 = vmor %vm1421_vm9, %vm1422_vm8 }
 0x784   :  { %v1414_v36 = vsel %vm1413_vm7, %v3487_v21, %v1410_v59  ;;  %v1417_v54 = vmul.f32 %v3489_v31, %v1416_v37  ;;  %3287 = vmatmul.msk.f32.vlgmr.msra.gmra.mxu0 %vm205_vm1, %v4347_v34  ;;  %3291 = vmatmul.msk.f32.vlgmr.msrb.gmra.mxu1 %vm205_vm1, %v4347_v34  ;;  %v1495_v21 = vld [vmem:[%s4904_s15 + $0x150] sm:$0xff]  ;;  %v1516_v59 = vld [vmem:[%s4904_s15 + $0x1f8] sm:$0xff]  ;;  %v1497_v37 = vld [vmem:[%s4904_s15 + $0x160] sm:$0xff] }
 0x785   :  { %v1436_v40 = vmul.f32 %v1414_v36, %v4266_v55  ;;  %1838 = vmatpush.msrb.mxu3 %v1510_v19  ;;  %1867 = vmatpush.msra.mxu0 %v1511_v58  ;;  %v1498_v36 = vld [vmem:[%s4904_s15 + $0x168] sm:$0xff]  ;;  %v2101_v19 = vld [vmem:[#allocation2 + $0x40] sm:$0xff] }
 0x786   :  { %v1418_v62 = vmul.f32 0.5, %v1417_v54  ;;  %1896 = vmatpush.msrb.mxu1 %v1512_v42  ;;  %v1499_v54 = vld [vmem:[%s4904_s15 + $0x170] sm:$0xff]  ;;  %v2117_v58 = vld [vmem:[#allocation2 + $0xc0] sm:$0xff] }
 0x787   :  { %v1443_v60 = vmul.f32 %v4337_v26, %v1436_v40  ;;  %1839 = vmatpush.msrb.mxu3 %v1494_v39  ;;  %1868 = vmatpush.msra.mxu0 %v1495_v21  ;;  %v1500_v40 = vld [vmem:[%s4904_s15 + $0x178] sm:$0xff]  ;;  %v2133_v42 = vld [vmem:[#allocation2 + $0x140] sm:$0xff] }
 0x788   :  { %v1419_v41 = vsub.f32 1.5, %v1418_v62  ;;  %1897 = vmatpush.msrb.mxu1 %v1496_v23  ;;  %v1481_v62 = vld [vmem:[%s4904_s15 + $0xe0] sm:$0xff]  ;;  %v2100_v39 = vld [vmem:[#allocation2 + $0x38] sm:$0xff] }
 0x789   :  { %v4360_v29 = vadd.f32 %v4342_v27, %v1443_v60  ;;  %1840 = vmatpush.msrb.mxu3 %v1478_v61  ;;  %v1482_v60 = vld [vmem:[%s4904_s15 + $0xe8] sm:$0xff]  ;;  %v2116_v21 = vld [vmem:[#allocation2 + $0xb8] sm:$0xff]  ;;  %v2099_v61 = vld [vmem:[#allocation2 + $0x30] sm:$0xff] }
 0x78a   :  { %v1420_v43 = vmul.f32 %v3489_v31, %v1419_v41  ;;  %1898 = vmatpush.msrb.mxu1 %v1480_v46  ;;  %v1483_v41 = vld [vmem:[%s4904_s15 + $0xf0] sm:$0xff]  ;;  %v2132_v23 = vld [vmem:[#allocation2 + $0x138] sm:$0xff] }
 0x78b   :  { %3280 = vmatmul.msk.f32.gmra.mxu2 %vm205_vm1, %v4360_v29  ;;  %3284 = vmatmul.msk.f32.gmra.mxu3 %vm205_vm1, %v4360_v29  ;;  %v2131_v46 = vld [vmem:[#allocation2 + $0x130] sm:$0xff] }
 0x78c   :  { %v1424_v11 = vsel %vm1423_vm10, %v3489_v31, %v1420_v43  ;;  %3288 = vmatmul.msk.f32.gmra.mxu0 %vm205_vm1, %v4360_v29  ;;  %3292 = vmatmul.msk.f32.gmra.mxu1 %vm205_vm1, %v4360_v29  ;;  %v1515_v31 = vld [vmem:[%s4904_s15 + $0x1f0] sm:$0xff]  ;;  %v1484_v43 = vld [vmem:[%s4904_s15 + $0xf8] sm:$0xff] }
 0x78d   :  { %v1437_v55 = vmul.f32 %v1424_v11, %v4272_v44  ;;  %v1505_v44 = vld [vmem:[%s4904_s15 + $0x1a0] sm:$0xff]  ;;  %1899 = vmatpush.msrb.mxu1 %v1464_v30  ;;  %v2130_v30 = vld [vmem:[#allocation2 + $0x128] sm:$0xff] }
 0x78e   :  { %1693 = vmatpush.msra.mxu2 %v1505_v44  ;;  %v1465_v11 = vld [vmem:[%s4904_s15 + $0x60] sm:$0xff]  ;;  %v1468_v44 = vld [vmem:[%s4904_s15 + $0x78] sm:$0xff] }
 0x78f   :  { %v1444_v48 = vmul.f32 %v4337_v26, %v1437_v55  ;;  %v1466_v55 = vld [vmem:[%s4904_s15 + $0x68] sm:$0xff] }
 0x790   :  { %1694 = vmatpush.msra.mxu2 %v1489_v32  ;;  %v2156_v32 = vld [vmem:[#allocation2 + $0x1f8] sm:$0xff] }
 0x791   :  { %v4373_v28 = vadd.f32 %v4342_v27, %v1444_v48  ;;  %v1467_v48 = vld [vmem:[%s4904_s15 + $0x70] sm:$0xff] }
 0x792   :  { %1695 = vmatpush.msra.mxu2 %v1473_v6  ;;  %v2106_v6 = vld [vmem:[#allocation2 + $0x68] sm:$0xff] }
 0x793   :  { %3281 = vmatmul.msk.f32.gmra.mxu2 %vm205_vm1, %v4373_v28  ;;  %3285 = vmatmul.msk.f32.gmra.mxu3 %vm205_vm1, %v4373_v28 }
 0x794   :  { %3289 = vmatmul.msk.f32.gmra.mxu0 %vm205_vm1, %v4373_v28  ;;  %3293 = vmatmul.msk.f32.gmra.mxu1 %vm205_vm1, %v4373_v28 }
 0x795   :  { %1696 = vmatpush.msra.mxu2 %v1457_v8  ;;  %v2121_v8 = vld [vmem:[#allocation2 + $0xe0] sm:$0xff] }
 0x79f   :  { %v1386_v3 = vpop.xlane.xlu1 %1385 }
 0x7a0   :  { %v1390_v33 = vmul.f32 %v1386_v3, %v4257_v35  ;;  %v2123_v3 = vld [vmem:[#allocation2 + $0xf0] sm:$0xff] }
 0x7a2   :  { %v1394_v63 = vadd.f32 1e-05, %v1390_v33  ;;  %v2122_v33 = vld [vmem:[#allocation2 + $0xe8] sm:$0xff] }
 0x7a4   :  { %3490 = vrsqrt.f32 %v1394_v63  ;;  %vm1431_vm12 = vweird.f32 %v1394_v63 }
 0x7aa   :  { %v3491_v13 = vpop.eup %3490 }
 0x7ab   :  { %v1426_v38 = vmul.f32 %v3491_v13, %v1394_v63  ;;  %vm1432_vm11 = vweird.f32 %v3491_v13  ;;  %v2153_v63 = vld [vmem:[#allocation2 + $0x1e0] sm:$0xff] }
 0x7ac   :  { %vm1433_vm13 = vmor %vm1431_vm12, %vm1432_vm11 }
 0x7ad   :  { %v1427_v14 = vmul.f32 %v3491_v13, %v1426_v38  ;;  %v2152_v38 = vld [vmem:[#allocation2 + $0x1d8] sm:$0xff] }
 0x7af   :  { %v1428_v22 = vmul.f32 0.5, %v1427_v14  ;;  %v2103_v14 = vld [vmem:[#allocation2 + $0x50] sm:$0xff] }
 0x7b1   :  { %v1429_v56 = vsub.f32 1.5, %v1428_v22  ;;  %v2119_v22 = vld [vmem:[#allocation2 + $0xd0] sm:$0xff] }
 0x7b3   :  { %v1430_v15 = vmul.f32 %v3491_v13, %v1429_v56  ;;  %v2135_v56 = vld [vmem:[#allocation2 + $0x150] sm:$0xff] }
 0x7b5   :  { %v1434_v17 = vsel %vm1433_vm13, %v3491_v13, %v1430_v15  ;;  %v2136_v13 = vld [vmem:[#allocation2 + $0x158] sm:$0xff]  ;;  %v2151_v15 = vld [vmem:[#allocation2 + $0x1d0] sm:$0xff] }
 0x7b6   :  { %v1438_v45 = vmul.f32 %v1434_v17, %v4278_v53  ;;  %v1509_v53 = vld [vmem:[%s4904_s15 + $0x1c0] sm:$0xff]  ;;  %v2102_v17 = vld [vmem:[#allocation2 + $0x48] sm:$0xff] }
 0x7b7   :  { %1809 = vmatpush.msrb.mxu2 %v1509_v53  ;;  %v2150_v53 = vld [vmem:[#allocation2 + $0x1c8] sm:$0xff] }
 0x7b8   :  { %v1445_v24 = vmul.f32 %v4337_v26, %v1438_v45  ;;  %v1479_v26 = vld [vmem:[%s4904_s15 + $0xd0] sm:$0xff]  ;;  %v2118_v45 = vld [vmem:[#allocation2 + $0xc8] sm:$0xff] }
 0x7b9   :  { %1810 = vmatpush.msrb.mxu2 %v1493_v20  ;;  %1869 = vmatpush.msra.mxu0 %v1479_v26  ;;  %v2149_v20 = vld [vmem:[#allocation2 + $0x1c0] sm:$0xff]  ;;  %v2115_v26 = vld [vmem:[#allocation2 + $0xb0] sm:$0xff] }
 0x7ba   :  { %v4435_v18 = vadd.f32 %v4342_v27, %v1445_v24  ;;  %v1462_v27 = vld [vmem:[%s4904_s15 + $0x48] sm:$0xff] }
 0x7bb   :  { %1811 = vmatpush.msrb.mxu2 %v1477_v52  ;;  %1841 = vmatpush.msrb.mxu3 %v1462_v27  ;;  %v2134_v24 = vld [vmem:[#allocation2 + $0x148] sm:$0xff]  ;;  %v2148_v52 = vld [vmem:[#allocation2 + $0x1b8] sm:$0xff] }
 0x7bc   :  { %3282 = vmatmul.msk.f32.gmra.mxu2 %vm205_vm1, %v4435_v18  ;;  %3286 = vmatmul.msk.f32.gmra.mxu3 %vm205_vm1, %v4435_v18  ;;  %v2098_v27 = vld [vmem:[#allocation2 + $0x28] sm:$0xff] }
 0x7bd   :  { %3290 = vmatmul.msk.f32.gmra.mxu0 %vm205_vm1, %v4435_v18  ;;  %3294 = vmatmul.msk.f32.gmra.mxu1 %vm205_vm1, %v4435_v18 }
 0x7be   :  { %1812 = vmatpush.msrb.mxu2 %v1461_v49  ;;  %1870 = vmatpush.msra.mxu0 %v1463_v51  ;;  %v2147_v49 = vld [vmem:[#allocation2 + $0x1b0] sm:$0xff]  ;;  %v2114_v51 = vld [vmem:[#allocation2 + $0xa8] sm:$0xff] }
 0x7c4   :  { %3295 = vmatmul.msk.f32.vlgmr.msra.gmra.mxu2 %vm205_vm1, %v4347_v34  ;;  %3299 = vmatmul.msk.f32.vlgmr.msra.gmra.mxu3 %vm205_vm1, %v4347_v34 }
 0x7c5   :  { %3303 = vmatmul.msk.f32.vlgmr.msrb.gmra.mxu0 %vm205_vm1, %v4347_v34  ;;  %3307 = vmatmul.msk.f32.vlgmr.msra.gmra.mxu1 %vm205_vm1, %v4347_v34 }
 0x7c6   :  { %1925 = vmatpush.msra.mxu2 %v1513_v25  ;;  %1954 = vmatpush.msra.mxu3 %v1514_v50  ;;  %v2146_v25 = vld [vmem:[#allocation2 + $0x1a8] sm:$0xff]  ;;  %v2097_v50 = vld [vmem:[#allocation2 + $0x20] sm:$0xff] }
 0x7c7   :  { %1983 = vmatpush.msrb.mxu0 %v1515_v31  ;;  %2012 = vmatpush.msra.mxu1 %v1516_v59  ;;  %v2113_v31 = vld [vmem:[#allocation2 + $0xa0] sm:$0xff] }
 0x7c8   :  { %1926 = vmatpush.msra.mxu2 %v1497_v37  ;;  %1955 = vmatpush.msra.mxu3 %v1498_v36  ;;  %v2129_v59 = vld [vmem:[#allocation2 + $0x120] sm:$0xff]  ;;  %v2096_v36 = vld [vmem:[#allocation2 + $0x18] sm:$0xff] }
 0x7c9   :  { %1984 = vmatpush.msrb.mxu0 %v1499_v54  ;;  %2013 = vmatpush.msra.mxu1 %v1500_v40  ;;  %v2145_v37 = vld [vmem:[#allocation2 + $0x1a0] sm:$0xff]  ;;  %v2112_v54 = vld [vmem:[#allocation2 + $0x98] sm:$0xff] }
 0x7ca   :  { %1927 = vmatpush.msra.mxu2 %v1481_v62  ;;  %1956 = vmatpush.msra.mxu3 %v1482_v60  ;;  %v2128_v40 = vld [vmem:[#allocation2 + $0x118] sm:$0xff]  ;;  %v2095_v60 = vld [vmem:[#allocation2 + $0x10] sm:$0xff] }
 0x7cb   :  { %1985 = vmatpush.msrb.mxu0 %v1483_v41  ;;  %2014 = vmatpush.msra.mxu1 %v1484_v43  ;;  %v2144_v62 = vld [vmem:[#allocation2 + $0x198] sm:$0xff]  ;;  %v2111_v41 = vld [vmem:[#allocation2 + $0x90] sm:$0xff] }
 0x7cc   :  { %3296 = vmatmul.msk.f32.gmra.mxu2 %vm205_vm1, %v4360_v29  ;;  %3300 = vmatmul.msk.f32.gmra.mxu3 %vm205_vm1, %v4360_v29  ;;  %v2127_v43 = vld [vmem:[#allocation2 + $0x110] sm:$0xff] }
 0x7cd   :  { %3304 = vmatmul.msk.f32.gmra.mxu0 %vm205_vm1, %v4360_v29  ;;  %3308 = vmatmul.msk.f32.gmra.mxu1 %vm205_vm1, %v4360_v29 }
 0x7ce   :  { %1928 = vmatpush.msra.mxu2 %v1465_v11  ;;  %1957 = vmatpush.msra.mxu3 %v1466_v55  ;;  %v2143_v11 = vld [vmem:[#allocation2 + $0x190] sm:$0xff]  ;;  %v2094_v55 = vld [vmem:[#allocation2 + $0x8] sm:$0xff] }
 0x7cf   :  { %1986 = vmatpush.msrb.mxu0 %v1467_v48  ;;  %2015 = vmatpush.msra.mxu1 %v1468_v44  ;;  %v2110_v48 = vld [vmem:[#allocation2 + $0x88] sm:$0xff] }
 0x7d0   :  { %v2126_v44 = vld [vmem:[#allocation2 + $0x108] sm:$0xff] }
 0x7d4   :  { %3297 = vmatmul.msk.f32.gmra.mxu2 %vm205_vm1, %v4373_v28  ;;  %3301 = vmatmul.msk.f32.gmra.mxu3 %vm205_vm1, %v4373_v28 }
 0x7d5   :  { %3305 = vmatmul.msk.f32.gmra.mxu0 %vm205_vm1, %v4373_v28  ;;  %3309 = vmatmul.msk.f32.gmra.mxu1 %vm205_vm1, %v4373_v28 }
 0x7dc   :  { %3298 = vmatmul.msk.f32.gmra.mxu2 %vm205_vm1, %v4435_v18  ;;  %3302 = vmatmul.msk.f32.gmra.mxu3 %vm205_vm1, %v4435_v18 }
 0x7dd   :  { %3306 = vmatmul.msk.f32.gmra.mxu0 %vm205_vm1, %v4435_v18  ;;  %3310 = vmatmul.msk.f32.gmra.mxu1 %vm205_vm1, %v4435_v18 }
 0x7e4   :  { %3311 = vmatmul.msk.f32.vlgmr.msrb.gmra.mxu2 %vm205_vm1, %v4347_v34  ;;  %3315 = vmatmul.msk.f32.vlgmr.msrb.gmra.mxu3 %vm205_vm1, %v4347_v34 }
 0x7e5   :  { %3319 = vmatmul.msk.f32.vlgmr.msra.gmra.mxu0 %vm205_vm1, %v4347_v34  ;;  %3323 = vmatmul.msk.f32.vlgmr.msrb.gmra.mxu1 %vm205_vm1, %v4347_v34 }
 0x7e6   :  { %2353 = vmatpush.msrb.mxu2 %v2108_v5  ;;  %2382 = vmatpush.msrb.mxu3 %v2124_v10  ;;  %v2142_v5 = vld [vmem:[#allocation2 + $0x188] sm:$0xff]  ;;  %v2093_v10 = vld [vmem:[#allocation2] sm:$0xff] }
 0x7e7   :  { %2411 = vmatpush.msra.mxu0 %v2140_v57  ;;  %2440 = vmatpush.msrb.mxu1 %v2156_v32  ;;  %v2109_v57 = vld [vmem:[#allocation2 + $0x80] sm:$0xff] }
 0x7e8   :  { %2354 = vmatpush.msrb.mxu2 %v2107_v0  ;;  %2383 = vmatpush.msrb.mxu3 %v2123_v3  ;;  %v2125_v32 = vld [vmem:[#allocation2 + $0x100] sm:$0xff]  ;;  %v2204_v3 = vld [vmem:[#allocation2 + $0x378] sm:$0xff] }
 0x7e9   :  { %2412 = vmatpush.msra.mxu0 %v2139_v1  ;;  %2441 = vmatpush.msrb.mxu1 %v2155_v4  ;;  %v2141_v0 = vld [vmem:[#allocation2 + $0x180] sm:$0xff]  ;;  %v2220_v1 = vld [vmem:[#allocation2 + $0x3f8] sm:$0xff] }
 0x7ea   :  { %2355 = vmatpush.msrb.mxu2 %v2106_v6  ;;  %2384 = vmatpush.msrb.mxu3 %v2122_v33  ;;  %v2172_v4 = vld [vmem:[#allocation2 + $0x278] sm:$0xff]  ;;  %v2203_v33 = vld [vmem:[#allocation2 + $0x370] sm:$0xff] }
 0x7eb   :  { %2413 = vmatpush.msra.mxu0 %v2138_v7  ;;  %2442 = vmatpush.msrb.mxu1 %v2154_v2  ;;  %v2188_v6 = vld [vmem:[#allocation2 + $0x2f8] sm:$0xff]  ;;  %v2219_v7 = vld [vmem:[#allocation2 + $0x3f0] sm:$0xff] }
 0x7ec   :  { %3312 = vmatmul.msk.f32.gmra.mxu2 %vm205_vm1, %v4360_v29  ;;  %3316 = vmatmul.msk.f32.gmra.mxu3 %vm205_vm1, %v4360_v29  ;;  %v2171_v2 = vld [vmem:[#allocation2 + $0x270] sm:$0xff] }
 0x7ed   :  { %3320 = vmatmul.msk.f32.gmra.mxu0 %vm205_vm1, %v4360_v29  ;;  %3324 = vmatmul.msk.f32.gmra.mxu1 %vm205_vm1, %v4360_v29 }
 0x7ee   :  { %2356 = vmatpush.msrb.mxu2 %v2105_v16  ;;  %2385 = vmatpush.msrb.mxu3 %v2121_v8  ;;  %v2187_v16 = vld [vmem:[#allocation2 + $0x2f0] sm:$0xff]  ;;  %v2202_v8 = vld [vmem:[#allocation2 + $0x368] sm:$0xff] }
 0x7ef   :  { %2414 = vmatpush.msra.mxu0 %v2137_v47  ;;  %2443 = vmatpush.msrb.mxu1 %v2153_v63  ;;  %v2218_v47 = vld [vmem:[#allocation2 + $0x3e8] sm:$0xff] }
 0x7f0   :  { %2357 = vmatpush.msrb.mxu2 %v2104_v9  ;;  %2386 = vmatpush.msrb.mxu3 %v2120_v12  ;;  %v2170_v63 = vld [vmem:[#allocation2 + $0x268] sm:$0xff] }
 0x7f1   :  { %2415 = vmatpush.msra.mxu0 %v2136_v13  ;;  %2444 = vmatpush.msrb.mxu1 %v2152_v38  ;;  %v2186_v9 = vld [vmem:[#allocation2 + $0x2e8] sm:$0xff]  ;;  %v2201_v38 = vld [vmem:[#allocation2 + $0x360] sm:$0xff] }
 0x7f2   :  { %2358 = vmatpush.msrb.mxu2 %v2103_v14  ;;  %2387 = vmatpush.msrb.mxu3 %v2119_v22  ;;  %v2217_v14 = vld [vmem:[#allocation2 + $0x3e0] sm:$0xff] }
 0x7f3   :  { %2416 = vmatpush.msra.mxu0 %v2135_v56  ;;  %2445 = vmatpush.msrb.mxu1 %v2151_v15  ;;  %v4632_v22 = vld [vmem:[%s4905_s16] sm:$0xff] }
 0x7f4   :  { %3313 = vmatmul.msk.f32.gmra.mxu2 %vm205_vm1, %v4373_v28  ;;  %3317 = vmatmul.msk.f32.gmra.mxu3 %vm205_vm1, %v4373_v28 }
 0x7f5   :  { %3321 = vmatmul.msk.f32.gmra.mxu0 %vm205_vm1, %v4373_v28  ;;  %3325 = vmatmul.msk.f32.gmra.mxu1 %vm205_vm1, %v4373_v28 }
 0x7f6   :  { %2359 = vmatpush.msrb.mxu2 %v2102_v17  ;;  %2388 = vmatpush.msrb.mxu3 %v2118_v45  ;;  %v2169_v17 = vld [vmem:[#allocation2 + $0x260] sm:$0xff] }
 0x7f7   :  { %2417 = vmatpush.msra.mxu0 %v2134_v24  ;;  %2446 = vmatpush.msrb.mxu1 %v2150_v53  ;;  %v2185_v45 = vld [vmem:[#allocation2 + $0x2e0] sm:$0xff]  ;;  %v4635_v24 = vperm.slane %v4632_v22, 0  ;;  %v4638_v53 = vperm.slane %v4632_v22, 1 }
 0x7f8   :  { %2360 = vmatpush.msrb.mxu2 %v2101_v19  ;;  %2389 = vmatpush.msrb.mxu3 %v2117_v58  ;;  %v4641_v19 = vperm.slane %v4632_v22, 2  ;;  %v4644_v58 = vperm.slane %v4632_v22, 3 }
 0x7f9   :  { %2418 = vmatpush.msra.mxu0 %v2133_v42  ;;  %2447 = vmatpush.msrb.mxu1 %v2149_v20  ;;  %v2200_v42 = vld [vmem:[#allocation2 + $0x358] sm:$0xff] }
 0x7fa   :  { %2361 = vmatpush.msrb.mxu2 %v2100_v39  ;;  %2390 = vmatpush.msrb.mxu3 %v2116_v21  ;;  %v2216_v20 = vld [vmem:[#allocation2 + $0x3d8] sm:$0xff] }
 0x7fb   :  { %2419 = vmatpush.msra.mxu0 %v2132_v23  ;;  %2448 = vmatpush.msrb.mxu1 %v2148_v52  ;;  %v2168_v39 = vld [vmem:[#allocation2 + $0x258] sm:$0xff]  ;;  %v2199_v23 = vld [vmem:[#allocation2 + $0x350] sm:$0xff] }
 0x7fc   :  { %3314 = vmatmul.msk.f32.gmra.mxu2 %vm205_vm1, %v4435_v18  ;;  %3318 = vmatmul.msk.f32.gmra.mxu3 %vm205_vm1, %v4435_v18  ;;  %v2184_v21 = vld [vmem:[#allocation2 + $0x2d8] sm:$0xff]  ;;  %v2215_v52 = vld [vmem:[#allocation2 + $0x3d0] sm:$0xff] }
 0x7fd   :  { %3322 = vmatmul.msk.f32.gmra.mxu0 %vm205_vm1, %v4435_v18  ;;  %3326 = vmatmul.msk.f32.gmra.mxu1 %vm205_vm1, %v4435_v18 }
 0x7fe   :  { %2362 = vmatpush.msrb.mxu2 %v2099_v61  ;;  %2391 = vmatpush.msrb.mxu3 %v2115_v26 }
 0x7ff   :  { %2420 = vmatpush.msra.mxu0 %v2131_v46  ;;  %2449 = vmatpush.msrb.mxu1 %v2147_v49  ;;  %v2167_v46 = vld [vmem:[#allocation2 + $0x250] sm:$0xff] }
 0x800   :  { %2363 = vmatpush.msrb.mxu2 %v2098_v27  ;;  %2392 = vmatpush.msrb.mxu3 %v2114_v51  ;;  %v2183_v49 = vld [vmem:[#allocation2 + $0x2d0] sm:$0xff] }
 0x801   :  { %2421 = vmatpush.msra.mxu0 %v2130_v30  ;;  %2450 = vmatpush.msrb.mxu1 %v2146_v25  ;;  %v1640_v56 = vpop.f32.mrf.mxu0  ;;  %v1669_v15 = vpop.f32.mrf.mxu1  ;;  %v2198_v30 = vld [vmem:[#allocation2 + $0x348] sm:$0xff] }
 0x802   :  { %2364 = vmatpush.msrb.mxu2 %v2097_v50  ;;  %2393 = vmatpush.msrb.mxu3 %v2113_v31  ;;  %v1641_v27 = vadd.f32 %v1640_v56, %v4641_v19  ;;  %v1670_v51 = vadd.f32 %v1669_v15, %v4644_v58  ;;  %v2214_v25 = vld [vmem:[#allocation2 + $0x3c8] sm:$0xff] }
 0x803   :  { %2422 = vmatpush.msra.mxu0 %v2129_v59  ;;  %2451 = vmatpush.msrb.mxu1 %v2145_v37  ;;  %v2166_v50 = vld [vmem:[#allocation2 + $0x248] sm:$0xff] }
 0x804   :  { %3327 = vmatmul.msk.f32.vlgmr.msra.gmra.mxu2 %vm205_vm1, %v4347_v34  ;;  %3331 = vmatmul.msk.f32.vlgmr.msra.gmra.mxu3 %vm205_vm1, %v4347_v34  ;;  %v2182_v31 = vld [vmem:[#allocation2 + $0x2c8] sm:$0xff] }
 0x805   :  { %3335 = vmatmul.msk.f32.vlgmr.msrb.gmra.mxu0 %vm205_vm1, %v4347_v34  ;;  %3339 = vmatmul.msk.f32.vlgmr.msra.gmra.mxu1 %vm205_vm1, %v4347_v34  ;;  %v2162_v56 = vld [vmem:[#allocation2 + $0x228] sm:$0xff] }
 0x806   :  { %2365 = vmatpush.msrb.mxu2 %v2096_v36  ;;  %2394 = vmatpush.msrb.mxu3 %v2112_v54  ;;  %v1582_v12 = vpop.f32.mrf.mxu2  ;;  %v1611_v13 = vpop.f32.mrf.mxu3  ;;  %v2178_v15 = vld [vmem:[#allocation2 + $0x2a8] sm:$0xff] }
 0x807   :  { %2423 = vmatpush.msra.mxu0 %v2128_v40  ;;  %2452 = vmatpush.msrb.mxu1 %v2144_v62  ;;  %v1583_v61 = vadd.f32 %v1582_v12, %v4635_v24  ;;  %v1612_v26 = vadd.f32 %v1611_v13, %v4638_v53  ;;  %v2194_v12 = vld [vmem:[#allocation2 + $0x328] sm:$0xff] }
 0x808   :  { %2366 = vmatpush.msrb.mxu2 %v2095_v60  ;;  %2395 = vmatpush.msrb.mxu3 %v2111_v41  ;;  %v2031_v60 = vmax.f32 %v1641_v27, 0.0  ;;  %v2032_v41 = vmax.f32 %v1670_v51, 0.0  ;;  %v2210_v13 = vld [vmem:[#allocation2 + $0x3a8] sm:$0xff] }
 0x809   :  { %2424 = vmatpush.msra.mxu0 %v2127_v43  ;;  %2453 = vmatpush.msrb.mxu1 %v2143_v11  ;;  %v2029_v36 = vmax.f32 %v1583_v61, 0.0  ;;  %v2030_v54 = vmax.f32 %v1612_v26, 0.0  ;;  %v1643_v40 = vpop.f32.mrf.mxu0  ;;  %v1672_v62 = vpop.f32.mrf.mxu1  ;;  %v2197_v43 = vld [vmem:[#allocation2 + $0x340] sm:$0xff]  ;;  %v2192_v61 = vld [vmem:[#allocation2 + $0x318] sm:$0xff] }
 0x80a   :  { %2367 = vmatpush.msrb.mxu2 %v2094_v55  ;;  %2396 = vmatpush.msrb.mxu3 %v2110_v48  ;;  %v2213_v11 = vld [vmem:[#allocation2 + $0x3c0] sm:$0xff]  ;;  %v2208_v26 = vld [vmem:[#allocation2 + $0x398] sm:$0xff] }
 0x80b   :  { %2425 = vmatpush.msra.mxu0 %v2126_v44  ;;  %2454 = vmatpush.msrb.mxu1 %v2142_v5  ;;  %v2165_v55 = vld [vmem:[#allocation2 + $0x240] sm:$0xff]  ;;  %v2196_v44 = vld [vmem:[#allocation2 + $0x338] sm:$0xff] }
 0x80c   :  { %3328 = vmatmul.msk.f32.gmra.mxu2 %vm205_vm1, %v4360_v29  ;;  %3332 = vmatmul.msk.f32.gmra.mxu3 %vm205_vm1, %v4360_v29  ;;  %v2181_v48 = vld [vmem:[#allocation2 + $0x2c0] sm:$0xff]  ;;  %v2212_v5 = vld [vmem:[#allocation2 + $0x3b8] sm:$0xff] }
 0x80d   :  { %3336 = vmatmul.msk.f32.gmra.mxu0 %vm205_vm1, %v4360_v29  ;;  %3340 = vmatmul.msk.f32.gmra.mxu1 %vm205_vm1, %v4360_v29 }
 0x80e   :  { %2368 = vmatpush.msrb.mxu2 %v2093_v10  ;;  %2397 = vmatpush.msrb.mxu3 %v2109_v57  ;;  %v1585_v59 = vpop.f32.mrf.mxu2  ;;  %v1614_v37 = vpop.f32.mrf.mxu3 }
 0x80f   :  { %2426 = vmatpush.msra.mxu0 %v2125_v32  ;;  %2455 = vmatpush.msrb.mxu1 %v2141_v0  ;;  %v1586_v10 = vadd.f32 %v1585_v59, %v4635_v24  ;;  %v1615_v57 = vadd.f32 %v1614_v37, %v4638_v53  ;;  %v2164_v32 = vld [vmem:[#allocation2 + $0x238] sm:$0xff]  ;;  %v2159_v59 = vld [vmem:[#allocation2 + $0x210] sm:$0xff] }
 0x810   :  { %2469 = vmatpush.msra.mxu2 %v2172_v4  ;;  %2498 = vmatpush.msra.mxu3 %v2188_v6  ;;  %v2180_v0 = vld [vmem:[#allocation2 + $0x2b8] sm:$0xff]  ;;  %v2195_v4 = vld [vmem:[#allocation2 + $0x330] sm:$0xff] }
 0x811   :  { %2527 = vmatpush.msrb.mxu0 %v2204_v3  ;;  %2556 = vmatpush.msra.mxu1 %v2220_v1  ;;  %v1644_v3 = vadd.f32 %v1643_v40, %v4641_v19  ;;  %v1673_v1 = vadd.f32 %v1672_v62, %v4644_v58  ;;  %v2211_v6 = vld [vmem:[#allocation2 + $0x3b0] sm:$0xff]  ;;  %v2158_v40 = vld [vmem:[#allocation2 + $0x208] sm:$0xff] }
 0x812   :  { %2470 = vmatpush.msra.mxu2 %v2171_v2  ;;  %2499 = vmatpush.msra.mxu3 %v2187_v16  ;;  %v2045_v2 = vmax.f32 %v1586_v10, 0.0  ;;  %v2046_v16 = vmax.f32 %v1615_v57, 0.0  ;;  %v2175_v37 = vld [vmem:[#allocation2 + $0x290] sm:$0xff]  ;;  %v2174_v62 = vld [vmem:[#allocation2 + $0x288] sm:$0xff] }
 0x813   :  { %2528 = vmatpush.msrb.mxu0 %v2203_v33  ;;  %2557 = vmatpush.msra.mxu1 %v2219_v7  ;;  %v2163_v33 = vld [vmem:[#allocation2 + $0x230] sm:$0xff] }
 0x814   :  { %3329 = vmatmul.msk.f32.gmra.mxu2 %vm205_vm1, %v4373_v28  ;;  %3333 = vmatmul.msk.f32.gmra.mxu3 %vm205_vm1, %v4373_v28  ;;  %v2179_v7 = vld [vmem:[#allocation2 + $0x2b0] sm:$0xff] }
 0x815   :  { %3337 = vmatmul.msk.f32.gmra.mxu0 %vm205_vm1, %v4373_v28  ;;  %3341 = vmatmul.msk.f32.gmra.mxu1 %vm205_vm1, %v4373_v28  ;;  %v2267_v10 = vld [vmem:[#allocation2 + $0x570] sm:$0xff] }
 0x816   :  { %2529 = vmatpush.msrb.mxu0 %v2202_v8  ;;  %2558 = vmatpush.msra.mxu1 %v2218_v47  ;;  %v2047_v8 = vmax.f32 %v1644_v3, 0.0  ;;  %v2048_v47 = vmax.f32 %v1673_v1, 0.0  ;;  %v2283_v57 = vld [vmem:[#allocation2 + $0x5f0] sm:$0xff]  ;;  %v2236_v3 = vld [vmem:[#allocation2 + $0x478] sm:$0xff] }
 0x817   :  { %2471 = vmatpush.msra.mxu2 %v2170_v63  ;;  %2500 = vmatpush.msra.mxu3 %v2186_v9  ;;  %v1588_v63 = vpop.f32.mrf.mxu2  ;;  %v1617_v9 = vpop.f32.mrf.mxu3  ;;  %v2252_v1 = vld [vmem:[#allocation2 + $0x4f8] sm:$0xff] }
 0x818   :  { %2530 = vmatpush.msrb.mxu0 %v2201_v38  ;;  %2559 = vmatpush.msra.mxu1 %v2217_v14  ;;  %v1646_v38 = vpop.f32.mrf.mxu0  ;;  %v1675_v14 = vpop.f32.mrf.mxu1 }
 0x819   :  { %2472 = vmatpush.msra.mxu2 %v2169_v17  ;;  %2501 = vmatpush.msra.mxu3 %v2185_v45  ;;  %v2193_v17 = vld [vmem:[#allocation2 + $0x320] sm:$0xff] }
 0x81a   :  { %2531 = vmatpush.msrb.mxu0 %v2200_v42  ;;  %2560 = vmatpush.msra.mxu1 %v2216_v20  ;;  %v2209_v45 = vld [vmem:[#allocation2 + $0x3a0] sm:$0xff]  ;;  %v1589_v42 = vadd.f32 %v1588_v63, %v4635_v24  ;;  %v1618_v20 = vadd.f32 %v1617_v9, %v4638_v53 }
 0x81b   :  { %2473 = vmatpush.msra.mxu2 %v2168_v39  ;;  %2502 = vmatpush.msra.mxu3 %v2184_v21  ;;  %v2161_v39 = vld [vmem:[#allocation2 + $0x220] sm:$0xff] }
 0x81c   :  { %3330 = vmatmul.msk.f32.gmra.mxu2 %vm205_vm1, %v4435_v18  ;;  %3334 = vmatmul.msk.f32.gmra.mxu3 %vm205_vm1, %v4435_v18  ;;  %v2177_v21 = vld [vmem:[#allocation2 + $0x2a0] sm:$0xff]  ;;  %v2061_v27 = vmax.f32 %v1589_v42, 0.0  ;;  %v2062_v51 = vmax.f32 %v1618_v20, 0.0  ;;  %v2264_v42 = vld [vmem:[#allocation2 + $0x558] sm:$0xff] }
 0x81d   :  { %3338 = vmatmul.msk.f32.gmra.mxu0 %vm205_vm1, %v4435_v18  ;;  %3342 = vmatmul.msk.f32.gmra.mxu1 %vm205_vm1, %v4435_v18  ;;  %v2265_v63 = vld [vmem:[#allocation2 + $0x560] sm:$0xff]  ;;  %v2280_v20 = vld [vmem:[#allocation2 + $0x5d8] sm:$0xff] }
 0x81e   :  { %2532 = vmatpush.msrb.mxu0 %v2199_v23  ;;  %2561 = vmatpush.msra.mxu1 %v2215_v52  ;;  %v1647_v23 = vadd.f32 %v1646_v38, %v4641_v19  ;;  %v1676_v52 = vadd.f32 %v1675_v14, %v4644_v58  ;;  %v2281_v9 = vld [vmem:[#allocation2 + $0x5e0] sm:$0xff]  ;;  %v2234_v38 = vld [vmem:[#allocation2 + $0x468] sm:$0xff] }
 0x81f   :  { %2474 = vmatpush.msra.mxu2 %v2167_v46  ;;  %2503 = vmatpush.msra.mxu3 %v2183_v49  ;;  %v2160_v46 = vld [vmem:[#allocation2 + $0x218] sm:$0xff]  ;;  %v2250_v14 = vld [vmem:[#allocation2 + $0x4e8] sm:$0xff] }
 0x820   :  { %2533 = vmatpush.msrb.mxu0 %v2198_v30  ;;  %2562 = vmatpush.msra.mxu1 %v2214_v25  ;;  %v2176_v49 = vld [vmem:[#allocation2 + $0x298] sm:$0xff]  ;;  %v2063_v30 = vmax.f32 %v1647_v23, 0.0  ;;  %v2064_v25 = vmax.f32 %v1676_v52, 0.0  ;;  %v4679_v23 = vperm.slane %v4632_v22, 4  ;;  %v4682_v52 = vperm.slane %v4632_v22, 5 }
 0x821   :  { %2475 = vmatpush.msra.mxu2 %v2166_v50  ;;  %2504 = vmatpush.msra.mxu3 %v2182_v31  ;;  %v2191_v50 = vld [vmem:[#allocation2 + $0x310] sm:$0xff] }
 0x822   :  { %2534 = vmatpush.msrb.mxu0 %v2197_v43  ;;  %2563 = vmatpush.msra.mxu1 %v2213_v11  ;;  %v2207_v31 = vld [vmem:[#allocation2 + $0x390] sm:$0xff]  ;;  %v2268_v43 = vld [vmem:[#allocation2 + $0x578] sm:$0xff] }
 0x823   :  { %2476 = vmatpush.msra.mxu2 %v2165_v55  ;;  %2505 = vmatpush.msra.mxu3 %v2181_v48  ;;  %v2284_v11 = vld [vmem:[#allocation2 + $0x5f8] sm:$0xff]  ;;  %v2157_v55 = vld [vmem:[#allocation2 + $0x200] sm:$0xff] }
 0x824   :  { %2369 = vmatmul.f32.vlgmr.msrb.gmra.mxu2 %v2029_v36  ;;  %2398 = vmatmul.f32.vlgmr.msrb.gmra.mxu3 %v2030_v54  ;;  %v2190_v36 = vld [vmem:[#allocation2 + $0x308] sm:$0xff]  ;;  %v2173_v48 = vld [vmem:[#allocation2 + $0x280] sm:$0xff] }
 0x825   :  { %2427 = vmatmul.f32.vlgmr.msra.gmra.mxu0 %v2031_v60  ;;  %2456 = vmatmul.f32.vlgmr.msrb.gmra.mxu1 %v2032_v41  ;;  %v2206_v54 = vld [vmem:[#allocation2 + $0x388] sm:$0xff]  ;;  %v2189_v60 = vld [vmem:[#allocation2 + $0x300] sm:$0xff] }
 0x826   :  { %2535 = vmatpush.msrb.mxu0 %v2196_v44  ;;  %2564 = vmatpush.msra.mxu1 %v2212_v5  ;;  %v2205_v41 = vld [vmem:[#allocation2 + $0x380] sm:$0xff] }
 0x827   :  { %2477 = vmatpush.msra.mxu2 %v2164_v32  ;;  %2506 = vmatpush.msra.mxu3 %v2180_v0 }
 0x828   :  { %2536 = vmatpush.msrb.mxu0 %v2195_v4  ;;  %2565 = vmatpush.msra.mxu1 %v2211_v6 }
 0x829   :  { %2478 = vmatpush.msra.mxu2 %v2163_v33  ;;  %2507 = vmatpush.msra.mxu3 %v2179_v7  ;;  %v2266_v33 = vld [vmem:[#allocation2 + $0x568] sm:$0xff] }
 0x82a   :  { %2537 = vmatpush.msrb.mxu0 %v2194_v12  ;;  %2566 = vmatpush.msra.mxu1 %v2210_v13  ;;  %v2282_v7 = vld [vmem:[#allocation2 + $0x5e8] sm:$0xff] }
 0x82b   :  { %2479 = vmatpush.msra.mxu2 %v2162_v56  ;;  %2508 = vmatpush.msra.mxu3 %v2178_v15 }
 0x82c   :  { %2372 = vmatmul.f32.gmra.mxu2 %v2045_v2  ;;  %2401 = vmatmul.f32.gmra.mxu3 %v2046_v16  ;;  %v2235_v2 = vld [vmem:[#allocation2 + $0x470] sm:$0xff] }
 0x82d   :  { %2430 = vmatmul.f32.gmra.mxu0 %v2047_v8  ;;  %2459 = vmatmul.f32.gmra.mxu1 %v2048_v47  ;;  %v2251_v16 = vld [vmem:[#allocation2 + $0x4f0] sm:$0xff]  ;;  %v4669_v8 = vperm.slane %v4632_v22, 6  ;;  %v4672_v47 = vperm.slane %v4632_v22, 7 }
 0x82e   :  { %2538 = vmatpush.msrb.mxu0 %v2193_v17  ;;  %2567 = vmatpush.msra.mxu1 %v2209_v45 }
 0x82f   :  { %2480 = vmatpush.msra.mxu2 %v2161_v39  ;;  %2509 = vmatpush.msra.mxu3 %v2177_v21  ;;  %v2249_v21 = vld [vmem:[#allocation2 + $0x4e0] sm:$0xff] }
 0x830   :  { %2539 = vmatpush.msrb.mxu0 %v2192_v61  ;;  %2568 = vmatpush.msra.mxu1 %v2208_v26 }
 0x831   :  { %2481 = vmatpush.msra.mxu2 %v2160_v46  ;;  %2510 = vmatpush.msra.mxu3 %v2176_v49  ;;  %v2263_v46 = vld [vmem:[#allocation2 + $0x550] sm:$0xff] }
 0x832   :  { %2540 = vmatpush.msrb.mxu0 %v2191_v50  ;;  %2569 = vmatpush.msra.mxu1 %v2207_v31  ;;  %v2279_v49 = vld [vmem:[#allocation2 + $0x5d0] sm:$0xff]  ;;  %v2262_v50 = vld [vmem:[#allocation2 + $0x548] sm:$0xff] }
 0x833   :  { %2482 = vmatpush.msra.mxu2 %v2159_v59  ;;  %2511 = vmatpush.msra.mxu3 %v2175_v37  ;;  %v2278_v31 = vld [vmem:[#allocation2 + $0x5c8] sm:$0xff]  ;;  %v2231_v37 = vld [vmem:[#allocation2 + $0x450] sm:$0xff] }
 0x834   :  { %2375 = vmatmul.f32.gmra.mxu2 %v2061_v27  ;;  %2404 = vmatmul.f32.gmra.mxu3 %v2062_v51  ;;  %v2232_v27 = vld [vmem:[#allocation2 + $0x458] sm:$0xff] }
 0x835   :  { %2433 = vmatmul.f32.gmra.mxu0 %v2063_v30  ;;  %2462 = vmatmul.f32.gmra.mxu1 %v2064_v25  ;;  %v2248_v51 = vld [vmem:[#allocation2 + $0x4d8] sm:$0xff] }
 0x836   :  { %2541 = vmatpush.msrb.mxu0 %v2190_v36  ;;  %2570 = vmatpush.msra.mxu1 %v2206_v54  ;;  %v2247_v36 = vld [vmem:[#allocation2 + $0x4d0] sm:$0xff] }
 0x837   :  { %2483 = vmatpush.msra.mxu2 %v2158_v40  ;;  %2512 = vmatpush.msra.mxu3 %v2174_v62 }
 0x838   :  { %2542 = vmatpush.msrb.mxu0 %v2189_v60  ;;  %2571 = vmatpush.msra.mxu1 %v2205_v41  ;;  %v2261_v41 = vld [vmem:[#allocation2 + $0x540] sm:$0xff] }
 0x839   :  { %2484 = vmatpush.msra.mxu2 %v2157_v55  ;;  %2513 = vmatpush.msra.mxu3 %v2173_v48  ;;  %v2230_v48 = vld [vmem:[#allocation2 + $0x448] sm:$0xff] }
 0x83a   :  { %v1649_v44 = vpop.f32.mrf.mxu0  ;;  %v1678_v5 = vpop.f32.mrf.mxu1  ;;  %2643 = vmatpush.msra.mxu0 %v2268_v43  ;;  %2672 = vmatpush.msrb.mxu1 %v2284_v11  ;;  %v2277_v43 = vld [vmem:[#allocation2 + $0x5c0] sm:$0xff] }
 0x83b   :  { %v1650_v32 = vadd.f32 %v1649_v44, %v4641_v19  ;;  %v1679_v0 = vadd.f32 %v1678_v5, %v4644_v58  ;;  %2585 = vmatpush.msrb.mxu2 %v2236_v3  ;;  %2614 = vmatpush.msrb.mxu3 %v2252_v1  ;;  %v2246_v44 = vld [vmem:[#allocation2 + $0x4c8] sm:$0xff]  ;;  %v2245_v3 = vld [vmem:[#allocation2 + $0x4c0] sm:$0xff] }
 0x83c   :  { %2644 = vmatpush.msra.mxu0 %v2267_v10  ;;  %2673 = vmatpush.msrb.mxu1 %v2283_v57  ;;  %v2260_v57 = vld [vmem:[#allocation2 + $0x538] sm:$0xff] }
 0x83d   :  { %v2079_v4 = vmax.f32 %v1650_v32, 0.0  ;;  %v2080_v6 = vmax.f32 %v1679_v0, 0.0  ;;  %2586 = vmatpush.msrb.mxu2 %v2235_v2  ;;  %2615 = vmatpush.msrb.mxu3 %v2251_v16  ;;  %v2276_v32 = vld [vmem:[#allocation2 + $0x5b8] sm:$0xff]  ;;  %v2229_v0 = vld [vmem:[#allocation2 + $0x440] sm:$0xff] }
 0x83e   :  { %2645 = vmatpush.msra.mxu0 %v2266_v33  ;;  %2674 = vmatpush.msrb.mxu1 %v2282_v7  ;;  %v2275_v33 = vld [vmem:[#allocation2 + $0x5b0] sm:$0xff]  ;;  %v2228_v16 = vld [vmem:[#allocation2 + $0x438] sm:$0xff] }
 0x83f   :  { %2436 = vmatmul.f32.gmra.mxu0 %v2079_v4  ;;  %2465 = vmatmul.f32.gmra.mxu1 %v2080_v6  ;;  %v1591_v19 = vpop.f32.mrf.mxu2  ;;  %v1620_v58 = vpop.f32.mrf.mxu3  ;;  %v2259_v6 = vld [vmem:[#allocation2 + $0x530] sm:$0xff] }
 0x840   :  { %v1592_v12 = vadd.f32 %v1591_v19, %v4635_v24  ;;  %v1621_v13 = vadd.f32 %v1620_v58, %v4638_v53  ;;  %2646 = vmatpush.msra.mxu0 %v2265_v63  ;;  %2675 = vmatpush.msrb.mxu1 %v2281_v9  ;;  %v2233_v53 = vld [vmem:[#allocation2 + $0x460] sm:$0xff]  ;;  %v2244_v19 = vld [vmem:[#allocation2 + $0x4b8] sm:$0xff] }
 0x841   :  { %2587 = vmatpush.msrb.mxu2 %v2234_v38  ;;  %2616 = vmatpush.msrb.mxu3 %v2250_v14  ;;  %v2274_v38 = vld [vmem:[#allocation2 + $0x5a8] sm:$0xff] }
 0x842   :  { %v2077_v56 = vmax.f32 %v1592_v12, 0.0  ;;  %v2078_v15 = vmax.f32 %v1621_v13, 0.0  ;;  %v1756_v17 = vpop.f32.mrf.mxu0  ;;  %v1785_v45 = vpop.f32.mrf.mxu1  ;;  %2647 = vmatpush.msra.mxu0 %v2264_v42  ;;  %2676 = vmatpush.msrb.mxu1 %v2280_v20  ;;  %v2258_v13 = vld [vmem:[#allocation2 + $0x528] sm:$0xff]  ;;  %v2257_v20 = vld [vmem:[#allocation2 + $0x520] sm:$0xff] }
 0x843   :  { %v1757_v39 = vadd.f32 %v1756_v17, %v4669_v8  ;;  %v1786_v24 = vadd.f32 %v1785_v45, %v4672_v47  ;;  %2588 = vmatpush.msrb.mxu2 %v2233_v53  ;;  %2617 = vmatpush.msrb.mxu3 %v2249_v21  ;;  %v2243_v17 = vld [vmem:[#allocation2 + $0x4b0] sm:$0xff]  ;;  %v2242_v53 = vld [vmem:[#allocation2 + $0x4a8] sm:$0xff] }
 0x844   :  { %2378 = vmatmul.f32.gmra.mxu2 %v2077_v56  ;;  %2407 = vmatmul.f32.gmra.mxu3 %v2078_v15  ;;  %v2227_v15 = vld [vmem:[#allocation2 + $0x430] sm:$0xff] }
 0x845   :  { %v2035_v61 = vmax.f32 %v1757_v39, 0.0  ;;  %v2036_v26 = vmax.f32 %v1786_v24, 0.0  ;;  %2648 = vmatpush.msra.mxu0 %v2263_v46  ;;  %2677 = vmatpush.msrb.mxu1 %v2279_v49  ;;  %v2273_v39 = vld [vmem:[#allocation2 + $0x5a0] sm:$0xff]  ;;  %v2226_v24 = vld [vmem:[#allocation2 + $0x428] sm:$0xff]  ;;  %v2272_v46 = vld [vmem:[#allocation2 + $0x598] sm:$0xff] }
 0x846   :  { %2589 = vmatpush.msrb.mxu2 %v2232_v27  ;;  %2618 = vmatpush.msrb.mxu3 %v2248_v51  ;;  %v2225_v51 = vld [vmem:[#allocation2 + $0x420] sm:$0xff] }
 0x847   :  { %2543 = vmatmul.f32.vlgmr.msrb.gmra.mxu0 %v2035_v61  ;;  %2572 = vmatmul.f32.vlgmr.msra.gmra.mxu1 %v2036_v26  ;;  %v1698_v30 = vpop.f32.mrf.mxu2  ;;  %v1727_v25 = vpop.f32.mrf.mxu3  ;;  %v2256_v26 = vld [vmem:[#allocation2 + $0x518] sm:$0xff] }
 0x848   :  { %v1699_v59 = vadd.f32 %v1698_v30, %v4679_v23  ;;  %v1728_v22 = vadd.f32 %v1727_v25, %v4682_v52  ;;  %2649 = vmatpush.msra.mxu0 %v2262_v50  ;;  %2678 = vmatpush.msrb.mxu1 %v2278_v31  ;;  %v2241_v30 = vld [vmem:[#allocation2 + $0x4a0] sm:$0xff] }
 0x849   :  { %2590 = vmatpush.msrb.mxu2 %v2231_v37  ;;  %2619 = vmatpush.msrb.mxu3 %v2247_v36  ;;  %v2271_v37 = vld [vmem:[#allocation2 + $0x590] sm:$0xff] }
 0x84a   :  { %v2033_v54 = vmax.f32 %v1699_v59, 0.0  ;;  %v2034_v40 = vmax.f32 %v1728_v22, 0.0  ;;  %v1759_v62 = vpop.f32.mrf.mxu0  ;;  %v1788_v60 = vpop.f32.mrf.mxu1  ;;  %2650 = vmatpush.msra.mxu0 %v2261_v41  ;;  %2679 = vmatpush.msrb.mxu1 %v2277_v43  ;;  %v2255_v22 = vld [vmem:[#allocation2 + $0x510] sm:$0xff] }
 0x84b   :  { %v1760_v11 = vadd.f32 %v1759_v62, %v4669_v8  ;;  %v1789_v55 = vadd.f32 %v1788_v60, %v4672_v47  ;;  %2591 = vmatpush.msrb.mxu2 %v2230_v48  ;;  %2620 = vmatpush.msrb.mxu3 %v2246_v44  ;;  %v2240_v62 = vld [vmem:[#allocation2 + $0x498] sm:$0xff]  ;;  %v4699_v60 = vld [vmem:[%s4905_s16 + $0x8] sm:$0xff] }
 0x84c   :  { %2485 = vmatmul.f32.vlgmr.msra.gmra.mxu2 %v2033_v54  ;;  %2514 = vmatmul.f32.vlgmr.msra.gmra.mxu3 %v2034_v40  ;;  %v2224_v40 = vld [vmem:[#allocation2 + $0x418] sm:$0xff] }
 0x84d   :  { %v2051_v5 = vmax.f32 %v1760_v11, 0.0  ;;  %v2052_v10 = vmax.f32 %v1789_v55, 0.0  ;;  %2651 = vmatpush.msra.mxu0 %v2260_v57  ;;  %2680 = vmatpush.msrb.mxu1 %v2276_v32  ;;  %v2254_v11 = vld [vmem:[#allocation2 + $0x508] sm:$0xff]  ;;  %v2253_v57 = vld [vmem:[#allocation2 + $0x500] sm:$0xff] }
 0x84e   :  { %2592 = vmatpush.msrb.mxu2 %v2229_v0  ;;  %2621 = vmatpush.msrb.mxu3 %v2245_v3  ;;  %v2270_v55 = vld [vmem:[#allocation2 + $0x588] sm:$0xff]  ;;  %v2269_v32 = vld [vmem:[#allocation2 + $0x580] sm:$0xff] }
 0x84f   :  { %2546 = vmatmul.f32.gmra.mxu0 %v2051_v5  ;;  %2575 = vmatmul.f32.gmra.mxu1 %v2052_v10  ;;  %v1701_v1 = vpop.f32.mrf.mxu2  ;;  %v1730_v4 = vpop.f32.mrf.mxu3  ;;  %v4702_v5 = vperm.slane %v4699_v60, 2  ;;  %v4705_v10 = vperm.slane %v4699_v60, 3 }
 0x850   :  { %v1702_v7 = vadd.f32 %v1701_v1, %v4679_v23  ;;  %v1731_v2 = vadd.f32 %v1730_v4, %v4682_v52  ;;  %2652 = vmatpush.msra.mxu0 %v2259_v6  ;;  %2681 = vmatpush.msrb.mxu1 %v2275_v33  ;;  %v2332_v1 = vld [vmem:[#allocation2 + $0x778] sm:$0xff] }
 0x851   :  { %2593 = vmatpush.msrb.mxu2 %v2228_v16  ;;  %2622 = vmatpush.msrb.mxu3 %v2244_v19  ;;  %v2348_v4 = vld [vmem:[#allocation2 + $0x7f8] sm:$0xff]  ;;  %v2222_v16 = vld [vmem:[#allocation2 + $0x408] sm:$0xff] }
 0x852   :  { %v2049_v58 = vmax.f32 %v1702_v7, 0.0  ;;  %v2050_v63 = vmax.f32 %v1731_v2, 0.0  ;;  %v1762_v9 = vpop.f32.mrf.mxu0  ;;  %v1791_v12 = vpop.f32.mrf.mxu1  ;;  %2653 = vmatpush.msra.mxu0 %v2258_v13  ;;  %2682 = vmatpush.msrb.mxu1 %v2274_v38  ;;  %v2238_v19 = vld [vmem:[#allocation2 + $0x488] sm:$0xff] }
 0x853   :  { %v1763_v14 = vadd.f32 %v1762_v9, %v4669_v8  ;;  %v1792_v56 = vadd.f32 %v1791_v12, %v4672_v47  ;;  %2594 = vmatpush.msrb.mxu2 %v2227_v15  ;;  %2623 = vmatpush.msrb.mxu3 %v2243_v17  ;;  %v4712_v9 = vperm.slane %v4699_v60, 0  ;;  %v4715_v12 = vperm.slane %v4699_v60, 1  ;;  %v2330_v15 = vld [vmem:[#allocation2 + $0x768] sm:$0xff] }
 0x854   :  { %2488 = vmatmul.f32.gmra.mxu2 %v2049_v58  ;;  %2517 = vmatmul.f32.gmra.mxu3 %v2050_v63  ;;  %v2347_v63 = vld [vmem:[#allocation2 + $0x7f0] sm:$0xff]  ;;  %v2346_v17 = vld [vmem:[#allocation2 + $0x7e8] sm:$0xff] }
 0x855   :  { %v2067_v45 = vmax.f32 %v1763_v14, 0.0  ;;  %v2068_v42 = vmax.f32 %v1792_v56, 0.0  ;;  %2654 = vmatpush.msra.mxu0 %v2257_v20  ;;  %2683 = vmatpush.msrb.mxu1 %v2273_v39  ;;  %v2221_v14 = vld [vmem:[#allocation2 + $0x400] sm:$0xff]  ;;  %v2300_v20 = vld [vmem:[#allocation2 + $0x678] sm:$0xff] }
 0x856   :  { %2595 = vmatpush.msrb.mxu2 %v2226_v24  ;;  %2624 = vmatpush.msrb.mxu3 %v2242_v53  ;;  %v2237_v56 = vld [vmem:[#allocation2 + $0x480] sm:$0xff]  ;;  %v2316_v39 = vld [vmem:[#allocation2 + $0x6f8] sm:$0xff] }
 0x857   :  { %2549 = vmatmul.f32.gmra.mxu0 %v2067_v45  ;;  %2578 = vmatmul.f32.gmra.mxu1 %v2068_v42  ;;  %v1704_v21 = vpop.f32.mrf.mxu2  ;;  %v1733_v61 = vpop.f32.mrf.mxu3 }
 0x858   :  { %v1705_v49 = vadd.f32 %v1704_v21, %v4679_v23  ;;  %v1734_v27 = vadd.f32 %v1733_v61, %v4682_v52  ;;  %2655 = vmatpush.msra.mxu0 %v2256_v26  ;;  %2684 = vmatpush.msrb.mxu1 %v2272_v46  ;;  %v2329_v21 = vld [vmem:[#allocation2 + $0x760] sm:$0xff] }
 0x859   :  { %2596 = vmatpush.msrb.mxu2 %v2225_v51  ;;  %2625 = vmatpush.msrb.mxu3 %v2241_v30  ;;  %v2345_v61 = vld [vmem:[#allocation2 + $0x7e0] sm:$0xff]  ;;  %v2299_v51 = vld [vmem:[#allocation2 + $0x670] sm:$0xff] }
 0x85a   :  { %v2065_v25 = vmax.f32 %v1705_v49, 0.0  ;;  %v2066_v50 = vmax.f32 %v1734_v27, 0.0  ;;  %v1765_v31 = vpop.f32.mrf.mxu0  ;;  %v1794_v59 = vpop.f32.mrf.mxu1  ;;  %2656 = vmatpush.msra.mxu0 %v2255_v22  ;;  %2685 = vmatpush.msrb.mxu1 %v2271_v37  ;;  %v2315_v30 = vld [vmem:[#allocation2 + $0x6f0] sm:$0xff] }
 0x85b   :  { %v1766_v36 = vadd.f32 %v1765_v31, %v4669_v8  ;;  %v1795_v54 = vadd.f32 %v1794_v59, %v4672_v47  ;;  %2597 = vmatpush.msrb.mxu2 %v2224_v40  ;;  %2626 = vmatpush.msrb.mxu3 %v2240_v62  ;;  %v2223_v8 = vld [vmem:[#allocation2 + $0x410] sm:$0xff]  ;;  %v2328_v31 = vld [vmem:[#allocation2 + $0x758] sm:$0xff] }
 0x85c   :  { %2491 = vmatmul.f32.gmra.mxu2 %v2065_v25  ;;  %2520 = vmatmul.f32.gmra.mxu3 %v2066_v50  ;;  %v2239_v47 = vld [vmem:[#allocation2 + $0x490] sm:$0xff]  ;;  %v2344_v59 = vld [vmem:[#allocation2 + $0x7d8] sm:$0xff] }
 0x85d   :  { %v2083_v41 = vmax.f32 %v1766_v36, 0.0  ;;  %v2084_v43 = vmax.f32 %v1795_v54, 0.0  ;;  %2657 = vmatpush.msra.mxu0 %v2254_v11  ;;  %2686 = vmatpush.msrb.mxu1 %v2270_v55  ;;  %v2298_v36 = vld [vmem:[#allocation2 + $0x668] sm:$0xff]  ;;  %v2327_v40 = vld [vmem:[#allocation2 + $0x750] sm:$0xff]  ;;  %v2297_v11 = vld [vmem:[#allocation2 + $0x660] sm:$0xff] }
 0x85e   :  { %2598 = vmatpush.msrb.mxu2 %v2223_v8  ;;  %2627 = vmatpush.msrb.mxu3 %v2239_v47  ;;  %v2314_v54 = vld [vmem:[#allocation2 + $0x6e8] sm:$0xff]  ;;  %v2343_v62 = vld [vmem:[#allocation2 + $0x7d0] sm:$0xff]  ;;  %v2313_v55 = vld [vmem:[#allocation2 + $0x6e0] sm:$0xff] }
 0x85f   :  { %2552 = vmatmul.f32.gmra.mxu0 %v2083_v41  ;;  %2581 = vmatmul.f32.gmra.mxu1 %v2084_v43  ;;  %v1707_v48 = vpop.f32.mrf.mxu2  ;;  %v1736_v44 = vpop.f32.mrf.mxu3 }
 0x860   :  { %v1708_v0 = vadd.f32 %v1707_v48, %v4679_v23  ;;  %v1737_v3 = vadd.f32 %v1736_v44, %v4682_v52  ;;  %2658 = vmatpush.msra.mxu0 %v2253_v57  ;;  %2687 = vmatpush.msrb.mxu1 %v2269_v32  ;;  %v2331_v52 = vld [vmem:[#allocation2 + $0x770] sm:$0xff]  ;;  %v2326_v48 = vld [vmem:[#allocation2 + $0x748] sm:$0xff] }
 0x861   :  { %2599 = vmatpush.msrb.mxu2 %v2222_v16  ;;  %2628 = vmatpush.msrb.mxu3 %v2238_v19  ;;  %v2342_v44 = vld [vmem:[#allocation2 + $0x7c8] sm:$0xff] }
 0x862   :  { %v2081_v6 = vmax.f32 %v1708_v0, 0.0  ;;  %v2082_v33 = vmax.f32 %v1737_v3, 0.0  ;;  %v1872_v7 = vpop.f32.mrf.mxu0  ;;  %v1901_v2 = vpop.f32.mrf.mxu1  ;;  %2759 = vmatpush.msrb.mxu0 %v2332_v1  ;;  %2788 = vmatpush.msra.mxu1 %v2348_v4  ;;  %v2296_v1 = vld [vmem:[#allocation2 + $0x658] sm:$0xff] }
 0x863   :  { %v1873_v58 = vadd.f32 %v1872_v7, %v4702_v5  ;;  %v1902_v23 = vadd.f32 %v1901_v2, %v4705_v10  ;;  %2600 = vmatpush.msrb.mxu2 %v2221_v14  ;;  %2629 = vmatpush.msrb.mxu3 %v2237_v56  ;;  %v2312_v4 = vld [vmem:[#allocation2 + $0x6d8] sm:$0xff]  ;;  %v2325_v7 = vld [vmem:[#allocation2 + $0x740] sm:$0xff]  ;;  %v2294_v14 = vld [vmem:[#allocation2 + $0x648] sm:$0xff] }
 0x864   :  { %2494 = vmatmul.f32.gmra.mxu2 %v2081_v6  ;;  %2523 = vmatmul.f32.gmra.mxu3 %v2082_v33  ;;  %v2341_v2 = vld [vmem:[#allocation2 + $0x7c0] sm:$0xff]  ;;  %v2310_v56 = vld [vmem:[#allocation2 + $0x6c8] sm:$0xff] }
 0x865   :  { %v2039_v13 = vmax.f32 %v1873_v58, 0.0  ;;  %v2040_v38 = vmax.f32 %v1902_v23, 0.0  ;;  %2760 = vmatpush.msrb.mxu0 %v2331_v52  ;;  %2789 = vmatpush.msra.mxu1 %v2347_v63  ;;  %v2295_v58 = vld [vmem:[#allocation2 + $0x650] sm:$0xff]  ;;  %v2324_v52 = vld [vmem:[#allocation2 + $0x738] sm:$0xff] }
 0x866   :  { %2701 = vmatpush.msra.mxu2 %v2300_v20  ;;  %2730 = vmatpush.msra.mxu3 %v2316_v39  ;;  %v2311_v23 = vld [vmem:[#allocation2 + $0x6d0] sm:$0xff]  ;;  %v2340_v63 = vld [vmem:[#allocation2 + $0x7b8] sm:$0xff]  ;;  %v2293_v20 = vld [vmem:[#allocation2 + $0x640] sm:$0xff] }
 0x867   :  { %2659 = vmatmul.f32.vlgmr.msra.gmra.mxu0 %v2039_v13  ;;  %2688 = vmatmul.f32.vlgmr.msrb.gmra.mxu1 %v2040_v38  ;;  %v1814_v45 = vpop.f32.mrf.mxu2  ;;  %v1843_v42 = vpop.f32.mrf.mxu3  ;;  %v2309_v39 = vld [vmem:[#allocation2 + $0x6c0] sm:$0xff] }
 0x868   :  { %v1815_v24 = vadd.f32 %v1814_v45, %v4712_v9  ;;  %v1844_v53 = vadd.f32 %v1843_v42, %v4715_v12  ;;  %2761 = vmatpush.msrb.mxu0 %v2330_v15  ;;  %2790 = vmatpush.msra.mxu1 %v2346_v17  ;;  %v2323_v45 = vld [vmem:[#allocation2 + $0x730] sm:$0xff] }
 0x869   :  { %2702 = vmatpush.msra.mxu2 %v2299_v51  ;;  %2731 = vmatpush.msra.mxu3 %v2315_v30  ;;  %v2339_v42 = vld [vmem:[#allocation2 + $0x7b0] sm:$0xff]  ;;  %v2292_v51 = vld [vmem:[#allocation2 + $0x638] sm:$0xff] }
 0x86a   :  { %v2037_v26 = vmax.f32 %v1815_v24, 0.0  ;;  %v2038_v46 = vmax.f32 %v1844_v53, 0.0  ;;  %v1875_v49 = vpop.f32.mrf.mxu0  ;;  %v1904_v27 = vpop.f32.mrf.mxu1  ;;  %2762 = vmatpush.msrb.mxu0 %v2329_v21  ;;  %2791 = vmatpush.msra.mxu1 %v2345_v61  ;;  %v2308_v30 = vld [vmem:[#allocation2 + $0x6b8] sm:$0xff] }
 0x86b   :  { %v1876_v25 = vadd.f32 %v1875_v49, %v4702_v5  ;;  %v1905_v50 = vadd.f32 %v1904_v27, %v4705_v10  ;;  %2703 = vmatpush.msra.mxu2 %v2298_v36  ;;  %2732 = vmatpush.msra.mxu3 %v2314_v54  ;;  %v4730_v36 = vperm.slane %v4699_v60, 6  ;;  %v4733_v54 = vperm.slane %v4699_v60, 7 }
 0x86c   :  { %2601 = vmatmul.f32.vlgmr.msrb.gmra.mxu2 %v2037_v26  ;;  %2630 = vmatmul.f32.vlgmr.msrb.gmra.mxu3 %v2038_v46  ;;  %v2322_v26 = vld [vmem:[#allocation2 + $0x728] sm:$0xff] }
 0x86d   :  { %v2055_v22 = vmax.f32 %v1876_v25, 0.0  ;;  %v2056_v37 = vmax.f32 %v1905_v50, 0.0  ;;  %2763 = vmatpush.msrb.mxu0 %v2328_v31  ;;  %2792 = vmatpush.msra.mxu1 %v2344_v59  ;;  %v2338_v46 = vld [vmem:[#allocation2 + $0x7a8] sm:$0xff]  ;;  %v2321_v31 = vld [vmem:[#allocation2 + $0x720] sm:$0xff] }
 0x86e   :  { %2704 = vmatpush.msra.mxu2 %v2297_v11  ;;  %2733 = vmatpush.msra.mxu3 %v2313_v55  ;;  %v2337_v59 = vld [vmem:[#allocation2 + $0x7a0] sm:$0xff]  ;;  %v2290_v11 = vld [vmem:[#allocation2 + $0x628] sm:$0xff] }
 0x86f   :  { %2662 = vmatmul.f32.gmra.mxu0 %v2055_v22  ;;  %2691 = vmatmul.f32.gmra.mxu1 %v2056_v37  ;;  %v1817_v41 = vpop.f32.mrf.mxu2  ;;  %v1846_v43 = vpop.f32.mrf.mxu3  ;;  %v2291_v37 = vld [vmem:[#allocation2 + $0x630] sm:$0xff]  ;;  %v2306_v55 = vld [vmem:[#allocation2 + $0x6a8] sm:$0xff] }
 0x870   :  { %v1818_v8 = vadd.f32 %v1817_v41, %v4712_v9  ;;  %v1847_v47 = vadd.f32 %v1846_v43, %v4715_v12  ;;  %2764 = vmatpush.msrb.mxu0 %v2327_v40  ;;  %2793 = vmatpush.msra.mxu1 %v2343_v62  ;;  %v2320_v41 = vld [vmem:[#allocation2 + $0x718] sm:$0xff] }
 0x871   :  { %2705 = vmatpush.msra.mxu2 %v2296_v1  ;;  %2734 = vmatpush.msra.mxu3 %v2312_v4  ;;  %v2336_v43 = vld [vmem:[#allocation2 + $0x798] sm:$0xff]  ;;  %v2318_v1 = vld [vmem:[#allocation2 + $0x708] sm:$0xff] }
 0x872   :  { %v2053_v57 = vmax.f32 %v1818_v8, 0.0  ;;  %v2054_v32 = vmax.f32 %v1847_v47, 0.0  ;;  %v1878_v0 = vpop.f32.mrf.mxu0  ;;  %v1907_v3 = vpop.f32.mrf.mxu1  ;;  %2765 = vmatpush.msrb.mxu0 %v2326_v48  ;;  %2794 = vmatpush.msra.mxu1 %v2342_v44  ;;  %v2319_v48 = vld [vmem:[#allocation2 + $0x710] sm:$0xff]  ;;  %v2334_v4 = vld [vmem:[#allocation2 + $0x788] sm:$0xff] }
 0x873   :  { %v1879_v6 = vadd.f32 %v1878_v0, %v4702_v5  ;;  %v1908_v33 = vadd.f32 %v1907_v3, %v4705_v10  ;;  %2706 = vmatpush.msra.mxu2 %v2295_v58  ;;  %2735 = vmatpush.msra.mxu3 %v2311_v23  ;;  %v2335_v44 = vld [vmem:[#allocation2 + $0x790] sm:$0xff]  ;;  %v2317_v58 = vld [vmem:[#allocation2 + $0x700] sm:$0xff] }
 0x874   :  { %2604 = vmatmul.f32.gmra.mxu2 %v2053_v57  ;;  %2633 = vmatmul.f32.gmra.mxu3 %v2054_v32  ;;  %v2289_v32 = vld [vmem:[#allocation2 + $0x620] sm:$0xff] }
 0x875   :  { %v2071_v16 = vmax.f32 %v1879_v6, 0.0  ;;  %v2072_v19 = vmax.f32 %v1908_v33, 0.0  ;;  %2766 = vmatpush.msrb.mxu0 %v2325_v7  ;;  %2795 = vmatpush.msra.mxu1 %v2341_v2  ;;  %v4740_v6 = vperm.slane %v4699_v60, 4  ;;  %v4743_v33 = vperm.slane %v4699_v60, 5  ;;  %v2288_v7 = vld [vmem:[#allocation2 + $0x618] sm:$0xff]  ;;  %v2333_v23 = vld [vmem:[#allocation2 + $0x780] sm:$0xff] }
 0x876   :  { %2707 = vmatpush.msra.mxu2 %v2294_v14  ;;  %2736 = vmatpush.msra.mxu3 %v2310_v56  ;;  %v2304_v2 = vld [vmem:[#allocation2 + $0x698] sm:$0xff]  ;;  %v2303_v14 = vld [vmem:[#allocation2 + $0x690] sm:$0xff] }
 0x877   :  { %2665 = vmatmul.f32.gmra.mxu0 %v2071_v16  ;;  %2694 = vmatmul.f32.gmra.mxu1 %v2072_v19  ;;  %v1820_v13 = vpop.f32.mrf.mxu2  ;;  %v1849_v38 = vpop.f32.mrf.mxu3 }
 0x878   :  { %v1821_v15 = vadd.f32 %v1820_v13, %v4712_v9  ;;  %v1850_v17 = vadd.f32 %v1849_v38, %v4715_v12  ;;  %2767 = vmatpush.msrb.mxu0 %v2324_v52  ;;  %2796 = vmatpush.msra.mxu1 %v2340_v63  ;;  %v2287_v38 = vld [vmem:[#allocation2 + $0x610] sm:$0xff] }
 0x879   :  { %2708 = vmatpush.msra.mxu2 %v2293_v20  ;;  %2737 = vmatpush.msra.mxu3 %v2309_v39  ;;  %v2302_v20 = vld [vmem:[#allocation2 + $0x688] sm:$0xff] }
 0x87a   :  { %v2069_v24 = vmax.f32 %v1821_v15, 0.0  ;;  %v2070_v53 = vmax.f32 %v1850_v17, 0.0  ;;  %v1881_v21 = vpop.f32.mrf.mxu0  ;;  %v1910_v61 = vpop.f32.mrf.mxu1  ;;  %2768 = vmatpush.msrb.mxu0 %v2323_v45  ;;  %2797 = vmatpush.msra.mxu1 %v2339_v42  ;;  %v2286_v42 = vld [vmem:[#allocation2 + $0x608] sm:$0xff] }
 0x87b   :  { %v1882_v49 = vadd.f32 %v1881_v21, %v4702_v5  ;;  %v1911_v27 = vadd.f32 %v1910_v61, %v4705_v10  ;;  %2709 = vmatpush.msra.mxu2 %v2292_v51  ;;  %2738 = vmatpush.msra.mxu3 %v2308_v30  ;;  %v2307_v10 = vld [vmem:[#allocation2 + $0x6b0] sm:$0xff]  ;;  %v2301_v21 = vld [vmem:[#allocation2 + $0x680] sm:$0xff] }
 0x87c   :  { %2769 = vmatpush.msrb.mxu0 %v2322_v26  ;;  %2798 = vmatpush.msra.mxu1 %v2338_v46 }
 0x87d   :  { %v2087_v25 = vmax.f32 %v1882_v49, 0.0  ;;  %v2088_v50 = vmax.f32 %v1911_v27, 0.0  ;;  %2607 = vmatmul.f32.gmra.mxu2 %v2069_v24  ;;  %2636 = vmatmul.f32.gmra.mxu3 %v2070_v53  ;;  %v2285_v53 = vld [vmem:[#allocation2 + $0x600] sm:$0xff] }
 0x87e   :  { %2770 = vmatpush.msrb.mxu0 %v2321_v31  ;;  %2799 = vmatpush.msra.mxu1 %v2337_v59 }
 0x87f   :  { %v1823_v22 = vpop.f32.mrf.mxu2  ;;  %v1852_v5 = vpop.f32.mrf.mxu3  ;;  %2668 = vmatmul.f32.gmra.mxu0 %v2087_v25  ;;  %2697 = vmatmul.f32.gmra.mxu1 %v2088_v50 }
 0x880   :  { %v1824_v40 = vadd.f32 %v1823_v22, %v4712_v9  ;;  %v1853_v62 = vadd.f32 %v1852_v5, %v4715_v12  ;;  %2710 = vmatpush.msra.mxu2 %v2291_v37  ;;  %2739 = vmatpush.msra.mxu3 %v2307_v10  ;;  %v2305_v12 = vld [vmem:[#allocation2 + $0x6a0] sm:$0xff] }
 0x881   :  { %2771 = vmatpush.msrb.mxu0 %v2320_v41  ;;  %2800 = vmatpush.msra.mxu1 %v2336_v43 }
 0x882   :  { %v1988_v8 = vpop.f32.mrf.mxu0  ;;  %v2017_v47 = vpop.f32.mrf.mxu1  ;;  %v2085_v0 = vmax.f32 %v1824_v40, 0.0  ;;  %v2086_v3 = vmax.f32 %v1853_v62, 0.0  ;;  %2711 = vmatpush.msra.mxu2 %v2290_v11  ;;  %2740 = vmatpush.msra.mxu3 %v2306_v55 }
 0x883   :  { %v1989_v57 = vadd.f32 %v1988_v8, %v4730_v36  ;;  %v2018_v9 = vadd.f32 %v2017_v47, %v4733_v54  ;;  %2772 = vmatpush.msrb.mxu0 %v2319_v48  ;;  %2801 = vmatpush.msra.mxu1 %v2335_v44 }
 0x884   :  { %2712 = vmatpush.msra.mxu2 %v2289_v32  ;;  %2741 = vmatpush.msra.mxu3 %v2305_v12 }
 0x885   :  { %v2043_v16 = vmax.f32 %v1989_v57, 0.0  ;;  %v2044_v19 = vmax.f32 %v2018_v9, 0.0  ;;  %2773 = vmatpush.msrb.mxu0 %v2318_v1  ;;  %2802 = vmatpush.msra.mxu1 %v2334_v4 }
 0x886   :  { %2610 = vmatmul.f32.gmra.mxu2 %v2085_v0  ;;  %2639 = vmatmul.f32.gmra.mxu3 %v2086_v3 }
 0x887   :  { %v1930_v52 = vpop.f32.mrf.mxu2  ;;  %v1959_v63 = vpop.f32.mrf.mxu3  ;;  %2713 = vmatpush.msra.mxu2 %v2288_v7  ;;  %2742 = vmatpush.msra.mxu3 %v2304_v2 }
 0x888   :  { %v1931_v13 = vadd.f32 %v1930_v52, %v4740_v6  ;;  %v1960_v60 = vadd.f32 %v1959_v63, %v4743_v33  ;;  %2774 = vmatpush.msrb.mxu0 %v2317_v58  ;;  %2803 = vmatpush.msra.mxu1 %v2333_v23 }
 0x889   :  { %2775 = vmatmul.f32.vlgmr.msrb.gmra.mxu0 %v2043_v16  ;;  %2804 = vmatmul.f32.vlgmr.msra.gmra.mxu1 %v2044_v19 }
 0x88a   :  { %v1991_v56 = vpop.f32.mrf.mxu0  ;;  %v2020_v15 = vpop.f32.mrf.mxu1  ;;  %2714 = vmatpush.msra.mxu2 %v2287_v38  ;;  %2743 = vmatpush.msra.mxu3 %v2303_v14  ;;  %v2041_v39 = vmax.f32 %v1931_v13, 0.0  ;;  %v2042_v24 = vmax.f32 %v1960_v60, 0.0 }
 0x88b   :  { %v1992_v17 = vadd.f32 %v1991_v56, %v4730_v36  ;;  %v2021_v45 = vadd.f32 %v2020_v15, %v4733_v54 }
 0x88c   :  { %2715 = vmatpush.msra.mxu2 %v2286_v42  ;;  %2744 = vmatpush.msra.mxu3 %v2302_v20 }
 0x88d   :  { %v2059_v61 = vmax.f32 %v1992_v17, 0.0  ;;  %v2060_v26 = vmax.f32 %v2021_v45, 0.0 }
 0x88e   :  { %2716 = vmatpush.msra.mxu2 %v2285_v53  ;;  %2745 = vmatpush.msra.mxu3 %v2301_v21 }
 0x88f   :  { %v1933_v46 = vpop.f32.mrf.mxu2  ;;  %v1962_v49 = vpop.f32.mrf.mxu3  ;;  %2717 = vmatmul.f32.vlgmr.msra.gmra.mxu2 %v2041_v39  ;;  %2746 = vmatmul.f32.vlgmr.msra.gmra.mxu3 %v2042_v24 }
 0x890   :  { %v1934_v27 = vadd.f32 %v1933_v46, %v4740_v6  ;;  %v1963_v51 = vadd.f32 %v1962_v49, %v4743_v33 }
 0x891   :  { %2778 = vmatmul.f32.gmra.mxu0 %v2059_v61  ;;  %2807 = vmatmul.f32.gmra.mxu1 %v2060_v26 }
 0x892   :  { %v1994_v30 = vpop.f32.mrf.mxu0  ;;  %v2023_v25 = vpop.f32.mrf.mxu1  ;;  %v2057_v59 = vmax.f32 %v1934_v27, 0.0  ;;  %v2058_v22 = vmax.f32 %v1963_v51, 0.0 }
 0x893   :  { %v1995_v50 = vadd.f32 %v1994_v30, %v4730_v36  ;;  %v2024_v31 = vadd.f32 %v2023_v25, %v4733_v54 }
 0x895   :  { %v2075_v5 = vmax.f32 %v1995_v50, 0.0  ;;  %v2076_v37 = vmax.f32 %v2024_v31, 0.0 }
 0x897   :  { %v1936_v10 = vpop.f32.mrf.mxu2  ;;  %v1965_v40 = vpop.f32.mrf.mxu3  ;;  %2720 = vmatmul.f32.gmra.mxu2 %v2057_v59  ;;  %2749 = vmatmul.f32.gmra.mxu3 %v2058_v22 }
 0x898   :  { %v1937_v62 = vadd.f32 %v1936_v10, %v4740_v6  ;;  %v1966_v41 = vadd.f32 %v1965_v40, %v4743_v33 }
 0x899   :  { %2781 = vmatmul.f32.gmra.mxu0 %v2075_v5  ;;  %2810 = vmatmul.f32.gmra.mxu1 %v2076_v37 }
 0x89a   :  { %v1997_v43 = vpop.f32.mrf.mxu0  ;;  %v2026_v11 = vpop.f32.mrf.mxu1  ;;  %v2073_v47 = vmax.f32 %v1937_v62, 0.0  ;;  %v2074_v48 = vmax.f32 %v1966_v41, 0.0 }
 0x89b   :  { %v1998_v55 = vadd.f32 %v1997_v43, %v4730_v36  ;;  %v2027_v8 = vadd.f32 %v2026_v11, %v4733_v54  ;;  %v3413_v36 = vld [vmem:[%s4907_s18] ss:$0 sm:$0xff] }
 0x89d   :  { %v2091_v44 = vmax.f32 %v1998_v55, 0.0  ;;  %v2092_v57 = vmax.f32 %v2027_v8, 0.0 }
 0x89f   :  { %v1939_v9 = vpop.f32.mrf.mxu2  ;;  %v1968_v32 = vpop.f32.mrf.mxu3  ;;  %2723 = vmatmul.f32.gmra.mxu2 %v2073_v47  ;;  %2752 = vmatmul.f32.gmra.mxu3 %v2074_v48 }
 0x8a0   :  { %v1940_v12 = vadd.f32 %v1939_v9, %v4740_v6  ;;  %v1969_v0 = vadd.f32 %v1968_v32, %v4743_v33 }
 0x8a1   :  { %2784 = vmatmul.f32.gmra.mxu0 %v2091_v44  ;;  %2813 = vmatmul.f32.gmra.mxu1 %v2092_v57 }
 0x8a2   :  { %v2428_v3 = vpop.f32.mrf.mxu0  ;;  %v2457_v1 = vpop.f32.mrf.mxu1  ;;  %v2089_v54 = vmax.f32 %v1940_v12, 0.0  ;;  %v2090_v4 = vmax.f32 %v1969_v0, 0.0 }
 0x8a7   :  { %v2370_v7 = vpop.f32.mrf.mxu2  ;;  %v2399_v2 = vpop.f32.mrf.mxu3  ;;  %2726 = vmatmul.f32.gmra.mxu2 %v2089_v54  ;;  %2755 = vmatmul.f32.gmra.mxu3 %v2090_v4 }
 0x8a8   :  { %v2371_v16 = vadd.f32 %v3413_v36, %v2370_v7 }
 0x8aa   :  { %v2400_v19 = vadd.f32 %v2399_v2, %v2371_v16  ;;  %v2431_v58 = vpop.f32.mrf.mxu0  ;;  %v2460_v6 = vpop.f32.mrf.mxu1 }
 0x8ac   :  { %v2429_v23 = vadd.f32 %v2428_v3, %v2400_v19 }
 0x8ae   :  { %v2458_v33 = vadd.f32 %v2457_v1, %v2429_v23 }
 0x8af   :  { %v2373_v52 = vpop.f32.mrf.mxu2  ;;  %v2402_v63 = vpop.f32.mrf.mxu3 }
 0x8b0   :  { %v2374_v13 = vadd.f32 %v3413_v36, %v2373_v52 }
 0x8b2   :  { %v2403_v60 = vadd.f32 %v2402_v63, %v2374_v13  ;;  %v2434_v14 = vpop.f32.mrf.mxu0  ;;  %v2463_v56 = vpop.f32.mrf.mxu1 }
 0x8b4   :  { %v2432_v38 = vadd.f32 %v2431_v58, %v2403_v60 }
 0x8b6   :  { %v2461_v15 = vadd.f32 %v2460_v6, %v2432_v38 }
 0x8b7   :  { %v2376_v17 = vpop.f32.mrf.mxu2  ;;  %v2405_v42 = vpop.f32.mrf.mxu3 }
 0x8b8   :  { %v2377_v45 = vadd.f32 %v3413_v36, %v2376_v17 }
 0x8ba   :  { %v2406_v20 = vadd.f32 %v2405_v42, %v2377_v45 }
 0x8bc   :  { %v2435_v39 = vadd.f32 %v2434_v14, %v2406_v20  ;;  %v2437_v24 = vpop.f32.mrf.mxu0  ;;  %v2466_v53 = vpop.f32.mrf.mxu1 }
 0x8be   :  { %v2464_v21 = vadd.f32 %v2463_v56, %v2435_v39 }
 0x8c4   :  { %v2544_v61 = vpop.f32.mrf.mxu0  ;;  %v2573_v26 = vpop.f32.mrf.mxu1 }
 0x8c7   :  { %v2379_v46 = vpop.f32.mrf.mxu2  ;;  %v2408_v49 = vpop.f32.mrf.mxu3 }
 0x8c8   :  { %v2380_v27 = vadd.f32 %v3413_v36, %v2379_v46 }
 0x8ca   :  { %v2409_v51 = vadd.f32 %v2408_v49, %v2380_v27 }
 0x8cc   :  { %v2438_v30 = vadd.f32 %v2437_v24, %v2409_v51  ;;  %v2547_v25 = vpop.f32.mrf.mxu0  ;;  %v2576_v50 = vpop.f32.mrf.mxu1 }
 0x8ce   :  { %v2467_v31 = vadd.f32 %v2466_v53, %v2438_v30 }
 0x8cf   :  { %v2486_v59 = vpop.f32.mrf.mxu2  ;;  %v2515_v22 = vpop.f32.mrf.mxu3 }
 0x8d0   :  { %v2487_v3 = vadd.f32 %v2486_v59, %v2458_v33 }
 0x8d2   :  { %v2516_v1 = vadd.f32 %v2515_v22, %v2487_v3 }
 0x8d4   :  { %v2550_v5 = vpop.f32.mrf.mxu0  ;;  %v2579_v37 = vpop.f32.mrf.mxu1  ;;  %v2545_v4 = vadd.f32 %v2544_v61, %v2516_v1 }
 0x8d6   :  { %v2574_v58 = vadd.f32 %v2573_v26, %v2545_v4 }
 0x8d7   :  { %v2489_v10 = vpop.f32.mrf.mxu2  ;;  %v2518_v40 = vpop.f32.mrf.mxu3 }
 0x8d8   :  { %v2490_v7 = vadd.f32 %v2489_v10, %v2461_v15 }
 0x8da   :  { %v2519_v19 = vadd.f32 %v2518_v40, %v2490_v7 }
 0x8dc   :  { %v2553_v62 = vpop.f32.mrf.mxu0  ;;  %v2582_v11 = vpop.f32.mrf.mxu1  ;;  %v2548_v52 = vadd.f32 %v2547_v25, %v2519_v19 }
 0x8de   :  { %v2577_v17 = vadd.f32 %v2576_v50, %v2548_v52 }
 0x8df   :  { %v2492_v41 = vpop.f32.mrf.mxu2  ;;  %v2521_v43 = vpop.f32.mrf.mxu3 }
 0x8e0   :  { %v2493_v63 = vadd.f32 %v2492_v41, %v2464_v21 }
 0x8e2   :  { %v2522_v56 = vadd.f32 %v2521_v43, %v2493_v63 }
 0x8e4   :  { %v2660_v47 = vpop.f32.mrf.mxu0  ;;  %v2689_v48 = vpop.f32.mrf.mxu1  ;;  %v2551_v42 = vadd.f32 %v2550_v5, %v2522_v56 }
 0x8e6   :  { %v2580_v49 = vadd.f32 %v2579_v37, %v2551_v42 }
 0x8e7   :  { %v2495_v55 = vpop.f32.mrf.mxu2  ;;  %v2524_v8 = vpop.f32.mrf.mxu3 }
 0x8e8   :  { %v2496_v20 = vadd.f32 %v2495_v55, %v2467_v31 }
 0x8ea   :  { %v2525_v46 = vadd.f32 %v2524_v8, %v2496_v20 }
 0x8ec   :  { %v2663_v9 = vpop.f32.mrf.mxu0  ;;  %v2692_v32 = vpop.f32.mrf.mxu1  ;;  %v2554_v25 = vadd.f32 %v2553_v62, %v2525_v46 }
 0x8ee   :  { %v2583_v41 = vadd.f32 %v2582_v11, %v2554_v25 }
 0x8ef   :  { %v2602_v44 = vpop.f32.mrf.mxu2  ;;  %v2631_v57 = vpop.f32.mrf.mxu3 }
 0x8f0   :  { %v2603_v6 = vadd.f32 %v2602_v44, %v2574_v58 }
 0x8f2   :  { %v2632_v60 = vadd.f32 %v2631_v57, %v2603_v6 }
 0x8f4   :  { %v2666_v36 = vpop.f32.mrf.mxu0  ;;  %v2695_v54 = vpop.f32.mrf.mxu1  ;;  %v2661_v33 = vadd.f32 %v2660_v47, %v2632_v60 }
 0x8f6   :  { %v2690_v53 = vadd.f32 %v2689_v48, %v2661_v33 }
 0x8f7   :  { %v2605_v12 = vpop.f32.mrf.mxu2  ;;  %v2634_v0 = vpop.f32.mrf.mxu3 }
 0x8f8   :  { %v2606_v45 = vadd.f32 %v2605_v12, %v2577_v17 }
 0x8fa   :  { %v2635_v15 = vadd.f32 %v2634_v0, %v2606_v45 }
 0x8fc   :  { %v2669_v23 = vpop.f32.mrf.mxu0  ;;  %v2698_v13 = vpop.f32.mrf.mxu1  ;;  %v2664_v21 = vadd.f32 %v2663_v9, %v2635_v15 }
 0x8fe   :  { %v2693_v10 = vadd.f32 %v2692_v32, %v2664_v21 }
 0x900   :  { %v2608_v2 = vpop.f32.mrf.mxu2  ;;  %v2637_v16 = vpop.f32.mrf.mxu3 }
 0x901   :  { %v2609_v51 = vadd.f32 %v2608_v2, %v2580_v49 }
 0x903   :  { %v2638_v22 = vadd.f32 %v2637_v16, %v2609_v51 }
 0x905   :  { %v2667_v48 = vadd.f32 %v2666_v36, %v2638_v22  ;;  %v2931_v22 = vld [vmem:[%s4910_s21 + $0x10] sm:$0xff] }
 0x906   :  { %v2776_v39 = vpop.f32.mrf.mxu0  ;;  %v2805_v24 = vpop.f32.mrf.mxu1 }
 0x907   :  { %v2696_v9 = vadd.f32 %v2695_v54, %v2667_v48 }
 0x909   :  { %v2611_v38 = vpop.f32.mrf.mxu2  ;;  %v2640_v14 = vpop.f32.mrf.mxu3 }
 0x90a   :  { %v2612_v8 = vadd.f32 %v2611_v38, %v2583_v41 }
 0x90c   :  { %v2641_v62 = vadd.f32 %v2640_v14, %v2612_v8 }
 0x90e   :  { %v2779_v50 = vpop.f32.mrf.mxu0  ;;  %v2808_v47 = vpop.f32.mrf.mxu1  ;;  %v2670_v4 = vadd.f32 %v2669_v23, %v2641_v62 }
 0x910   :  { %v2699_v16 = vadd.f32 %v2698_v13, %v2670_v4  ;;  %v3415_v4 = vld [vmem:[%s4909_s20] ss:$0 sm:$0xff] }
 0x912   :  { %v2718_v61 = vpop.f32.mrf.mxu2  ;;  %v2747_v26 = vpop.f32.mrf.mxu3 }
 0x913   :  { %v2719_v27 = vadd.f32 %v2718_v61, %v2690_v53 }
 0x915   :  { %v2748_v30 = vadd.f32 %v2747_v26, %v2719_v27 }
 0x916   :  { %v2782_v11 = vpop.f32.mrf.mxu0  ;;  %v2811_v36 = vpop.f32.mrf.mxu1 }
 0x917   :  { %v2777_v59 = vadd.f32 %v2776_v39, %v2748_v30 }
 0x919   :  { %v2806_v40 = vadd.f32 %v2805_v24, %v2777_v59  ;;  %v2932_v59 = vld [vmem:[%s4910_s21 + $0x18] sm:$0xff] }
 0x91a   :  { %v2721_v5 = vpop.f32.mrf.mxu2  ;;  %v2750_v31 = vpop.f32.mrf.mxu3  ;;  %2958 = vmatpush.msrb.mxu2 %v2932_v59  ;;  %3047 = vmatpush.msra.mxu0 %v2932_v59  ;;  %v2927_v59 = vld [vmem:[%s4947_s29 + $0x10] sm:$0xff] }
 0x91b   :  { %v2722_v43 = vadd.f32 %v2721_v5, %v2693_v10  ;;  %v2817_v55 = vadd.f32 %v2806_v40, %v4347_v34  ;;  %v2929_v10 = vld [vmem:[%s4910_s21] sm:$0xff] }
 0x91c   :  { %2959 = vmatpush.msrb.mxu2 %v2931_v22  ;;  %3048 = vmatpush.msra.mxu0 %v2931_v22  ;;  %v2928_v22 = vld [vmem:[%s4947_s29 + $0x18] sm:$0xff] }
 0x91d   :  { %v2751_v37 = vadd.f32 %v2750_v31, %v2722_v43  ;;  %v2823_v44 = vsel %vm205_vm1, %v2817_v55, 0.0 }
 0x91e   :  { %2824 = vadd.xlane.f32.xlu0 %v2823_v44  ;;  %v2785_v38 = vpop.f32.mrf.mxu0  ;;  %v2814_v23 = vpop.f32.mrf.mxu1 }
 0x91f   :  { %v2780_v57 = vadd.f32 %v2779_v50, %v2751_v37  ;;  %v2930_v50 = vld [vmem:[%s4910_s21 + $0x8] sm:$0xff] }
 0x920   :  { %2960 = vmatpush.msrb.mxu2 %v2930_v50  ;;  %3049 = vmatpush.msra.mxu0 %v2930_v50  ;;  %v3416_v50 = vld [vmem:[%s4911_s22] ss:$0 sm:$0xff] }
 0x921   :  { %v2809_v12 = vadd.f32 %v2808_v47, %v2780_v57 }
 0x922   :  { %v2724_v0 = vpop.f32.mrf.mxu2  ;;  %v2753_v32 = vpop.f32.mrf.mxu3  ;;  %2961 = vmatpush.msrb.mxu2 %v2929_v10  ;;  %3050 = vmatpush.msra.mxu0 %v2929_v10 }
 0x923   :  { %v2725_v3 = vadd.f32 %v2724_v0, %v2696_v9  ;;  %v2818_v1 = vadd.f32 %v2809_v12, %v4360_v29 }
 0x925   :  { %v2754_v7 = vadd.f32 %v2753_v32, %v2725_v3  ;;  %v2826_v34 = vsel %vm205_vm1, %v2818_v1, 0.0  ;;  %v3414_v3 = vld [vmem:[%s4908_s19] ss:$0 sm:$0xff] }
 0x926   :  { %2827 = vadd.xlane.f32.xlu2 %v2826_v34 }
 0x927   :  { %v2783_v2 = vadd.f32 %v2782_v11, %v2754_v7 }
 0x929   :  { %v2812_v19 = vadd.f32 %v2811_v36, %v2783_v2 }
 0x92a   :  { %v2727_v58 = vpop.f32.mrf.mxu2  ;;  %v2756_v52 = vpop.f32.mrf.mxu3 }
 0x92b   :  { %v2728_v6 = vadd.f32 %v2727_v58, %v2699_v16  ;;  %v2819_v54 = vadd.f32 %v2812_v19, %v4373_v28 }
 0x92d   :  { %v2757_v63 = vadd.f32 %v2756_v52, %v2728_v6  ;;  %v2829_v60 = vsel %vm205_vm1, %v2819_v54, 0.0 }
 0x92e   :  { %2830 = vadd.xlane.f32.xlu1 %v2829_v60 }
 0x92f   :  { %v2786_v29 = vadd.f32 %v2785_v38, %v2757_v63 }
 0x931   :  { %v2815_v14 = vadd.f32 %v2814_v23, %v2786_v29 }
 0x933   :  { %v2820_v56 = vadd.f32 %v2815_v14, %v4435_v18 }
 0x935   :  { %v2832_v17 = vsel %vm205_vm1, %v2820_v56, 0.0 }
 0x936   :  { %2833 = vadd.xlane.f32.xlu0 %v2832_v17 }
 0x991   :  { %v2825_v13 = vpop.xlane.xlu0 %2824 }
 0x992   :  { %v2835_v33 = vmul.f32 %v2825_v13, %v4257_v35 }
 0x994   :  { %v2839_v45 = vsub.f32 %v2817_v55, %v2835_v33 }
 0x996   :  { %v2843_v42 = vmul.f32 %v2839_v45, %v2839_v45 }
 0x998   :  { %v2847_v28 = vsel %vm205_vm1, %v2843_v42, 0.0 }
 0x999   :  { %v2828_v20 = vpop.xlane.xlu2 %2827  ;;  %2848 = vadd.xlane.f32.xlu2 %v2847_v28 }
 0x99a   :  { %v2836_v39 = vmul.f32 %v2828_v20, %v4257_v35 }
 0x99c   :  { %v4773_v15 = vsub.f32 %v2818_v1, %v2836_v39 }
 0x99e   :  { %v2844_v24 = vmul.f32 %v4773_v15, %v4773_v15 }
 0x9a0   :  { %v2850_v18 = vsel %vm205_vm1, %v2844_v24, 0.0 }
 0x9a1   :  { %v2831_v53 = vpop.xlane.xlu1 %2830  ;;  %2851 = vadd.xlane.f32.xlu1 %v2850_v18 }
 0x9a2   :  { %v2837_v61 = vmul.f32 %v2831_v53, %v4257_v35 }
 0x9a4   :  { %v4779_v26 = vsub.f32 %v2819_v54, %v2837_v61 }
 0x9a6   :  { %v2845_v46 = vmul.f32 %v4779_v26, %v4779_v26 }
 0x9a8   :  { %v2853_v49 = vsel %vm205_vm1, %v2845_v46, 0.0 }
 0x9a9   :  { %2854 = vadd.xlane.f32.xlu0 %v2853_v49  ;;  %v2834_v27 = vpop.xlane.xlu0 %2833 }
 0x9aa   :  { %v2838_v21 = vmul.f32 %v2834_v27, %v4257_v35 }
 0x9ac   :  { %v4785_v51 = vsub.f32 %v2820_v56, %v2838_v21 }
 0x9ae   :  { %v2846_v30 = vmul.f32 %v4785_v51, %v4785_v51 }
 0x9b0   :  { %v2856_v25 = vsel %vm205_vm1, %v2846_v30, 0.0 }
 0x9b1   :  { %2857 = vadd.xlane.f32.xlu2 %v2856_v25  ;;  %v2925_v25 = vld [vmem:[%s4947_s29] sm:$0xff] }
 0xa0c   :  { %v2849_v40 = vpop.xlane.xlu2 %2848 }
 0xa0d   :  { %v2859_v5 = vmul.f32 %v2849_v40, %v4257_v35 }
 0xa0f   :  { %v2863_v31 = vadd.f32 1e-05, %v2859_v5 }
 0xa11   :  { %3492 = vrsqrt.f32 %v2863_v31  ;;  %vm2873_vm2 = vweird.f32 %v2863_v31 }
 0xa14   :  { %v2852_v41 = vpop.xlane.xlu1 %2851 }
 0xa15   :  { %v2860_v43 = vmul.f32 %v2852_v41, %v4257_v35 }
 0xa17   :  { %v3493_v55 = vpop.eup %3492  ;;  %v2864_v47 = vadd.f32 1e-05, %v2860_v43 }
 0xa18   :  { %v2868_v48 = vmul.f32 %v3493_v55, %v2863_v31  ;;  %vm2874_vm14 = vweird.f32 %v3493_v55 }
 0xa19   :  { %3494 = vrsqrt.f32 %v2864_v47  ;;  %vm2875_vm15 = vmor %vm2873_vm2, %vm2874_vm14  ;;  %vm2883_vm4 = vweird.f32 %v2864_v47 }
 0xa1a   :  { %v2869_v8 = vmul.f32 %v3493_v55, %v2868_v48 }
 0xa1c   :  { %v2870_v37 = vmul.f32 0.5, %v2869_v8  ;;  %v2855_v44 = vpop.xlane.xlu0 %2854 }
 0xa1d   :  { %v2861_v57 = vmul.f32 %v2855_v44, %v4257_v35 }
 0xa1e   :  { %v2871_v62 = vsub.f32 1.5, %v2870_v37 }
 0xa1f   :  { %v3495_v9 = vpop.eup %3494  ;;  %v2865_v12 = vadd.f32 1e-05, %v2861_v57 }
 0xa20   :  { %v2872_v0 = vmul.f32 %v3493_v55, %v2871_v62  ;;  %v2878_v32 = vmul.f32 %v3495_v9, %v2864_v47  ;;  %vm2884_vm3 = vweird.f32 %v3495_v9 }
 0xa21   :  { %3496 = vrsqrt.f32 %v2865_v12  ;;  %vm2885_vm5 = vmor %vm2883_vm4, %vm2884_vm3  ;;  %vm2893_vm7 = vweird.f32 %v2865_v12 }
 0xa22   :  { %v2876_v1 = vsel %vm2875_vm15, %v3493_v55, %v2872_v0  ;;  %v2879_v11 = vmul.f32 %v3495_v9, %v2878_v32 }
 0xa23   :  { %v2907_v7 = vmul.f32 %v2876_v1, %v2839_v45 }
 0xa24   :  { %v2880_v34 = vmul.f32 0.5, %v2879_v11  ;;  %v2858_v36 = vpop.xlane.xlu2 %2857 }
 0xa25   :  { %v2914_v2 = vmul.f32 %v3414_v3, %v2907_v7  ;;  %v2862_v16 = vmul.f32 %v2858_v36, %v4257_v35 }
 0xa26   :  { %v2881_v19 = vsub.f32 1.5, %v2880_v34 }
 0xa27   :  { %v3497_v58 = vpop.eup %3496  ;;  %v2921_v6 = vadd.f32 %v3415_v4, %v2914_v2  ;;  %v2866_v54 = vadd.f32 1e-05, %v2862_v16 }
 0xa28   :  { %v2882_v52 = vmul.f32 %v3495_v9, %v2881_v19  ;;  %v2888_v63 = vmul.f32 %v3497_v58, %v2865_v12  ;;  %vm2894_vm6 = vweird.f32 %v3497_v58 }
 0xa29   :  { %3498 = vrsqrt.f32 %v2866_v54  ;;  %3343 = vmatmul.msk.f32.vlgmr.msrb.gmra.mxu2 %vm205_vm1, %v2921_v6  ;;  %vm2895_vm8 = vmor %vm2893_vm7, %vm2894_vm6  ;;  %vm2903_vm10 = vweird.f32 %v2866_v54 }
 0xa2a   :  { %v2886_v60 = vsel %vm2885_vm5, %v3495_v9, %v2882_v52  ;;  %v2889_v38 = vmul.f32 %v3497_v58, %v2888_v63 }
 0xa2b   :  { %v2908_v29 = vmul.f32 %v2886_v60, %v4773_v15 }
 0xa2c   :  { %v2890_v23 = vmul.f32 0.5, %v2889_v38 }
 0xa2d   :  { %v2915_v14 = vmul.f32 %v3414_v3, %v2908_v29 }
 0xa2e   :  { %v2891_v56 = vsub.f32 1.5, %v2890_v23 }
 0xa2f   :  { %v3499_v35 = vpop.eup %3498  ;;  %v2922_v17 = vadd.f32 %v3415_v4, %v2915_v14 }
 0xa30   :  { %v2892_v13 = vmul.f32 %v3497_v58, %v2891_v56  ;;  %v2898_v33 = vmul.f32 %v3499_v35, %v2866_v54  ;;  %vm2904_vm9 = vweird.f32 %v3499_v35 }
 0xa31   :  { %3344 = vmatmul.msk.f32.gmra.mxu2 %vm205_vm1, %v2922_v17  ;;  %vm2905_vm11 = vmor %vm2903_vm10, %vm2904_vm9 }
 0xa32   :  { %v2896_v45 = vsel %vm2895_vm8, %v3497_v58, %v2892_v13  ;;  %v2899_v42 = vmul.f32 %v3499_v35, %v2898_v33 }
 0xa33   :  { %v2909_v28 = vmul.f32 %v2896_v45, %v4779_v26 }
 0xa34   :  { %v2900_v20 = vmul.f32 0.5, %v2899_v42 }
 0xa35   :  { %v2916_v39 = vmul.f32 %v3414_v3, %v2909_v28 }
 0xa36   :  { %v2901_v24 = vsub.f32 1.5, %v2900_v20 }
 0xa37   :  { %v2923_v15 = vadd.f32 %v3415_v4, %v2916_v39 }
 0xa38   :  { %v2902_v18 = vmul.f32 %v3499_v35, %v2901_v24  ;;  %v3144_v24 = vld [vmem:[%s4912_s23 + $0x18] sm:$0xff] }
 0xa39   :  { %3345 = vmatmul.msk.f32.gmra.mxu2 %vm205_vm1, %v2923_v15  ;;  %v3143_v15 = vld [vmem:[%s4912_s23 + $0x10] sm:$0xff] }
 0xa3a   :  { %v2906_v53 = vsel %vm2905_vm11, %v3499_v35, %v2902_v18  ;;  %3173 = vmatpush.msra.mxu2 %v3144_v24  ;;  %v3142_v18 = vld [vmem:[%s4912_s23 + $0x8] sm:$0xff] }
 0xa3b   :  { %v2910_v61 = vmul.f32 %v2906_v53, %v4785_v51  ;;  %v2926_v51 = vld [vmem:[%s4947_s29 + $0x8] sm:$0xff]  ;;  %v3141_v53 = vld [vmem:[%s4912_s23] sm:$0xff] }
 0xa3c   :  { %3174 = vmatpush.msra.mxu2 %v3143_v15 }
 0xa3d   :  { %v2917_v46 = vmul.f32 %v3414_v3, %v2910_v61 }
 0xa3e   :  { %3175 = vmatpush.msra.mxu2 %v3142_v18 }
 0xa3f   :  { %v2924_v49 = vadd.f32 %v3415_v4, %v2917_v46 }
 0xa40   :  { %3176 = vmatpush.msra.mxu2 %v3141_v53 }
 0xa41   :  { %3346 = vmatmul.msk.f32.gmra.mxu2 %vm205_vm1, %v2924_v49 }
 0xaac   :  { %v2963_v27 = vpop.f32.mrf.mxu2 }
 0xab4   :  { %v2966_v21 = vpop.f32.mrf.mxu2 }
 0xabc   :  { %v2969_v26 = vpop.f32.mrf.mxu2 }
 0xac4   :  { %v2972_v30 = vpop.f32.mrf.mxu2 }
 0xac5   :  { %3002 = vmatpush.msrb.mxu3 %v2972_v30 }
 0xac7   :  { %3003 = vmatpush.msrb.mxu3 %v2969_v26 }
 0xac9   :  { %3004 = vmatpush.msrb.mxu3 %v2966_v21 }
 0xacb   :  { %3005 = vmatpush.msrb.mxu3 %v2963_v27 }
 0xacc   :  { %3347 = vmatmul.msk.f32.vlgmr.msrb.gmra.mxu3 %vm205_vm1, %v2925_v25 }
 0xad4   :  { %3348 = vmatmul.msk.f32.gmra.mxu3 %vm205_vm1, %v2926_v51 }
 0xadc   :  { %3349 = vmatmul.msk.f32.gmra.mxu3 %vm205_vm1, %v2927_v59 }
 0xae4   :  { %3350 = vmatmul.msk.f32.gmra.mxu3 %vm205_vm1, %v2928_v22 }
 0xb4f   :  { %v3007_v10 = vpop.f32.mrf.mxu3 }
 0xb50   :  { %v3008_v40 = vadd.f32 %v3416_v50, %v3007_v10 }
 0xb52   :  { %v3019_v5 = vmax.f32 %v3008_v40, 0.0 }
 0xb54   :  { %3351 = vmatmul.msk.f32.vlgmr.msra.gmra.mxu0 %vm205_vm1, %v3019_v5 }
 0xb57   :  { %v3010_v31 = vpop.f32.mrf.mxu3 }
 0xb58   :  { %v3011_v41 = vadd.f32 %v3416_v50, %v3010_v31 }
 0xb5a   :  { %v3020_v43 = vmax.f32 %v3011_v41, 0.0  ;;  %v3417_v41 = vld [vmem:[%s4913_s24] ss:$0 sm:$0xff] }
 0xb5c   :  { %3352 = vmatmul.msk.f32.gmra.mxu0 %vm205_vm1, %v3020_v43 }
 0xb5f   :  { %v3013_v55 = vpop.f32.mrf.mxu3 }
 0xb60   :  { %v3014_v47 = vadd.f32 %v3416_v50, %v3013_v55 }
 0xb62   :  { %v3021_v48 = vmax.f32 %v3014_v47, 0.0 }
 0xb64   :  { %3353 = vmatmul.msk.f32.gmra.mxu0 %vm205_vm1, %v3021_v48 }
 0xb67   :  { %v3016_v8 = vpop.f32.mrf.mxu3 }
 0xb68   :  { %v3017_v37 = vadd.f32 %v3416_v50, %v3016_v8 }
 0xb6a   :  { %v3022_v44 = vmax.f32 %v3017_v37, 0.0 }
 0xb6c   :  { %3354 = vmatmul.msk.f32.gmra.mxu0 %vm205_vm1, %v3022_v44 }
 0xbd1   :  { %v3052_v57 = vpop.f32.mrf.mxu0 }
 0xbd9   :  { %v3055_v62 = vpop.f32.mrf.mxu0 }
 0xbe1   :  { %v3058_v9 = vpop.f32.mrf.mxu0 }
 0xbe9   :  { %v3061_v12 = vpop.f32.mrf.mxu0 }
 0xbea   :  { %3076 = vmatpush.msrb.mxu1 %v3061_v12 }
 0xbec   :  { %3077 = vmatpush.msrb.mxu1 %v3058_v9 }
 0xbee   :  { %3078 = vmatpush.msrb.mxu1 %v3055_v62 }
 0xbf0   :  { %3079 = vmatpush.msrb.mxu1 %v3052_v57 }
 0xbf1   :  { %3355 = vmatmul.msk.f32.vlgmr.msrb.gmra.mxu1 %vm205_vm1, %v2925_v25 }
 0xbf9   :  { %3356 = vmatmul.msk.f32.gmra.mxu1 %vm205_vm1, %v2926_v51 }
 0xc01   :  { %3357 = vmatmul.msk.f32.gmra.mxu1 %vm205_vm1, %v2927_v59 }
 0xc09   :  { %3358 = vmatmul.msk.f32.gmra.mxu1 %vm205_vm1, %v2928_v22 }
 0xc6e   :  { %v3081_v0 = vpop.f32.mrf.mxu1 }
 0xc6f   :  { %v3082_v32 = vadd.f32 %v3416_v50, %v3081_v0 }
 0xc71   :  { %v3093_v3 = vsel %vm205_vm1, %v3082_v32, -inf }
 0xc72   :  { %3094 = vmax.xlane.f32.xlu1 %v3093_v3 }
 0xc76   :  { %v3084_v1 = vpop.f32.mrf.mxu1 }
 0xc77   :  { %v3085_v11 = vadd.f32 %v3416_v50, %v3084_v1 }
 0xc79   :  { %v3096_v4 = vsel %vm205_vm1, %v3085_v11, -inf }
 0xc7a   :  { %3097 = vmax.xlane.f32.xlu0 %v3096_v4 }
 0xc7e   :  { %v3087_v7 = vpop.f32.mrf.mxu1 }
 0xc7f   :  { %v3088_v34 = vadd.f32 %v3416_v50, %v3087_v7 }
 0xc81   :  { %v3099_v36 = vsel %vm205_vm1, %v3088_v34, -inf }
 0xc82   :  { %3100 = vmax.xlane.f32.xlu2 %v3099_v36 }
 0xc86   :  { %v3090_v2 = vpop.f32.mrf.mxu1 }
 0xc87   :  { %v3091_v16 = vadd.f32 %v3416_v50, %v3090_v2 }
 0xc89   :  { %v3102_v19 = vsel %vm205_vm1, %v3091_v16, -inf }
 0xc8a   :  { %3103 = vmax.xlane.f32.xlu1 %v3102_v19 }
 0xce5   :  { %v3095_v58 = vpop.xlane.xlu1 %3094 }
 0xce6   :  { %v3105_v6 = vsub.f32 %v3082_v32, %v3095_v58 }
 0xce8   :  { %v3109_v54 = vmul.f32 1.442695, %v3105_v6 }
 0xcea   :  { %3500 = vpow2.f32 %v3109_v54 }
 0xced   :  { %v3098_v52 = vpop.xlane.xlu0 %3097 }
 0xcee   :  { %v3106_v63 = vsub.f32 %v3085_v11, %v3098_v52 }
 0xcf0   :  { %v3501_v60 = vpop.eup %3500  ;;  %v3111_v38 = vmul.f32 1.442695, %v3106_v63 }
 0xcf1   :  { %v3117_v29 = vsel %vm205_vm1, %v3501_v60, 0.0 }
 0xcf2   :  { %3502 = vpow2.f32 %v3111_v38  ;;  %3118 = vadd.xlane.f32.xlu0 %v3117_v29 }
 0xcf5   :  { %v3101_v23 = vpop.xlane.xlu2 %3100 }
 0xcf6   :  { %v3107_v14 = vsub.f32 %v3088_v34, %v3101_v23 }
 0xcf8   :  { %v3503_v56 = vpop.eup %3502  ;;  %v3113_v35 = vmul.f32 1.442695, %v3107_v14 }
 0xcf9   :  { %v3120_v17 = vsel %vm205_vm1, %v3503_v56, 0.0 }
 0xcfa   :  { %3504 = vpow2.f32 %v3113_v35  ;;  %3121 = vadd.xlane.f32.xlu2 %v3120_v17 }
 0xcfd   :  { %v3104_v13 = vpop.xlane.xlu1 %3103 }
 0xcfe   :  { %v3108_v33 = vsub.f32 %v3091_v16, %v3104_v13 }
 0xd00   :  { %v3505_v45 = vpop.eup %3504  ;;  %v3115_v42 = vmul.f32 1.442695, %v3108_v33 }
 0xd01   :  { %v3123_v28 = vsel %vm205_vm1, %v3505_v45, 0.0 }
 0xd02   :  { %3506 = vpow2.f32 %v3115_v42  ;;  %3124 = vadd.xlane.f32.xlu1 %v3123_v28 }
 0xd08   :  { %v3507_v20 = vpop.eup %3506 }
 0xd09   :  { %v3126_v39 = vsel %vm205_vm1, %v3507_v20, 0.0 }
 0xd0a   :  { %3127 = vadd.xlane.f32.xlu0 %v3126_v39 }
 0xd65   :  { %v3119_v61 = vpop.xlane.xlu0 %3118 }
 0xd66   :  { %3508 = vlog2.f32 %v3119_v61 }
 0xd6c   :  { %v3509_v46 = vpop.eup %3508 }
 0xd6d   :  { %v3130_v49 = vmul.f32 0.6931472, %v3509_v46  ;;  %v3122_v27 = vpop.xlane.xlu2 %3121 }
 0xd6e   :  { %3510 = vlog2.f32 %v3122_v27 }
 0xd6f   :  { %v3137_v21 = vsub.f32 %v3105_v6, %v3130_v49 }
 0xd71   :  { %3359 = vmatmul.msk.f32.vlgmr.msra.gmra.mxu2 %vm205_vm1, %v3137_v21 }
 0xd74   :  { %v3511_v26 = vpop.eup %3510 }
 0xd75   :  { %v3132_v30 = vmul.f32 0.6931472, %v3511_v26  ;;  %v3125_v25 = vpop.xlane.xlu1 %3124 }
 0xd76   :  { %3512 = vlog2.f32 %v3125_v25 }
 0xd77   :  { %v3138_v51 = vsub.f32 %v3106_v63, %v3132_v30 }
 0xd79   :  { %3360 = vmatmul.msk.f32.gmra.mxu2 %vm205_vm1, %v3138_v51 }
 0xd7c   :  { %v3513_v59 = vpop.eup %3512 }
 0xd7d   :  { %v3134_v22 = vmul.f32 0.6931472, %v3513_v59  ;;  %v3128_v50 = vpop.xlane.xlu0 %3127 }
 0xd7e   :  { %3514 = vlog2.f32 %v3128_v50 }
 0xd7f   :  { %v3139_v10 = vsub.f32 %v3107_v14, %v3134_v22 }
 0xd81   :  { %3361 = vmatmul.msk.f32.gmra.mxu2 %vm205_vm1, %v3139_v10 }
 0xd84   :  { %v3515_v40 = vpop.eup %3514 }
 0xd85   :  { %v3136_v5 = vmul.f32 0.6931472, %v3515_v40 }
 0xd87   :  { %v3140_v31 = vsub.f32 %v3108_v33, %v3136_v5 }
 0xd89   :  { %3362 = vmatmul.msk.f32.gmra.mxu2 %vm205_vm1, %v3140_v31 }
 0xdf4   :  { %v3178_v43 = vpop.f32.mrf.mxu2 }
 0xdf5   :  { %v3179_v55 = vadd.f32 %v3417_v41, %v3178_v43 }
 0xdf7   :  { %3190 = vst.msk [vmem:[%s4914_s25] sm:$0xff] %vm126_vm0, %v3179_v55 }
 0xdfc   :  { %v3181_v47 = vpop.f32.mrf.mxu2 }
 0xdfd   :  { %v3182_v48 = vadd.f32 %v3417_v41, %v3181_v47 }
 0xdff   :  { %3191 = vst.msk [vmem:[%s4914_s25 + $0x8] sm:$0xff] %vm126_vm0, %v3182_v48 }
 0xe04   :  { %v3184_v8 = vpop.f32.mrf.mxu2 }
 0xe05   :  { %v3185_v37 = vadd.f32 %v3417_v41, %v3184_v8 }
 0xe07   :  { %3192 = vst.msk [vmem:[%s4914_s25 + $0x10] sm:$0xff] %vm126_vm0, %v3185_v37 }
 0xe0c   :  { %v3187_v44 = vpop.f32.mrf.mxu2 }
 0xe0d   :  { %v3188_v57 = vadd.f32 %v3417_v41, %v3187_v44 }
 0xe0f   :  { %3193 = vst.msk [vmem:[%s4914_s25 + $0x18] sm:$0xff] %vm126_vm0, %v3188_v57 }
 0xe10   :  { %3198 = vsyncpa [#allocation3], 1 }

</bundles_post_ra>
